<compile_context>
chip_gen: v5e
topology: v5e:2x2
jax: 0.10.0
libtpu: 0.0.40
codegen_flags: <defaults>
</compile_context>

<pallas_src>
import functools

import jax
import jax.numpy as jnp
from jax.experimental import pallas as pl
from jax.experimental.pallas import tpu as pltpu


def _round_up(x, m):
    return (x + m - 1) // m * m


def _pick_tile(dim, max_tile, base):
    """Largest base*2^k that divides `dim` and is <= max_tile (>= base)."""
    best = base
    cand = base
    while cand * 2 <= min(dim, max_tile):
        cand *= 2
        if dim % cand == 0:
            best = cand
    return best


def _vmem_limit(block_bytes, scratch_bytes=0):
    """Explicit scoped-VMEM limit: double-buffered blocks + scratch with 2x
    headroom, floored above v5e's 16 MiB default, capped below v7x's 64 MiB
    physical VMEM."""
    est = 2 * block_bytes + scratch_bytes
    return int(min(max(2 * est, 32 * 2**20), 60 * 2**20))


# ---------------------------------------------------------------------------
# Generic tiled matmul + bias kernel (used for x-projection and dense head).
# ---------------------------------------------------------------------------
def _matmul_bias_kernel(x_ref, w_ref, b_ref, o_ref):
    """(tm, K) x (K, tn) + (1, tn) -> (tm, tn)."""
    o_ref[...] = (jnp.dot(x_ref[...], w_ref[...],
                          preferred_element_type=jnp.float32)
                  + b_ref[...]).astype(o_ref.dtype)


def _matmul_bias(x, w, b, out_dtype, *, max_tm=512, max_tn=512):
    """Tiled (M, K) x (K, N) + bias.  M must be a multiple of 8, N of 128.

    Tile sizes are chosen to divide M / N exactly (no padding, no output
    slicing copy).  Grid order is (i outer, j inner) so the x row-tile stays
    resident in VMEM while W is streamed across j.
    """
    M, K = x.shape
    N = w.shape[1]
    tm = _pick_tile(M, max_tm, 8)
    tn = _pick_tile(N, max_tn, 128)

    block_bytes = (tm * K * x.dtype.itemsize
                   + K * tn * w.dtype.itemsize
                   + tn * b.dtype.itemsize
                   + tm * tn * jnp.dtype(out_dtype).itemsize)

    return pl.pallas_call(
        _matmul_bias_kernel,
        out_shape=jax.ShapeDtypeStruct((M, N), out_dtype),
        grid_spec=pltpu.PrefetchScalarGridSpec(
            num_scalar_prefetch=0,
            grid=(M // tm, N // tn),
            in_specs=[
                pl.BlockSpec((tm, K), lambda i, j: (i, 0)),   # x rows (resident over j)
                pl.BlockSpec((K, tn), lambda i, j: (0, j)),   # W tile
                pl.BlockSpec((1, tn), lambda i, j: (0, j)),   # bias tile
            ],
            out_specs=pl.BlockSpec((tm, tn), lambda i, j: (i, j)),
        ),
        compiler_params=pltpu.CompilerParams(
            dimension_semantics=("parallel", "parallel"),
            vmem_limit_bytes=_vmem_limit(block_bytes)),
    )(x, w, b)


# ---------------------------------------------------------------------------
# LSTM recurrence kernel.
# ---------------------------------------------------------------------------
def _lstm_seq_kernel(gx_ref, h0_ref, c0_ref, whh_ref,
                     hseq_ref, hout_ref, cout_ref,
                     h_sc, c_sc, *, steps_per_block, hidden_p, seq_len,
                     seq_pad):
    """One grid step = `steps_per_block` LSTM time steps (statically unrolled).

    gx_ref   : (TB, Bb, 4*Hp) bf16  precomputed x @ W_ih^T + b (time-major)
    h0/c0    : (Bb, Hp)       f32   initial state (read only at time-block 0)
    whh_ref  : (Hp, 4*Hp)     bf16  hidden-to-hidden weights (gate-aligned, T)
    hseq_ref : (Bb, TB, Hp)   bf16  per-step hidden states, stored BATCH-major
    hout/cout: (Bb, Hp)       f32   final state (written on the last time-block)
    h_sc/c_sc: (Bb, Hp)       f32   VMEM scratch carrying the recurrent state
    """
    tb = pl.program_id(1)                   # time-block index (axis 0 = batch split)
    TB = steps_per_block
    Hp = hidden_p

    @pl.when(tb == 0)
    def _():
        h_sc[...] = h0_ref[...]
        c_sc[...] = c0_ref[...]

    whh = whh_ref[...]                      # (Hp, 4Hp) bf16, loaded once per block
    h = h_sc[...]                           # (Bb, Hp) f32
    c = c_sc[...]

    # Only the steps that can actually fall past seq_len pay the masking cost.
    tail_start = (seq_len % TB) if seq_pad != seq_len else TB

    for step in range(TB):                  # fully unrolled, static indices
        gates = (gx_ref[step].astype(jnp.float32)
                 + jnp.dot(h.astype(jnp.bfloat16), whh,
                           preferred_element_type=jnp.float32))  # (Bb, 4Hp) f32
        i_g = jax.nn.sigmoid(gates[:, 0 * Hp:1 * Hp])
        f_g = jax.nn.sigmoid(gates[:, 1 * Hp:2 * Hp])
        g_g = jnp.tanh(gates[:, 2 * Hp:3 * Hp])
        o_g = jax.nn.sigmoid(gates[:, 3 * Hp:4 * Hp])

        c_new = f_g * c + i_g * g_g
        h_new = o_g * jnp.tanh(c_new)

        if step >= tail_start:              # padded steps keep the state
            valid = (tb * TB + step) < seq_len
            c_new = jnp.where(valid, c_new, c)
            h_new = jnp.where(valid, h_new, h)

        h, c = h_new, c_new
        # Batch-major store: one sublane row per batch slab (masked vst).
        hseq_ref[:, step, :] = h_new.astype(hseq_ref.dtype)

    h_sc[...] = h
    c_sc[...] = c

    @pl.when(tb == pl.num_programs(1) - 1)
    def _():
        hout_ref[...] = h_sc[...]
        cout_ref[...] = c_sc[...]


# ---------------------------------------------------------------------------
# Forward wrapper (Pallas equivalent of RNNModule.forward).
# ---------------------------------------------------------------------------
def rnn_module_forward(x_tokens, prev_state, params, *, steps_per_block=16):
    """x_tokens: (B, T) int32; prev_state: (h0, c0) each (1, B, H) f32.

    Returns (logits (B, T, V) f32, (h_n (1, B, H), c_n (1, B, H)) f32).
    TODO(synk): sweep steps_per_block (8/16/32) per TPU generation and check
    the bundle dump for vreg spills at large Hp.
    """
    emb_table = params["embedding"]          # (V, E)
    w_ih = params["w_ih"]                    # (4H, E)
    w_hh = params["w_hh"]                    # (4H, H)
    b_ih = params["b_ih"]                    # (4H,)
    b_hh = params["b_hh"]                    # (4H,)
    w_dense = params["w_dense"]              # (V, H)
    b_dense = params["b_dense"]              # (V,)

    B, T = x_tokens.shape
    V, E = emb_table.shape
    H = w_hh.shape[1]

    if T == 0:  # guard: scratch state would never be initialized
        return (jnp.zeros((B, 0, V), jnp.float32),
                (prev_state[0].astype(jnp.float32),
                 prev_state[1].astype(jnp.float32)))

    # --- padded, lane/sublane-friendly sizes ---
    Bp = _round_up(max(B, 8), 8)             # >= 8 sublanes
    Hp = _round_up(H, 128)                   # lane-aligned gate slices
    Ep = _round_up(E, 128)
    Vp = _round_up(V, 128)                   # lane-dense logits store
    TB = _round_up(min(T, max(steps_per_block, 1)), 8)   # sublane-legal hseq block
    Tp = _round_up(T, TB)

    # v7x: split the independent batch rows across a leading "parallel" axis
    # so the serial time recurrence can use the second TensorCore.
    n_bsplit = 2 if Bp % 16 == 0 else 1
    Bb = Bp // n_bsplit

    # --- embedding gather (bf16, time-major). Token transpose is B*T ints. ---
    embed = jnp.take(emb_table.astype(jnp.bfloat16), x_tokens.T, axis=0)  # (T,B,E)
    embed = jnp.pad(embed, ((0, Tp - T), (0, Bp - B), (0, Ep - E)))

    # Gate-aligned weight layout: each gate owns its own 128-aligned Hp slab,
    # so in-kernel gate slices are free vreg views.
    def _pad_gates(w):                    # (4H, K) -> (4*Hp, Kp)
        K = w.shape[1]
        Kp = _round_up(K, 128)
        w4 = w.reshape(4, H, K)
        w4 = jnp.pad(w4, ((0, 0), (0, Hp - H), (0, Kp - K)))
        return w4.reshape(4 * Hp, Kp)

    wih_t = _pad_gates(w_ih).T.astype(jnp.bfloat16)                # (Ep, 4Hp)
    whh_t = _pad_gates(w_hh).T.astype(jnp.bfloat16)                # (Hp, 4Hp)
    bias = (b_ih + b_hh).reshape(4, H)
    bias = jnp.pad(bias, ((0, 0), (0, Hp - H)))
    bias = bias.reshape(1, 4 * Hp).astype(jnp.float32)

    # --- 1) hoisted input projection: one big MXU matmul over all tokens ---
    # TODO(synk): when T*B >> V, pre-multiply the embedding table instead
    # (gather rows of emb_table @ W_ih^T + b) and skip this matmul entirely.
    gates_x = _matmul_bias(embed.reshape(Tp * Bp, Ep), wih_t, bias,
                           jnp.bfloat16, max_tm=512, max_tn=512)
    gates_x = gates_x.reshape(Tp, Bp, 4 * Hp)                      # time-major

    h0 = jnp.pad(prev_state[0][0].astype(jnp.float32),
                 ((0, Bp - B), (0, Hp - H)))
    c0 = jnp.pad(prev_state[1][0].astype(jnp.float32),
                 ((0, Bp - B), (0, Hp - H)))

    # --- 2) LSTM recurrence: TB time steps per grid iteration ---
    lstm_kernel = functools.partial(
        _lstm_seq_kernel, steps_per_block=TB, hidden_p=Hp,
        seq_len=T, seq_pad=Tp)

    lstm_block_bytes = (TB * Bb * 4 * Hp * 2     # gates_x block (bf16)
                        + 2 * Bb * Hp * 4        # h0, c0
                        + Hp * 4 * Hp * 2        # W_hh^T (bf16, resident)
                        + Bb * TB * Hp * 2       # hseq block (bf16)
                        + 2 * Bb * Hp * 4)       # h_n, c_n
    lstm_scratch_bytes = 2 * Bb * Hp * 4

    grid_spec = pltpu.PrefetchScalarGridSpec(
        num_scalar_prefetch=0,
        grid=(n_bsplit, Tp // TB),
        in_specs=[
            pl.BlockSpec((TB, Bb, 4 * Hp), lambda b, t: (t, b, 0)),  # gates_x
            pl.BlockSpec((Bb, Hp), lambda b, t: (b, 0)),             # h0
            pl.BlockSpec((Bb, Hp), lambda b, t: (b, 0)),             # c0
            # TODO(synk): mark this constant-index block pipeline_mode=
            # pl.Buffered(1) if the compiler double-buffers it (v5e VMEM).
            pl.BlockSpec((Hp, 4 * Hp), lambda b, t: (0, 0)),         # W_hh^T
        ],
        out_specs=[
            pl.BlockSpec((Bb, TB, Hp), lambda b, t: (b, t, 0)),      # h_seq (batch-major)
            pl.BlockSpec((Bb, Hp), lambda b, t: (b, 0)),             # h_n
            pl.BlockSpec((Bb, Hp), lambda b, t: (b, 0)),             # c_n
        ],
        scratch_shapes=[
            pltpu.VMEM((Bb, Hp), jnp.float32),                       # h carry
            pltpu.VMEM((Bb, Hp), jnp.float32),                       # c carry
        ],
    )

    h_seq, h_n, c_n = pl.pallas_call(
        lstm_kernel,
        out_shape=(
            jax.ShapeDtypeStruct((Bp, Tp, Hp), jnp.bfloat16),
            jax.ShapeDtypeStruct((Bp, Hp), jnp.float32),
            jax.ShapeDtypeStruct((Bp, Hp), jnp.float32),
        ),
        grid_spec=grid_spec,
        compiler_params=pltpu.CompilerParams(
            dimension_semantics=("parallel", "arbitrary"),
            vmem_limit_bytes=_vmem_limit(lstm_block_bytes,
                                         lstm_scratch_bytes)),
    )(gates_x, h0, c0, whh_t)

    # --- 3) dense head: (Bp*Tp, Hp) x (Hp, Vp); tm divides M (no pad/copy) ---
    wd_t = jnp.pad(w_dense, ((0, Vp - V), (0, Hp - H))).T.astype(jnp.bfloat16)
    bd = jnp.pad(b_dense, (0, Vp - V)).reshape(1, Vp).astype(jnp.float32)

    h_flat = h_seq.reshape(Bp * Tp, Hp)      # batch-major already: free reshape
    # TODO(synk): emit bf16 logits / fuse the softmax-loss consumer if allowed.
    logits_flat = _matmul_bias(h_flat, wd_t, bd, jnp.float32,
                               max_tm=1024, max_tn=512)

    logits = logits_flat.reshape(Bp, Tp, Vp)[:B, :T, :V]           # (B, T, V)
    h_out = h_n[:B, :H][None, :, :]
    c_out = c_n[:B, :H][None, :, :]
    return logits, (h_out, c_out)


# ---------------------------------------------------------------------------
# Parameter init + pure-JAX reference (for the self-check in __main__).
# ---------------------------------------------------------------------------
def init_params(key, n_vocab, embedding_size, lstm_size):
    """Deterministic init mirroring PyTorch default shapes/inits."""
    H = lstm_size
    k_emb, k1, k2, k3, k4, k5, k6 = jax.random.split(key, 7)
    bound = 1.0 / jnp.sqrt(H)
    return {
        "embedding": jax.random.normal(k_emb, (n_vocab, embedding_size),
                                       jnp.float32),
        "w_ih": jax.random.uniform(k1, (4 * H, embedding_size), jnp.float32,
                                   -bound, bound),
        "w_hh": jax.random.uniform(k2, (4 * H, H), jnp.float32, -bound, bound),
        "b_ih": jax.random.uniform(k3, (4 * H,), jnp.float32, -bound, bound),
        "b_hh": jax.random.uniform(k4, (4 * H,), jnp.float32, -bound, bound),
        "w_dense": jax.random.uniform(k5, (n_vocab, H), jnp.float32,
                                      -bound, bound),
        "b_dense": jax.random.uniform(k6, (n_vocab,), jnp.float32,
                                      -bound, bound),
    }


def _reference_forward(x_tokens, prev_state, params):
    """Pure-JAX f32 reference matching torch.nn.LSTM semantics."""
    H = params["w_hh"].shape[1]
    emb = jnp.take(params["embedding"], x_tokens, axis=0)          # (B, T, E)
    b = params["b_ih"] + params["b_hh"]
    h = prev_state[0][0]
    c = prev_state[1][0]
    hs = []
    for t in range(x_tokens.shape[1]):
        g = emb[:, t, :] @ params["w_ih"].T + h @ params["w_hh"].T + b
        i = jax.nn.sigmoid(g[:, 0 * H:1 * H])
        f = jax.nn.sigmoid(g[:, 1 * H:2 * H])
        gg = jnp.tanh(g[:, 2 * H:3 * H])
        o = jax.nn.sigmoid(g[:, 3 * H:4 * H])
        c = f * c + i * gg
        h = o * jnp.tanh(c)
        hs.append(h)
    out = jnp.stack(hs, axis=1)                                    # (B, T, H)
    logits = out @ params["w_dense"].T + params["b_dense"]
    return logits, (h[None], c[None])


if __name__ == "__main__":
    n_vocab, seq_size, embedding_size, lstm_size = 50, 8, 16, 32
    batch = 2

    key = jax.random.PRNGKey(0)
    k_params, k_tokens = jax.random.split(key)
    params = init_params(k_params, n_vocab, embedding_size, lstm_size)

    x = jax.random.randint(k_tokens, (batch, seq_size), 0, n_vocab, jnp.int32)
    # zero_state(batch)
    prev_state = (jnp.zeros((1, batch, lstm_size), jnp.float32),
                  jnp.zeros((1, batch, lstm_size), jnp.float32))

    fwd = jax.jit(rnn_module_forward)
    logits, (h_n, c_n) = fwd(x, prev_state, params)
    jax.block_until_ready((logits, h_n, c_n))

    assert logits.shape == (batch, seq_size, n_vocab)
    assert h_n.shape == (1, batch, lstm_size)
    assert c_n.shape == (1, batch, lstm_size)
    assert bool(jnp.all(jnp.isfinite(logits)))

    # Loose tolerance: kernel uses bf16 MXU operands / bf16 gate pre-activations,
    # reference is pure f32.
    ref_logits, (ref_h, ref_c) = _reference_forward(x, prev_state, params)
    assert float(jnp.max(jnp.abs(logits - ref_logits))) < 1e-1
    assert float(jnp.max(jnp.abs(h_n - ref_h))) < 1e-1
    assert float(jnp.max(jnp.abs(c_n - ref_c))) < 1e-1

    print("KERNEL_OK")
</pallas_src>

<mosaic_0001>
module attributes {stable_mosaic.version = 11 : i64} {
  func.func @_matmul_bias_kernel(%arg0: i32, %arg1: i32, %arg2: memref<64x128xbf16, #tpu.memory_space<vmem>>, %arg3: memref<128x512xbf16, #tpu.memory_space<vmem>>, %arg4: memref<1x512xf32, #tpu.memory_space<vmem>>, %arg5: memref<64x512xbf16, #tpu.memory_space<vmem>>) attributes {dimension_semantics = [#tpu.dimension_semantics<parallel>, #tpu.dimension_semantics<parallel>], iteration_bounds = array<i64: 1, 1>, scalar_prefetch = 0 : i64, scratch_operands = 0 : i64, tpu.core_type = #tpu.core_type<tc>, window_params = [{transform_indices = @transform_0, window_bounds = array<i64: 64, 128>}, {transform_indices = @transform_1, window_bounds = array<i64: 128, 512>}, {transform_indices = @transform_2, window_bounds = array<i64: 1, 512>}, {transform_indices = @transform_3, window_bounds = array<i64: 64, 512>}]} {
    %c0 = arith.constant 0 : index
    %c0_0 = arith.constant 0 : index
    %0 = vector.load %arg2[%c0, %c0_0] : memref<64x128xbf16, #tpu.memory_space<vmem>>, vector<64x128xbf16>
    %c0_1 = arith.constant 0 : index
    %c0_2 = arith.constant 0 : index
    %1 = vector.load %arg3[%c0_1, %c0_2] : memref<128x512xbf16, #tpu.memory_space<vmem>>, vector<128x512xbf16>
    %cst = arith.constant dense<0.000000e+00> : vector<64x512xf32>
    %2 = tpu.matmul %0, %1, %cst {dimension_numbers = #tpu.dot_dimension_numbers<[1], [0], [0], [1], [0, 0, 1, 1], [], []>} : vector<64x128xbf16>, vector<128x512xbf16>, vector<64x512xf32> -> vector<64x512xf32>
    %c0_3 = arith.constant 0 : index
    %c0_4 = arith.constant 0 : index
    %3 = vector.load %arg4[%c0_3, %c0_4] : memref<1x512xf32, #tpu.memory_space<vmem>>, vector<1x512xf32>
    %4 = vector.broadcast %3 : vector<1x512xf32> to vector<64x512xf32>
    %5 = arith.addf %2, %4 : vector<64x512xf32>
    %6 = arith.truncf %5 : vector<64x512xf32> to vector<64x512xbf16>
    %c0_5 = arith.constant 0 : index
    %c0_6 = arith.constant 0 : index
    %7 = vector.load %arg5[%c0_5, %c0_6] : memref<64x512xbf16, #tpu.memory_space<vmem>>, vector<64x512xbf16>
    tpu.vector_store %arg5[%c0_5, %c0_6], %6 {strides = array<i32>} : memref<64x512xbf16, #tpu.memory_space<vmem>>, vector<64x512xbf16>,
    return
  }
  func.func @transform_0(%arg0: i32, %arg1: i32) -> (i32, i32) {
    %c0_i32 = arith.constant 0 : i32
    %c0_i32_0 = arith.constant 0 : i32
    return %arg0, %c0_i32 : i32, i32
  }
  func.func @transform_1(%arg0: i32, %arg1: i32) -> (i32, i32) {
    %c0_i32 = arith.constant 0 : i32
    %c0_i32_0 = arith.constant 0 : i32
    return %c0_i32, %arg1 : i32, i32
  }
  func.func @transform_2(%arg0: i32, %arg1: i32) -> (i32, i32) {
    %c0_i32 = arith.constant 0 : i32
    %c0_i32_0 = arith.constant 0 : i32
    return %c0_i32, %arg1 : i32, i32
  }
  func.func @transform_3(%arg0: i32, %arg1: i32) -> (i32, i32) {
    %c0_i32 = arith.constant 0 : i32
    return %arg0, %arg1 : i32, i32
  }
}

module attributes {stable_mosaic.version = 11 : i64} {
  func.func @_lstm_seq_kernel(%arg0: i32, %arg1: i32, %arg2: memref<8x8x512xbf16, #tpu.memory_space<vmem>>, %arg3: memref<8x128xf32, #tpu.memory_space<vmem>>, %arg4: memref<8x128xf32, #tpu.memory_space<vmem>>, %arg5: memref<128x512xbf16, #tpu.memory_space<vmem>>, %arg6: memref<8x8x128xbf16, #tpu.memory_space<vmem>>, %arg7: memref<8x128xf32, #tpu.memory_space<vmem>>, %arg8: memref<8x128xf32, #tpu.memory_space<vmem>>, %arg9: memref<8x128xf32, #tpu.memory_space<vmem>>, %arg10: memref<8x128xf32, #tpu.memory_space<vmem>>) attributes {dimension_semantics = [#tpu.dimension_semantics<parallel>, #tpu.dimension_semantics<arbitrary>], iteration_bounds = array<i64: 1, 1>, scalar_prefetch = 0 : i64, scratch_operands = 2 : i64, tpu.core_type = #tpu.core_type<tc>, window_params = [{transform_indices = @transform_0, window_bounds = array<i64: 8, 8, 512>}, {transform_indices = @transform_1, window_bounds = array<i64: 8, 128>}, {transform_indices = @transform_2, window_bounds = array<i64: 8, 128>}, {pipeline_mode = #tpu.pipeline_mode<synchronous>, transform_indices = @transform_3, window_bounds = array<i64: 128, 512>}, {transform_indices = @transform_4, window_bounds = array<i64: 8, 8, 128>}, {transform_indices = @transform_5, window_bounds = array<i64: 8, 128>}, {transform_indices = @transform_6, window_bounds = array<i64: 8, 128>}]} {
    %c0_i32 = arith.constant 0 : i32
    %0 = arith.cmpi eq, %arg1, %c0_i32 : i32
    %1 = arith.extui %0 : i1 to i32
    %c0_i32_0 = arith.constant 0 : i32
    %2 = arith.cmpi ne, %1, %c0_i32_0 : i32
    scf.if %2 {
      %c0_84 = arith.constant 0 : index
      %c0_85 = arith.constant 0 : index
      %291 = vector.load %arg3[%c0_84, %c0_85] : memref<8x128xf32, #tpu.memory_space<vmem>>, vector<8x128xf32>
      %c0_86 = arith.constant 0 : index
      %c0_87 = arith.constant 0 : index
      %292 = vector.load %arg9[%c0_86, %c0_87] : memref<8x128xf32, #tpu.memory_space<vmem>>, vector<8x128xf32>
      tpu.vector_store %arg9[%c0_86, %c0_87], %291 {strides = array<i32>} : memref<8x128xf32, #tpu.memory_space<vmem>>, vector<8x128xf32>,
      %c0_88 = arith.constant 0 : index
      %c0_89 = arith.constant 0 : index
      %293 = vector.load %arg4[%c0_88, %c0_89] : memref<8x128xf32, #tpu.memory_space<vmem>>, vector<8x128xf32>
      %c0_90 = arith.constant 0 : index
      %c0_91 = arith.constant 0 : index
      %294 = vector.load %arg10[%c0_90, %c0_91] : memref<8x128xf32, #tpu.memory_space<vmem>>, vector<8x128xf32>
      tpu.vector_store %arg10[%c0_90, %c0_91], %293 {strides = array<i32>} : memref<8x128xf32, #tpu.memory_space<vmem>>, vector<8x128xf32>,
    } else {
    }
    %c0 = arith.constant 0 : index
    %c0_1 = arith.constant 0 : index
    %3 = vector.load %arg5[%c0, %c0_1] : memref<128x512xbf16, #tpu.memory_space<vmem>>, vector<128x512xbf16>
    %c0_2 = arith.constant 0 : index
    %c0_3 = arith.constant 0 : index
    %4 = vector.load %arg9[%c0_2, %c0_3] : memref<8x128xf32, #tpu.memory_space<vmem>>, vector<8x128xf32>
    %c0_4 = arith.constant 0 : index
    %c0_5 = arith.constant 0 : index
    %5 = vector.load %arg10[%c0_4, %c0_5] : memref<8x128xf32, #tpu.memory_space<vmem>>, vector<8x128xf32>
    %c0_6 = arith.constant 0 : index
    %c0_7 = arith.constant 0 : index
    %c0_8 = arith.constant 0 : index
    %6 = vector.load %arg2[%c0_6, %c0_7, %c0_8] : memref<8x8x512xbf16, #tpu.memory_space<vmem>>, vector<1x8x512xbf16>
    %7 = vector.shape_cast %6 : vector<1x8x512xbf16> to vector<8x512xbf16>
    %8 = arith.extf %7 : vector<8x512xbf16> to vector<8x512xf32>
    %9 = arith.truncf %4 : vector<8x128xf32> to vector<8x128xbf16>
    %cst = arith.constant dense<0.000000e+00> : vector<8x512xf32>
    %10 = tpu.matmul %9, %3, %cst {dimension_numbers = #tpu.dot_dimension_numbers<[1], [0], [0], [1], [0, 0, 1, 1], [], []>} : vector<8x128xbf16>, vector<128x512xbf16>, vector<8x512xf32> -> vector<8x512xf32>
    %11 = arith.addf %8, %10 : vector<8x512xf32>
    %12 = vector.extract_strided_slice %11 {offsets = [0, 0], sizes = [8, 128], strides = [1, 1]} : vector<8x512xf32> to vector<8x128xf32>
    %13 = arith.negf %12 : vector<8x128xf32>
    %14 = math.exp %13 : vector<8x128xf32>
    %cst_9 = arith.constant 1.000000e+00 : f32
    %15 = vector.broadcast %cst_9 : f32 to vector<8x128xf32>
    %16 = arith.addf %15, %14 : vector<8x128xf32>
    %17 = arith.divf %15, %16 : vector<8x128xf32>
    %18 = vector.extract_strided_slice %11 {offsets = [0, 128], sizes = [8, 128], strides = [1, 1]} : vector<8x512xf32> to vector<8x128xf32>
    %19 = arith.negf %18 : vector<8x128xf32>
    %20 = math.exp %19 : vector<8x128xf32>
    %cst_10 = arith.constant 1.000000e+00 : f32
    %21 = vector.broadcast %cst_10 : f32 to vector<8x128xf32>
    %22 = arith.addf %21, %20 : vector<8x128xf32>
    %23 = arith.divf %21, %22 : vector<8x128xf32>
    %24 = vector.extract_strided_slice %11 {offsets = [0, 256], sizes = [8, 128], strides = [1, 1]} : vector<8x512xf32> to vector<8x128xf32>
    %25 = math.tanh %24 : vector<8x128xf32>
    %26 = vector.extract_strided_slice %11 {offsets = [0, 384], sizes = [8, 128], strides = [1, 1]} : vector<8x512xf32> to vector<8x128xf32>
    %27 = arith.negf %26 : vector<8x128xf32>
    %28 = math.exp %27 : vector<8x128xf32>
    %cst_11 = arith.constant 1.000000e+00 : f32
    %29 = vector.broadcast %cst_11 : f32 to vector<8x128xf32>
    %30 = arith.addf %29, %28 : vector<8x128xf32>
    %31 = arith.divf %29, %30 : vector<8x128xf32>
    %32 = arith.mulf %23, %5 : vector<8x128xf32>
    %33 = arith.mulf %17, %25 : vector<8x128xf32>
    %34 = arith.addf %32, %33 : vector<8x128xf32>
    %35 = math.tanh %34 : vector<8x128xf32>
    %36 = arith.mulf %31, %35 : vector<8x128xf32>
    %37 = arith.truncf %36 : vector<8x128xf32> to vector<8x128xbf16>
    %c0_12 = arith.constant 0 : index
    %c0_13 = arith.constant 0 : index
    %c0_14 = arith.constant 0 : index
    %38 = vector.load %arg6[%c0_12, %c0_13, %c0_14] : memref<8x8x128xbf16, #tpu.memory_space<vmem>>, vector<8x1x128xbf16>
    %39 = vector.shape_cast %38 : vector<8x1x128xbf16> to vector<8x128xbf16>
    %40 = vector.shape_cast %37 : vector<8x128xbf16> to vector<8x1x128xbf16>
    tpu.vector_store %arg6[%c0_12, %c0_13, %c0_14], %40 {strides = array<i32>} : memref<8x8x128xbf16, #tpu.memory_space<vmem>>, vector<8x1x128xbf16>,
    %c1 = arith.constant 1 : index
    %c0_15 = arith.constant 0 : index
    %c0_16 = arith.constant 0 : index
    %41 = vector.load %arg2[%c1, %c0_15, %c0_16] : memref<8x8x512xbf16, #tpu.memory_space<vmem>>, vector<1x8x512xbf16>
    %42 = vector.shape_cast %41 : vector<1x8x512xbf16> to vector<8x512xbf16>
    %43 = arith.extf %42 : vector<8x512xbf16> to vector<8x512xf32>
    %44 = arith.truncf %36 : vector<8x128xf32> to vector<8x128xbf16>
    %cst_17 = arith.constant dense<0.000000e+00> : vector<8x512xf32>
    %45 = tpu.matmul %44, %3, %cst_17 {dimension_numbers = #tpu.dot_dimension_numbers<[1], [0], [0], [1], [0, 0, 1, 1], [], []>} : vector<8x128xbf16>, vector<128x512xbf16>, vector<8x512xf32> -> vector<8x512xf32>
    %46 = arith.addf %43, %45 : vector<8x512xf32>
    %47 = vector.extract_strided_slice %46 {offsets = [0, 0], sizes = [8, 128], strides = [1, 1]} : vector<8x512xf32> to vector<8x128xf32>
    %48 = arith.negf %47 : vector<8x128xf32>
    %49 = math.exp %48 : vector<8x128xf32>
    %cst_18 = arith.constant 1.000000e+00 : f32
    %50 = vector.broadcast %cst_18 : f32 to vector<8x128xf32>
    %51 = arith.addf %50, %49 : vector<8x128xf32>
    %52 = arith.divf %50, %51 : vector<8x128xf32>
    %53 = vector.extract_strided_slice %46 {offsets = [0, 128], sizes = [8, 128], strides = [1, 1]} : vector<8x512xf32> to vector<8x128xf32>
    %54 = arith.negf %53 : vector<8x128xf32>
    %55 = math.exp %54 : vector<8x128xf32>
    %cst_19 = arith.constant 1.000000e+00 : f32
    %56 = vector.broadcast %cst_19 : f32 to vector<8x128xf32>
    %57 = arith.addf %56, %55 : vector<8x128xf32>
    %58 = arith.divf %56, %57 : vector<8x128xf32>
    %59 = vector.extract_strided_slice %46 {offsets = [0, 256], sizes = [8, 128], strides = [1, 1]} : vector<8x512xf32> to vector<8x128xf32>
    %60 = math.tanh %59 : vector<8x128xf32>
    %61 = vector.extract_strided_slice %46 {offsets = [0, 384], sizes = [8, 128], strides = [1, 1]} : vector<8x512xf32> to vector<8x128xf32>
    %62 = arith.negf %61 : vector<8x128xf32>
    %63 = math.exp %62 : vector<8x128xf32>
    %cst_20 = arith.constant 1.000000e+00 : f32
    %64 = vector.broadcast %cst_20 : f32 to vector<8x128xf32>
    %65 = arith.addf %64, %63 : vector<8x128xf32>
    %66 = arith.divf %64, %65 : vector<8x128xf32>
    %67 = arith.mulf %58, %34 : vector<8x128xf32>
    %68 = arith.mulf %52, %60 : vector<8x128xf32>
    %69 = arith.addf %67, %68 : vector<8x128xf32>
    %70 = math.tanh %69 : vector<8x128xf32>
    %71 = arith.mulf %66, %70 : vector<8x128xf32>
    %72 = arith.truncf %71 : vector<8x128xf32> to vector<8x128xbf16>
    %c0_21 = arith.constant 0 : index
    %c1_22 = arith.constant 1 : index
    %c0_23 = arith.constant 0 : index
    %73 = vector.load %arg6[%c0_21, %c1_22, %c0_23] : memref<8x8x128xbf16, #tpu.memory_space<vmem>>, vector<8x1x128xbf16>
    %74 = vector.shape_cast %73 : vector<8x1x128xbf16> to vector<8x128xbf16>
    %75 = vector.shape_cast %72 : vector<8x128xbf16> to vector<8x1x128xbf16>
    tpu.vector_store %arg6[%c0_21, %c1_22, %c0_23], %75 {strides = array<i32>} : memref<8x8x128xbf16, #tpu.memory_space<vmem>>, vector<8x1x128xbf16>,
    %c2 = arith.constant 2 : index
    %c0_24 = arith.constant 0 : index
    %c0_25 = arith.constant 0 : index
    %76 = vector.load %arg2[%c2, %c0_24, %c0_25] : memref<8x8x512xbf16, #tpu.memory_space<vmem>>, vector<1x8x512xbf16>
    %77 = vector.shape_cast %76 : vector<1x8x512xbf16> to vector<8x512xbf16>
    %78 = arith.extf %77 : vector<8x512xbf16> to vector<8x512xf32>
    %79 = arith.truncf %71 : vector<8x128xf32> to vector<8x128xbf16>
    %cst_26 = arith.constant dense<0.000000e+00> : vector<8x512xf32>
    %80 = tpu.matmul %79, %3, %cst_26 {dimension_numbers = #tpu.dot_dimension_numbers<[1], [0], [0], [1], [0, 0, 1, 1], [], []>} : vector<8x128xbf16>, vector<128x512xbf16>, vector<8x512xf32> -> vector<8x512xf32>
    %81 = arith.addf %78, %80 : vector<8x512xf32>
    %82 = vector.extract_strided_slice %81 {offsets = [0, 0], sizes = [8, 128], strides = [1, 1]} : vector<8x512xf32> to vector<8x128xf32>
    %83 = arith.negf %82 : vector<8x128xf32>
    %84 = math.exp %83 : vector<8x128xf32>
    %cst_27 = arith.constant 1.000000e+00 : f32
    %85 = vector.broadcast %cst_27 : f32 to vector<8x128xf32>
    %86 = arith.addf %85, %84 : vector<8x128xf32>
    %87 = arith.divf %85, %86 : vector<8x128xf32>
    %88 = vector.extract_strided_slice %81 {offsets = [0, 128], sizes = [8, 128], strides = [1, 1]} : vector<8x512xf32> to vector<8x128xf32>
    %89 = arith.negf %88 : vector<8x128xf32>
    %90 = math.exp %89 : vector<8x128xf32>
    %cst_28 = arith.constant 1.000000e+00 : f32
    %91 = vector.broadcast %cst_28 : f32 to vector<8x128xf32>
    %92 = arith.addf %91, %90 : vector<8x128xf32>
    %93 = arith.divf %91, %92 : vector<8x128xf32>
    %94 = vector.extract_strided_slice %81 {offsets = [0, 256], sizes = [8, 128], strides = [1, 1]} : vector<8x512xf32> to vector<8x128xf32>
    %95 = math.tanh %94 : vector<8x128xf32>
    %96 = vector.extract_strided_slice %81 {offsets = [0, 384], sizes = [8, 128], strides = [1, 1]} : vector<8x512xf32> to vector<8x128xf32>
    %97 = arith.negf %96 : vector<8x128xf32>
    %98 = math.exp %97 : vector<8x128xf32>
    %cst_29 = arith.constant 1.000000e+00 : f32
    %99 = vector.broadcast %cst_29 : f32 to vector<8x128xf32>
    %100 = arith.addf %99, %98 : vector<8x128xf32>
    %101 = arith.divf %99, %100 : vector<8x128xf32>
    %102 = arith.mulf %93, %69 : vector<8x128xf32>
    %103 = arith.mulf %87, %95 : vector<8x128xf32>
    %104 = arith.addf %102, %103 : vector<8x128xf32>
    %105 = math.tanh %104 : vector<8x128xf32>
    %106 = arith.mulf %101, %105 : vector<8x128xf32>
    %107 = arith.truncf %106 : vector<8x128xf32> to vector<8x128xbf16>
    %c0_30 = arith.constant 0 : index
    %c2_31 = arith.constant 2 : index
    %c0_32 = arith.constant 0 : index
    %108 = vector.load %arg6[%c0_30, %c2_31, %c0_32] : memref<8x8x128xbf16, #tpu.memory_space<vmem>>, vector<8x1x128xbf16>
    %109 = vector.shape_cast %108 : vector<8x1x128xbf16> to vector<8x128xbf16>
    %110 = vector.shape_cast %107 : vector<8x128xbf16> to vector<8x1x128xbf16>
    tpu.vector_store %arg6[%c0_30, %c2_31, %c0_32], %110 {strides = array<i32>} : memref<8x8x128xbf16, #tpu.memory_space<vmem>>, vector<8x1x128xbf16>,
    %c3 = arith.constant 3 : index
    %c0_33 = arith.constant 0 : index
    %c0_34 = arith.constant 0 : index
    %111 = vector.load %arg2[%c3, %c0_33, %c0_34] : memref<8x8x512xbf16, #tpu.memory_space<vmem>>, vector<1x8x512xbf16>
    %112 = vector.shape_cast %111 : vector<1x8x512xbf16> to vector<8x512xbf16>
    %113 = arith.extf %112 : vector<8x512xbf16> to vector<8x512xf32>
    %114 = arith.truncf %106 : vector<8x128xf32> to vector<8x128xbf16>
    %cst_35 = arith.constant dense<0.000000e+00> : vector<8x512xf32>
    %115 = tpu.matmul %114, %3, %cst_35 {dimension_numbers = #tpu.dot_dimension_numbers<[1], [0], [0], [1], [0, 0, 1, 1], [], []>} : vector<8x128xbf16>, vector<128x512xbf16>, vector<8x512xf32> -> vector<8x512xf32>
    %116 = arith.addf %113, %115 : vector<8x512xf32>
    %117 = vector.extract_strided_slice %116 {offsets = [0, 0], sizes = [8, 128], strides = [1, 1]} : vector<8x512xf32> to vector<8x128xf32>
    %118 = arith.negf %117 : vector<8x128xf32>
    %119 = math.exp %118 : vector<8x128xf32>
    %cst_36 = arith.constant 1.000000e+00 : f32
    %120 = vector.broadcast %cst_36 : f32 to vector<8x128xf32>
    %121 = arith.addf %120, %119 : vector<8x128xf32>
    %122 = arith.divf %120, %121 : vector<8x128xf32>
    %123 = vector.extract_strided_slice %116 {offsets = [0, 128], sizes = [8, 128], strides = [1, 1]} : vector<8x512xf32> to vector<8x128xf32>
    %124 = arith.negf %123 : vector<8x128xf32>
    %125 = math.exp %124 : vector<8x128xf32>
    %cst_37 = arith.constant 1.000000e+00 : f32
    %126 = vector.broadcast %cst_37 : f32 to vector<8x128xf32>
    %127 = arith.addf %126, %125 : vector<8x128xf32>
    %128 = arith.divf %126, %127 : vector<8x128xf32>
    %129 = vector.extract_strided_slice %116 {offsets = [0, 256], sizes = [8, 128], strides = [1, 1]} : vector<8x512xf32> to vector<8x128xf32>
    %130 = math.tanh %129 : vector<8x128xf32>
    %131 = vector.extract_strided_slice %116 {offsets = [0, 384], sizes = [8, 128], strides = [1, 1]} : vector<8x512xf32> to vector<8x128xf32>
    %132 = arith.negf %131 : vector<8x128xf32>
    %133 = math.exp %132 : vector<8x128xf32>
    %cst_38 = arith.constant 1.000000e+00 : f32
    %134 = vector.broadcast %cst_38 : f32 to vector<8x128xf32>
    %135 = arith.addf %134, %133 : vector<8x128xf32>
    %136 = arith.divf %134, %135 : vector<8x128xf32>
    %137 = arith.mulf %128, %104 : vector<8x128xf32>
    %138 = arith.mulf %122, %130 : vector<8x128xf32>
    %139 = arith.addf %137, %138 : vector<8x128xf32>
    %140 = math.tanh %139 : vector<8x128xf32>
    %141 = arith.mulf %136, %140 : vector<8x128xf32>
    %142 = arith.truncf %141 : vector<8x128xf32> to vector<8x128xbf16>
    %c0_39 = arith.constant 0 : index
    %c3_40 = arith.constant 3 : index
    %c0_41 = arith.constant 0 : index
    %143 = vector.load %arg6[%c0_39, %c3_40, %c0_41] : memref<8x8x128xbf16, #tpu.memory_space<vmem>>, vector<8x1x128xbf16>
    %144 = vector.shape_cast %143 : vector<8x1x128xbf16> to vector<8x128xbf16>
    %145 = vector.shape_cast %142 : vector<8x128xbf16> to vector<8x1x128xbf16>
    tpu.vector_store %arg6[%c0_39, %c3_40, %c0_41], %145 {strides = array<i32>} : memref<8x8x128xbf16, #tpu.memory_space<vmem>>, vector<8x1x128xbf16>,
    %c4 = arith.constant 4 : index
    %c0_42 = arith.constant 0 : index
    %c0_43 = arith.constant 0 : index
    %146 = vector.load %arg2[%c4, %c0_42, %c0_43] : memref<8x8x512xbf16, #tpu.memory_space<vmem>>, vector<1x8x512xbf16>
    %147 = vector.shape_cast %146 : vector<1x8x512xbf16> to vector<8x512xbf16>
    %148 = arith.extf %147 : vector<8x512xbf16> to vector<8x512xf32>
    %149 = arith.truncf %141 : vector<8x128xf32> to vector<8x128xbf16>
    %cst_44 = arith.constant dense<0.000000e+00> : vector<8x512xf32>
    %150 = tpu.matmul %149, %3, %cst_44 {dimension_numbers = #tpu.dot_dimension_numbers<[1], [0], [0], [1], [0, 0, 1, 1], [], []>} : vector<8x128xbf16>, vector<128x512xbf16>, vector<8x512xf32> -> vector<8x512xf32>
    %151 = arith.addf %148, %150 : vector<8x512xf32>
    %152 = vector.extract_strided_slice %151 {offsets = [0, 0], sizes = [8, 128], strides = [1, 1]} : vector<8x512xf32> to vector<8x128xf32>
    %153 = arith.negf %152 : vector<8x128xf32>
    %154 = math.exp %153 : vector<8x128xf32>
    %cst_45 = arith.constant 1.000000e+00 : f32
    %155 = vector.broadcast %cst_45 : f32 to vector<8x128xf32>
    %156 = arith.addf %155, %154 : vector<8x128xf32>
    %157 = arith.divf %155, %156 : vector<8x128xf32>
    %158 = vector.extract_strided_slice %151 {offsets = [0, 128], sizes = [8, 128], strides = [1, 1]} : vector<8x512xf32> to vector<8x128xf32>
    %159 = arith.negf %158 : vector<8x128xf32>
    %160 = math.exp %159 : vector<8x128xf32>
    %cst_46 = arith.constant 1.000000e+00 : f32
    %161 = vector.broadcast %cst_46 : f32 to vector<8x128xf32>
    %162 = arith.addf %161, %160 : vector<8x128xf32>
    %163 = arith.divf %161, %162 : vector<8x128xf32>
    %164 = vector.extract_strided_slice %151 {offsets = [0, 256], sizes = [8, 128], strides = [1, 1]} : vector<8x512xf32> to vector<8x128xf32>
    %165 = math.tanh %164 : vector<8x128xf32>
    %166 = vector.extract_strided_slice %151 {offsets = [0, 384], sizes = [8, 128], strides = [1, 1]} : vector<8x512xf32> to vector<8x128xf32>
    %167 = arith.negf %166 : vector<8x128xf32>
    %168 = math.exp %167 : vector<8x128xf32>
    %cst_47 = arith.constant 1.000000e+00 : f32
    %169 = vector.broadcast %cst_47 : f32 to vector<8x128xf32>
    %170 = arith.addf %169, %168 : vector<8x128xf32>
    %171 = arith.divf %169, %170 : vector<8x128xf32>
    %172 = arith.mulf %163, %139 : vector<8x128xf32>
    %173 = arith.mulf %157, %165 : vector<8x128xf32>
    %174 = arith.addf %172, %173 : vector<8x128xf32>
    %175 = math.tanh %174 : vector<8x128xf32>
    %176 = arith.mulf %171, %175 : vector<8x128xf32>
    %177 = arith.truncf %176 : vector<8x128xf32> to vector<8x128xbf16>
    %c0_48 = arith.constant 0 : index
    %c4_49 = arith.constant 4 : index
    %c0_50 = arith.constant 0 : index
    %178 = vector.load %arg6[%c0_48, %c4_49, %c0_50] : memref<8x8x128xbf16, #tpu.memory_space<vmem>>, vector<8x1x128xbf16>
    %179 = vector.shape_cast %178 : vector<8x1x128xbf16> to vector<8x128xbf16>
    %180 = vector.shape_cast %177 : vector<8x128xbf16> to vector<8x1x128xbf16>
    tpu.vector_store %arg6[%c0_48, %c4_49, %c0_50], %180 {strides = array<i32>} : memref<8x8x128xbf16, #tpu.memory_space<vmem>>, vector<8x1x128xbf16>,
    %c5 = arith.constant 5 : index
    %c0_51 = arith.constant 0 : index
    %c0_52 = arith.constant 0 : index
    %181 = vector.load %arg2[%c5, %c0_51, %c0_52] : memref<8x8x512xbf16, #tpu.memory_space<vmem>>, vector<1x8x512xbf16>
    %182 = vector.shape_cast %181 : vector<1x8x512xbf16> to vector<8x512xbf16>
    %183 = arith.extf %182 : vector<8x512xbf16> to vector<8x512xf32>
    %184 = arith.truncf %176 : vector<8x128xf32> to vector<8x128xbf16>
    %cst_53 = arith.constant dense<0.000000e+00> : vector<8x512xf32>
    %185 = tpu.matmul %184, %3, %cst_53 {dimension_numbers = #tpu.dot_dimension_numbers<[1], [0], [0], [1], [0, 0, 1, 1], [], []>} : vector<8x128xbf16>, vector<128x512xbf16>, vector<8x512xf32> -> vector<8x512xf32>
    %186 = arith.addf %183, %185 : vector<8x512xf32>
    %187 = vector.extract_strided_slice %186 {offsets = [0, 0], sizes = [8, 128], strides = [1, 1]} : vector<8x512xf32> to vector<8x128xf32>
    %188 = arith.negf %187 : vector<8x128xf32>
    %189 = math.exp %188 : vector<8x128xf32>
    %cst_54 = arith.constant 1.000000e+00 : f32
    %190 = vector.broadcast %cst_54 : f32 to vector<8x128xf32>
    %191 = arith.addf %190, %189 : vector<8x128xf32>
    %192 = arith.divf %190, %191 : vector<8x128xf32>
    %193 = vector.extract_strided_slice %186 {offsets = [0, 128], sizes = [8, 128], strides = [1, 1]} : vector<8x512xf32> to vector<8x128xf32>
    %194 = arith.negf %193 : vector<8x128xf32>
    %195 = math.exp %194 : vector<8x128xf32>
    %cst_55 = arith.constant 1.000000e+00 : f32
    %196 = vector.broadcast %cst_55 : f32 to vector<8x128xf32>
    %197 = arith.addf %196, %195 : vector<8x128xf32>
    %198 = arith.divf %196, %197 : vector<8x128xf32>
    %199 = vector.extract_strided_slice %186 {offsets = [0, 256], sizes = [8, 128], strides = [1, 1]} : vector<8x512xf32> to vector<8x128xf32>
    %200 = math.tanh %199 : vector<8x128xf32>
    %201 = vector.extract_strided_slice %186 {offsets = [0, 384], sizes = [8, 128], strides = [1, 1]} : vector<8x512xf32> to vector<8x128xf32>
    %202 = arith.negf %201 : vector<8x128xf32>
    %203 = math.exp %202 : vector<8x128xf32>
    %cst_56 = arith.constant 1.000000e+00 : f32
    %204 = vector.broadcast %cst_56 : f32 to vector<8x128xf32>
    %205 = arith.addf %204, %203 : vector<8x128xf32>
    %206 = arith.divf %204, %205 : vector<8x128xf32>
    %207 = arith.mulf %198, %174 : vector<8x128xf32>
    %208 = arith.mulf %192, %200 : vector<8x128xf32>
    %209 = arith.addf %207, %208 : vector<8x128xf32>
    %210 = math.tanh %209 : vector<8x128xf32>
    %211 = arith.mulf %206, %210 : vector<8x128xf32>
    %212 = arith.truncf %211 : vector<8x128xf32> to vector<8x128xbf16>
    %c0_57 = arith.constant 0 : index
    %c5_58 = arith.constant 5 : index
    %c0_59 = arith.constant 0 : index
    %213 = vector.load %arg6[%c0_57, %c5_58, %c0_59] : memref<8x8x128xbf16, #tpu.memory_space<vmem>>, vector<8x1x128xbf16>
    %214 = vector.shape_cast %213 : vector<8x1x128xbf16> to vector<8x128xbf16>
    %215 = vector.shape_cast %212 : vector<8x128xbf16> to vector<8x1x128xbf16>
    tpu.vector_store %arg6[%c0_57, %c5_58, %c0_59], %215 {strides = array<i32>} : memref<8x8x128xbf16, #tpu.memory_space<vmem>>, vector<8x1x128xbf16>,
    %c6 = arith.constant 6 : index
    %c0_60 = arith.constant 0 : index
    %c0_61 = arith.constant 0 : index
    %216 = vector.load %arg2[%c6, %c0_60, %c0_61] : memref<8x8x512xbf16, #tpu.memory_space<vmem>>, vector<1x8x512xbf16>
    %217 = vector.shape_cast %216 : vector<1x8x512xbf16> to vector<8x512xbf16>
    %218 = arith.extf %217 : vector<8x512xbf16> to vector<8x512xf32>
    %219 = arith.truncf %211 : vector<8x128xf32> to vector<8x128xbf16>
    %cst_62 = arith.constant dense<0.000000e+00> : vector<8x512xf32>
    %220 = tpu.matmul %219, %3, %cst_62 {dimension_numbers = #tpu.dot_dimension_numbers<[1], [0], [0], [1], [0, 0, 1, 1], [], []>} : vector<8x128xbf16>, vector<128x512xbf16>, vector<8x512xf32> -> vector<8x512xf32>
    %221 = arith.addf %218, %220 : vector<8x512xf32>
    %222 = vector.extract_strided_slice %221 {offsets = [0, 0], sizes = [8, 128], strides = [1, 1]} : vector<8x512xf32> to vector<8x128xf32>
    %223 = arith.negf %222 : vector<8x128xf32>
    %224 = math.exp %223 : vector<8x128xf32>
    %cst_63 = arith.constant 1.000000e+00 : f32
    %225 = vector.broadcast %cst_63 : f32 to vector<8x128xf32>
    %226 = arith.addf %225, %224 : vector<8x128xf32>
    %227 = arith.divf %225, %226 : vector<8x128xf32>
    %228 = vector.extract_strided_slice %221 {offsets = [0, 128], sizes = [8, 128], strides = [1, 1]} : vector<8x512xf32> to vector<8x128xf32>
    %229 = arith.negf %228 : vector<8x128xf32>
    %230 = math.exp %229 : vector<8x128xf32>
    %cst_64 = arith.constant 1.000000e+00 : f32
    %231 = vector.broadcast %cst_64 : f32 to vector<8x128xf32>
    %232 = arith.addf %231, %230 : vector<8x128xf32>
    %233 = arith.divf %231, %232 : vector<8x128xf32>
    %234 = vector.extract_strided_slice %221 {offsets = [0, 256], sizes = [8, 128], strides = [1, 1]} : vector<8x512xf32> to vector<8x128xf32>
    %235 = math.tanh %234 : vector<8x128xf32>
    %236 = vector.extract_strided_slice %221 {offsets = [0, 384], sizes = [8, 128], strides = [1, 1]} : vector<8x512xf32> to vector<8x128xf32>
    %237 = arith.negf %236 : vector<8x128xf32>
    %238 = math.exp %237 : vector<8x128xf32>
    %cst_65 = arith.constant 1.000000e+00 : f32
    %239 = vector.broadcast %cst_65 : f32 to vector<8x128xf32>
    %240 = arith.addf %239, %238 : vector<8x128xf32>
    %241 = arith.divf %239, %240 : vector<8x128xf32>
    %242 = arith.mulf %233, %209 : vector<8x128xf32>
    %243 = arith.mulf %227, %235 : vector<8x128xf32>
    %244 = arith.addf %242, %243 : vector<8x128xf32>
    %245 = math.tanh %244 : vector<8x128xf32>
    %246 = arith.mulf %241, %245 : vector<8x128xf32>
    %247 = arith.truncf %246 : vector<8x128xf32> to vector<8x128xbf16>
    %c0_66 = arith.constant 0 : index
    %c6_67 = arith.constant 6 : index
    %c0_68 = arith.constant 0 : index
    %248 = vector.load %arg6[%c0_66, %c6_67, %c0_68] : memref<8x8x128xbf16, #tpu.memory_space<vmem>>, vector<8x1x128xbf16>
    %249 = vector.shape_cast %248 : vector<8x1x128xbf16> to vector<8x128xbf16>
    %250 = vector.shape_cast %247 : vector<8x128xbf16> to vector<8x1x128xbf16>
    tpu.vector_store %arg6[%c0_66, %c6_67, %c0_68], %250 {strides = array<i32>} : memref<8x8x128xbf16, #tpu.memory_space<vmem>>, vector<8x1x128xbf16>,
    %c7 = arith.constant 7 : index
    %c0_69 = arith.constant 0 : index
    %c0_70 = arith.constant 0 : index
    %251 = vector.load %arg2[%c7, %c0_69, %c0_70] : memref<8x8x512xbf16, #tpu.memory_space<vmem>>, vector<1x8x512xbf16>
    %252 = vector.shape_cast %251 : vector<1x8x512xbf16> to vector<8x512xbf16>
    %253 = arith.extf %252 : vector<8x512xbf16> to vector<8x512xf32>
    %254 = arith.truncf %246 : vector<8x128xf32> to vector<8x128xbf16>
    %cst_71 = arith.constant dense<0.000000e+00> : vector<8x512xf32>
    %255 = tpu.matmul %254, %3, %cst_71 {dimension_numbers = #tpu.dot_dimension_numbers<[1], [0], [0], [1], [0, 0, 1, 1], [], []>} : vector<8x128xbf16>, vector<128x512xbf16>, vector<8x512xf32> -> vector<8x512xf32>
    %256 = arith.addf %253, %255 : vector<8x512xf32>
    %257 = vector.extract_strided_slice %256 {offsets = [0, 0], sizes = [8, 128], strides = [1, 1]} : vector<8x512xf32> to vector<8x128xf32>
    %258 = arith.negf %257 : vector<8x128xf32>
    %259 = math.exp %258 : vector<8x128xf32>
    %cst_72 = arith.constant 1.000000e+00 : f32
    %260 = vector.broadcast %cst_72 : f32 to vector<8x128xf32>
    %261 = arith.addf %260, %259 : vector<8x128xf32>
    %262 = arith.divf %260, %261 : vector<8x128xf32>
    %263 = vector.extract_strided_slice %256 {offsets = [0, 128], sizes = [8, 128], strides = [1, 1]} : vector<8x512xf32> to vector<8x128xf32>
    %264 = arith.negf %263 : vector<8x128xf32>
    %265 = math.exp %264 : vector<8x128xf32>
    %cst_73 = arith.constant 1.000000e+00 : f32
    %266 = vector.broadcast %cst_73 : f32 to vector<8x128xf32>
    %267 = arith.addf %266, %265 : vector<8x128xf32>
    %268 = arith.divf %266, %267 : vector<8x128xf32>
    %269 = vector.extract_strided_slice %256 {offsets = [0, 256], sizes = [8, 128], strides = [1, 1]} : vector<8x512xf32> to vector<8x128xf32>
    %270 = math.tanh %269 : vector<8x128xf32>
    %271 = vector.extract_strided_slice %256 {offsets = [0, 384], sizes = [8, 128], strides = [1, 1]} : vector<8x512xf32> to vector<8x128xf32>
    %272 = arith.negf %271 : vector<8x128xf32>
    %273 = math.exp %272 : vector<8x128xf32>
    %cst_74 = arith.constant 1.000000e+00 : f32
    %274 = vector.broadcast %cst_74 : f32 to vector<8x128xf32>
    %275 = arith.addf %274, %273 : vector<8x128xf32>
    %276 = arith.divf %274, %275 : vector<8x128xf32>
    %277 = arith.mulf %268, %244 : vector<8x128xf32>
    %278 = arith.mulf %262, %270 : vector<8x128xf32>
    %279 = arith.addf %277, %278 : vector<8x128xf32>
    %280 = math.tanh %279 : vector<8x128xf32>
    %281 = arith.mulf %276, %280 : vector<8x128xf32>
    %282 = arith.truncf %281 : vector<8x128xf32> to vector<8x128xbf16>
    %c0_75 = arith.constant 0 : index
    %c7_76 = arith.constant 7 : index
    %c0_77 = arith.constant 0 : index
    %283 = vector.load %arg6[%c0_75, %c7_76, %c0_77] : memref<8x8x128xbf16, #tpu.memory_space<vmem>>, vector<8x1x128xbf16>
    %284 = vector.shape_cast %283 : vector<8x1x128xbf16> to vector<8x128xbf16>
    %285 = vector.shape_cast %282 : vector<8x128xbf16> to vector<8x1x128xbf16>
    tpu.vector_store %arg6[%c0_75, %c7_76, %c0_77], %285 {strides = array<i32>} : memref<8x8x128xbf16, #tpu.memory_space<vmem>>, vector<8x1x128xbf16>,
    %c0_78 = arith.constant 0 : index
    %c0_79 = arith.constant 0 : index
    %286 = vector.load %arg9[%c0_78, %c0_79] : memref<8x128xf32, #tpu.memory_space<vmem>>, vector<8x128xf32>
    tpu.vector_store %arg9[%c0_78, %c0_79], %281 {strides = array<i32>} : memref<8x128xf32, #tpu.memory_space<vmem>>, vector<8x128xf32>,
    %c0_80 = arith.constant 0 : index
    %c0_81 = arith.constant 0 : index
    %287 = vector.load %arg10[%c0_80, %c0_81] : memref<8x128xf32, #tpu.memory_space<vmem>>, vector<8x128xf32>
    tpu.vector_store %arg10[%c0_80, %c0_81], %279 {strides = array<i32>} : memref<8x128xf32, #tpu.memory_space<vmem>>, vector<8x128xf32>,
    %c0_i32_82 = arith.constant 0 : i32
    %288 = arith.cmpi eq, %arg1, %c0_i32_82 : i32
    %289 = arith.extui %288 : i1 to i32
    %c0_i32_83 = arith.constant 0 : i32
    %290 = arith.cmpi ne, %289, %c0_i32_83 : i32
    scf.if %290 {
      %c0_84 = arith.constant 0 : index
      %c0_85 = arith.constant 0 : index
      %291 = vector.load %arg9[%c0_84, %c0_85] : memref<8x128xf32, #tpu.memory_space<vmem>>, vector<8x128xf32>
      %c0_86 = arith.constant 0 : index
      %c0_87 = arith.constant 0 : index
      %292 = vector.load %arg7[%c0_86, %c0_87] : memref<8x128xf32, #tpu.memory_space<vmem>>, vector<8x128xf32>
      tpu.vector_store %arg7[%c0_86, %c0_87], %291 {strides = array<i32>} : memref<8x128xf32, #tpu.memory_space<vmem>>, vector<8x128xf32>,
      %c0_88 = arith.constant 0 : index
      %c0_89 = arith.constant 0 : index
      %293 = vector.load %arg10[%c0_88, %c0_89] : memref<8x128xf32, #tpu.memory_space<vmem>>, vector<8x128xf32>
      %c0_90 = arith.constant 0 : index
      %c0_91 = arith.constant 0 : index
      %294 = vector.load %arg8[%c0_90, %c0_91] : memref<8x128xf32, #tpu.memory_space<vmem>>, vector<8x128xf32>
      tpu.vector_store %arg8[%c0_90, %c0_91], %293 {strides = array<i32>} : memref<8x128xf32, #tpu.memory_space<vmem>>, vector<8x128xf32>,
    } else {
    }
    return
  }
  func.func @transform_0(%arg0: i32, %arg1: i32) -> (i32, i32, i32) {
    %c0_i32 = arith.constant 0 : i32
    %c0_i32_0 = arith.constant 0 : i32
    return %arg1, %arg0, %c0_i32 : i32, i32, i32
  }
  func.func @transform_1(%arg0: i32, %arg1: i32) -> (i32, i32) {
    %c0_i32 = arith.constant 0 : i32
    %c0_i32_0 = arith.constant 0 : i32
    return %arg0, %c0_i32 : i32, i32
  }
  func.func @transform_2(%arg0: i32, %arg1: i32) -> (i32, i32) {
    %c0_i32 = arith.constant 0 : i32
    %c0_i32_0 = arith.constant 0 : i32
    return %arg0, %c0_i32 : i32, i32
  }
  func.func @transform_3(%arg0: i32, %arg1: i32) -> (i32, i32) {
    %c0_i32 = arith.constant 0 : i32
    %c0_i32_0 = arith.constant 0 : i32
    %c0_i32_1 = arith.constant 0 : i32
    return %c0_i32, %c0_i32_0 : i32, i32
  }
  func.func @transform_4(%arg0: i32, %arg1: i32) -> (i32, i32, i32) {
    %c0_i32 = arith.constant 0 : i32
    %c0_i32_0 = arith.constant 0 : i32
    return %arg0, %arg1, %c0_i32 : i32, i32, i32
  }
  func.func @transform_5(%arg0: i32, %arg1: i32) -> (i32, i32) {
    %c0_i32 = arith.constant 0 : i32
    %c0_i32_0 = arith.constant 0 : i32
    return %arg0, %c0_i32 : i32, i32
  }
  func.func @transform_6(%arg0: i32, %arg1: i32) -> (i32, i32) {
    %c0_i32 = arith.constant 0 : i32
    %c0_i32_0 = arith.constant 0 : i32
    return %arg0, %c0_i32 : i32, i32
  }
}

module attributes {stable_mosaic.version = 11 : i64} {
  func.func @_matmul_bias_kernel(%arg0: i32, %arg1: i32, %arg2: memref<64x128xbf16, #tpu.memory_space<vmem>>, %arg3: memref<128x128xbf16, #tpu.memory_space<vmem>>, %arg4: memref<1x128xf32, #tpu.memory_space<vmem>>, %arg5: memref<64x128xf32, #tpu.memory_space<vmem>>) attributes {dimension_semantics = [#tpu.dimension_semantics<parallel>, #tpu.dimension_semantics<parallel>], iteration_bounds = array<i64: 1, 1>, scalar_prefetch = 0 : i64, scratch_operands = 0 : i64, tpu.core_type = #tpu.core_type<tc>, window_params = [{transform_indices = @transform_0, window_bounds = array<i64: 64, 128>}, {transform_indices = @transform_1, window_bounds = array<i64: 128, 128>}, {transform_indices = @transform_2, window_bounds = array<i64: 1, 128>}, {transform_indices = @transform_3, window_bounds = array<i64: 64, 128>}]} {
    %c0 = arith.constant 0 : index
    %c0_0 = arith.constant 0 : index
    %0 = vector.load %arg2[%c0, %c0_0] : memref<64x128xbf16, #tpu.memory_space<vmem>>, vector<64x128xbf16>
    %c0_1 = arith.constant 0 : index
    %c0_2 = arith.constant 0 : index
    %1 = vector.load %arg3[%c0_1, %c0_2] : memref<128x128xbf16, #tpu.memory_space<vmem>>, vector<128x128xbf16>
    %cst = arith.constant dense<0.000000e+00> : vector<64x128xf32>
    %2 = tpu.matmul %0, %1, %cst {dimension_numbers = #tpu.dot_dimension_numbers<[1], [0], [0], [1], [0, 0, 1, 1], [], []>} : vector<64x128xbf16>, vector<128x128xbf16>, vector<64x128xf32> -> vector<64x128xf32>
    %c0_3 = arith.constant 0 : index
    %c0_4 = arith.constant 0 : index
    %3 = vector.load %arg4[%c0_3, %c0_4] : memref<1x128xf32, #tpu.memory_space<vmem>>, vector<1x128xf32>
    %4 = vector.broadcast %3 : vector<1x128xf32> to vector<64x128xf32>
    %5 = arith.addf %2, %4 : vector<64x128xf32>
    %c0_5 = arith.constant 0 : index
    %c0_6 = arith.constant 0 : index
    %6 = vector.load %arg5[%c0_5, %c0_6] : memref<64x128xf32, #tpu.memory_space<vmem>>, vector<64x128xf32>
    tpu.vector_store %arg5[%c0_5, %c0_6], %5 {strides = array<i32>} : memref<64x128xf32, #tpu.memory_space<vmem>>, vector<64x128xf32>,
    return
  }
  func.func @transform_0(%arg0: i32, %arg1: i32) -> (i32, i32) {
    %c0_i32 = arith.constant 0 : i32
    %c0_i32_0 = arith.constant 0 : i32
    return %arg0, %c0_i32 : i32, i32
  }
  func.func @transform_1(%arg0: i32, %arg1: i32) -> (i32, i32) {
    %c0_i32 = arith.constant 0 : i32
    %c0_i32_0 = arith.constant 0 : i32
    return %c0_i32, %arg1 : i32, i32
  }
  func.func @transform_2(%arg0: i32, %arg1: i32) -> (i32, i32) {
    %c0_i32 = arith.constant 0 : i32
    %c0_i32_0 = arith.constant 0 : i32
    return %c0_i32, %arg1 : i32, i32
  }
  func.func @transform_3(%arg0: i32, %arg1: i32) -> (i32, i32) {
    %c0_i32 = arith.constant 0 : i32
    return %arg0, %arg1 : i32, i32
  }
}

</mosaic_0001>

<bundles_post_ra>
// kernel: rnn_module_forward.5
= control target key start
LH: loop header
LB: loop body
LE: loop exit
PB: predicated region body
PF: predicated region fallthrough
CT: control target
= control target key end

     0   :  { %s323_s1 = inlined_call_operand.vmem [shape: bf16[128,128], index: 1, kind: input, shape index: {}]   ;;  %s324_s2 = inlined_call_operand.vmem [shape: f32[1,128], index: 2, kind: input, shape index: {}]   ;;  %s325_s0 = inlined_call_operand.vmem [shape: bf16[64,128], index: 0, kind: input, shape index: {}]   ;;  %s326_s3 = inlined_call_operand.vmem [shape: f32[64,128], index: 3, kind: output, shape index: {}]  }
   0x1   :  { %v214_v0 = vld [vmem:[%s323_s1 + $0x38] sm:$0xff]  ;;  %v213_v1 = vld [vmem:[%s323_s1 + $0x30] sm:$0xff]  ;;  %v212_v2 = vld [vmem:[%s323_s1 + $0x28] sm:$0xff] }
   0x2   :  { %114 = vmatpush.bf16.msra.mxu0 %v214_v0  ;;  %215 = vmatpush.bf16.msra.mxu1 %v214_v0  ;;  %v211_v3 = vld [vmem:[%s323_s1 + $0x20] sm:$0xff]  ;;  %v210_v4 = vld [vmem:[%s323_s1 + $0x18] sm:$0xff]  ;;  %v209_v5 = vld [vmem:[%s323_s1 + $0x10] sm:$0xff] }
   0x3   :  { %216 = vmatpush.bf16.msra.mxu2 %v214_v0  ;;  %217 = vmatpush.bf16.msra.mxu3 %v214_v0  ;;  %v208_v6 = vld [vmem:[%s323_s1 + $0x8] sm:$0xff]  ;;  %v207_v7 = vld [vmem:[%s323_s1] sm:$0xff]  ;;  %v205_v10 = vld [vmem:[%s325_s0 + $0x10] sm:$0xff] }
   0x4   :  { %v203_v8 = vld [vmem:[%s325_s0] sm:$0xff]  ;;  %v204_v9 = vld [vmem:[%s325_s0 + $0x8] sm:$0xff]  ;;  %v206_v11 = vld [vmem:[%s325_s0 + $0x18] sm:$0xff] }
   0x5   :  { %v239_v12 = vld [vmem:[%s324_s2] ss:$0 sm:$0xff] }
   0x6   :  { %115 = vmatpush.bf16.msra.mxu0 %v213_v1  ;;  %218 = vmatpush.bf16.msra.mxu1 %v213_v1 }
   0x7   :  { %219 = vmatpush.bf16.msra.mxu2 %v213_v1  ;;  %220 = vmatpush.bf16.msra.mxu3 %v213_v1 }
   0xa   :  { %116 = vmatpush.bf16.msra.mxu0 %v212_v2  ;;  %221 = vmatpush.bf16.msra.mxu1 %v212_v2 }
   0xb   :  { %222 = vmatpush.bf16.msra.mxu2 %v212_v2  ;;  %223 = vmatpush.bf16.msra.mxu3 %v212_v2 }
   0xe   :  { %117 = vmatpush.bf16.msra.mxu0 %v211_v3  ;;  %224 = vmatpush.bf16.msra.mxu1 %v211_v3 }
   0xf   :  { %225 = vmatpush.bf16.msra.mxu2 %v211_v3  ;;  %226 = vmatpush.bf16.msra.mxu3 %v211_v3 }
  0x12   :  { %118 = vmatpush.bf16.msra.mxu0 %v210_v4  ;;  %227 = vmatpush.bf16.msra.mxu1 %v210_v4 }
  0x13   :  { %228 = vmatpush.bf16.msra.mxu2 %v210_v4  ;;  %229 = vmatpush.bf16.msra.mxu3 %v210_v4 }
  0x16   :  { %119 = vmatpush.bf16.msra.mxu0 %v209_v5  ;;  %230 = vmatpush.bf16.msra.mxu1 %v209_v5 }
  0x17   :  { %231 = vmatpush.bf16.msra.mxu2 %v209_v5  ;;  %232 = vmatpush.bf16.msra.mxu3 %v209_v5 }
  0x1a   :  { %120 = vmatpush.bf16.msra.mxu0 %v208_v6  ;;  %233 = vmatpush.bf16.msra.mxu1 %v208_v6 }
  0x1b   :  { %234 = vmatpush.bf16.msra.mxu2 %v208_v6  ;;  %235 = vmatpush.bf16.msra.mxu3 %v208_v6 }
  0x1e   :  { %121 = vmatpush.bf16.msra.mxu0 %v207_v7  ;;  %236 = vmatpush.bf16.msra.mxu1 %v207_v7 }
  0x1f   :  { %237 = vmatpush.bf16.msra.mxu2 %v207_v7  ;;  %238 = vmatpush.bf16.msra.mxu3 %v207_v7 }
  0x21   :  { %122 = vmatmul.bf16.vlgmr.msra.gmra.mxu0 %v203_v8  ;;  %127 = vmatmul.bf16.vlgmr.msra.gmra.mxu1 %v204_v9 }
  0x22   :  { %132 = vmatmul.bf16.vlgmr.msra.gmra.mxu2 %v205_v10  ;;  %137 = vmatmul.bf16.vlgmr.msra.gmra.mxu3 %v206_v11 }
  0x9e   :  { %v123_v13 = vpop.f32.mrf.mxu0  ;;  %v128_v14 = vpop.f32.mrf.mxu1 }
  0x9f   :  { %v124_v15 = vadd.f32 %v239_v12, %v123_v13  ;;  %v129_v16 = vadd.f32 %v239_v12, %v128_v14 }
  0xa1   :  { %143 = vst [vmem:[%s326_s3] sm:$0xff] %v124_v15 }
  0xa2   :  { %145 = vst [vmem:[%s326_s3 + $0x10] sm:$0xff] %v129_v16 }
  0xa5   :  { %v133_v17 = vpop.f32.mrf.mxu2  ;;  %v138_v18 = vpop.f32.mrf.mxu3 }
  0xa6   :  { %v134_v19 = vadd.f32 %v239_v12, %v133_v17  ;;  %v139_v20 = vadd.f32 %v239_v12, %v138_v18  ;;  %v125_v21 = vpop.f32.mrf.mxu0  ;;  %v130_v22 = vpop.f32.mrf.mxu1 }
  0xa7   :  { %v126_v23 = vadd.f32 %v239_v12, %v125_v21  ;;  %v131_v24 = vadd.f32 %v239_v12, %v130_v22 }
  0xa8   :  { %147 = vst [vmem:[%s326_s3 + $0x20] sm:$0xff] %v134_v19 }
  0xa9   :  { %149 = vst [vmem:[%s326_s3 + $0x30] sm:$0xff] %v139_v20 }
  0xaa   :  { %144 = vst [vmem:[%s326_s3 + $0x8] sm:$0xff] %v126_v23 }
  0xab   :  { %146 = vst [vmem:[%s326_s3 + $0x18] sm:$0xff] %v131_v24 }
  0xad   :  { %v135_v25 = vpop.f32.mrf.mxu2  ;;  %v140_v26 = vpop.f32.mrf.mxu3 }
  0xae   :  { %v136_v27 = vadd.f32 %v239_v12, %v135_v25  ;;  %v141_v28 = vadd.f32 %v239_v12, %v140_v26 }
  0xb0   :  { %148 = vst [vmem:[%s326_s3 + $0x28] sm:$0xff] %v136_v27 }
  0xb1   :  { %150 = vst [vmem:[%s326_s3 + $0x38] sm:$0xff] %v141_v28 }

// kernel: rnn_module_forward.3
= control target key start
LH: loop header
LB: loop body
LE: loop exit
PB: predicated region body
PF: predicated region fallthrough
CT: control target
= control target key end

     0   :  { %s895_s1 = inlined_call_operand.vmem [shape: bf16[128,512], index: 1, kind: input, shape index: {}]   ;;  %s896_s0 = inlined_call_operand.vmem [shape: bf16[64,128], index: 0, kind: input, shape index: {}]   ;;  %s897_s2 = inlined_call_operand.vmem [shape: f32[1,512], index: 2, kind: input, shape index: {}]   ;;  %s898_s3 = inlined_call_operand.vmem [shape: bf16[64,512], index: 3, kind: output, shape index: {}]  }
   0x1   :  { %v530_v0 = vld [vmem:[%s895_s1 + $0xe0] sm:$0xf]  ;;  %v578_v1 = vld [vmem:[%s895_s1 + $0xec] sm:$0xf0]  ;;  %v576_v2 = vld [vmem:[%s895_s1 + $0xe4] sm:$0xf] }
   0x2   :  { %v531_v3 = vor.u32 %v578_v1, %v530_v0  ;;  %v532_v4 = vld [vmem:[%s895_s1 + $0xf0] sm:$0xf0]  ;;  %v538_v5 = vld [vmem:[%s895_s1 + $0xe8] sm:$0xf]  ;;  %v579_v6 = vld [vmem:[%s895_s1 + $0xf4] sm:$0xf0] }
   0x3   :  { %v535_v7 = vor.u32 %v576_v2, %v532_v4  ;;  %v539_v8 = vor.u32 %v579_v6, %v538_v5  ;;  %v577_v9 = vld [vmem:[%s895_s1 + $0xec] sm:$0xf]  ;;  %v540_v10 = vld [vmem:[%s895_s1 + $0xf8] sm:$0xf0]  ;;  %v514_v11 = vld [vmem:[%s895_s1 + $0xc0] sm:$0xf] }
   0x4   :  { %248 = vmatpush.bf16.msra.mxu0 %v531_v3  ;;  %v543_v12 = vor.u32 %v577_v9, %v540_v10  ;;  %v574_v13 = vld [vmem:[%s895_s1 + $0xcc] sm:$0xf0]  ;;  %v572_v14 = vld [vmem:[%s895_s1 + $0xc4] sm:$0xf]  ;;  %v516_v15 = vld [vmem:[%s895_s1 + $0xd0] sm:$0xf0] }
   0x5   :  { %277 = vmatpush.bf16.msra.mxu1 %v535_v7  ;;  %306 = vmatpush.bf16.msra.mxu2 %v539_v8  ;;  %v515_v16 = vor.u32 %v574_v13, %v514_v11  ;;  %v519_v17 = vor.u32 %v572_v14, %v516_v15  ;;  %v522_v18 = vld [vmem:[%s895_s1 + $0xc8] sm:$0xf]  ;;  %v575_v19 = vld [vmem:[%s895_s1 + $0xd4] sm:$0xf0]  ;;  %v573_v20 = vld [vmem:[%s895_s1 + $0xcc] sm:$0xf] }
   0x6   :  { %335 = vmatpush.bf16.msra.mxu3 %v543_v12  ;;  %v523_v21 = vor.u32 %v575_v19, %v522_v18  ;;  %v524_v22 = vld [vmem:[%s895_s1 + $0xd8] sm:$0xf0]  ;;  %v498_v23 = vld [vmem:[%s895_s1 + $0xa0] sm:$0xf]  ;;  %v570_v24 = vld [vmem:[%s895_s1 + $0xac] sm:$0xf0] }
   0x7   :  { %v527_v25 = vor.u32 %v573_v20, %v524_v22  ;;  %v568_v26 = vld [vmem:[%s895_s1 + $0xa4] sm:$0xf]  ;;  %v500_v27 = vld [vmem:[%s895_s1 + $0xb0] sm:$0xf0]  ;;  %v506_v28 = vld [vmem:[%s895_s1 + $0xa8] sm:$0xf]  ;;  %v499_v29 = vor.u32 %v570_v24, %v498_v23 }
   0x8   :  { %249 = vmatpush.bf16.msra.mxu0 %v515_v16  ;;  %v571_v30 = vld [vmem:[%s895_s1 + $0xb4] sm:$0xf0]  ;;  %v569_v31 = vld [vmem:[%s895_s1 + $0xac] sm:$0xf]  ;;  %v508_v32 = vld [vmem:[%s895_s1 + $0xb8] sm:$0xf0]  ;;  %v503_v33 = vor.u32 %v568_v26, %v500_v27 }
   0x9   :  { %278 = vmatpush.bf16.msra.mxu1 %v519_v17  ;;  %307 = vmatpush.bf16.msra.mxu2 %v523_v21  ;;  %v507_v34 = vor.u32 %v571_v30, %v506_v28  ;;  %v482_v35 = vld [vmem:[%s895_s1 + $0x80] sm:$0xf]  ;;  %v566_v36 = vld [vmem:[%s895_s1 + $0x8c] sm:$0xf0]  ;;  %v564_v37 = vld [vmem:[%s895_s1 + $0x84] sm:$0xf]  ;;  %v511_v38 = vor.u32 %v569_v31, %v508_v32 }
   0xa   :  { %336 = vmatpush.bf16.msra.mxu3 %v527_v25  ;;  %v484_v39 = vld [vmem:[%s895_s1 + $0x90] sm:$0xf0]  ;;  %v490_v40 = vld [vmem:[%s895_s1 + $0x88] sm:$0xf]  ;;  %v567_v41 = vld [vmem:[%s895_s1 + $0x94] sm:$0xf0]  ;;  %v483_v44 = vor.u32 %v566_v36, %v482_v35 }
   0xb   :  { %v565_v42 = vld [vmem:[%s895_s1 + $0x8c] sm:$0xf]  ;;  %v492_v43 = vld [vmem:[%s895_s1 + $0x98] sm:$0xf0]  ;;  %v487_v45 = vor.u32 %v564_v37, %v484_v39  ;;  %v491_v46 = vor.u32 %v567_v41, %v490_v40  ;;  %v466_v47 = vld [vmem:[%s895_s1 + $0x60] sm:$0xf] }
   0xc   :  { %250 = vmatpush.bf16.msra.mxu0 %v499_v29  ;;  %v562_v48 = vld [vmem:[%s895_s1 + $0x6c] sm:$0xf0]  ;;  %v560_v49 = vld [vmem:[%s895_s1 + $0x64] sm:$0xf]  ;;  %v495_v50 = vor.u32 %v565_v42, %v492_v43  ;;  %v468_v51 = vld [vmem:[%s895_s1 + $0x70] sm:$0xf0] }
   0xd   :  { %279 = vmatpush.bf16.msra.mxu1 %v503_v33  ;;  %308 = vmatpush.bf16.msra.mxu2 %v507_v34  ;;  %v474_v52 = vld [vmem:[%s895_s1 + $0x68] sm:$0xf]  ;;  %v563_v53 = vld [vmem:[%s895_s1 + $0x74] sm:$0xf0]  ;;  %v561_v54 = vld [vmem:[%s895_s1 + $0x6c] sm:$0xf]  ;;  %v467_v56 = vor.u32 %v562_v48, %v466_v47  ;;  %v471_v57 = vor.u32 %v560_v49, %v468_v51 }
   0xe   :  { %337 = vmatpush.bf16.msra.mxu3 %v511_v38  ;;  %v476_v55 = vld [vmem:[%s895_s1 + $0x78] sm:$0xf0]  ;;  %v475_v58 = vor.u32 %v563_v53, %v474_v52  ;;  %v450_v59 = vld [vmem:[%s895_s1 + $0x40] sm:$0xf]  ;;  %v558_v60 = vld [vmem:[%s895_s1 + $0x4c] sm:$0xf0] }
   0xf   :  { %v556_v61 = vld [vmem:[%s895_s1 + $0x44] sm:$0xf]  ;;  %v479_v62 = vor.u32 %v561_v54, %v476_v55  ;;  %v452_v63 = vld [vmem:[%s895_s1 + $0x50] sm:$0xf0]  ;;  %v458_v0 = vld [vmem:[%s895_s1 + $0x48] sm:$0xf]  ;;  %v451_v4 = vor.u32 %v558_v60, %v450_v59 }
  0x10   :  { %251 = vmatpush.bf16.msra.mxu0 %v483_v44  ;;  %v559_v1 = vld [vmem:[%s895_s1 + $0x54] sm:$0xf0]  ;;  %v557_v2 = vld [vmem:[%s895_s1 + $0x4c] sm:$0xf]  ;;  %v460_v3 = vld [vmem:[%s895_s1 + $0x58] sm:$0xf0]  ;;  %v455_v5 = vor.u32 %v556_v61, %v452_v63 }
  0x11   :  { %280 = vmatpush.bf16.msra.mxu1 %v487_v45  ;;  %309 = vmatpush.bf16.msra.mxu2 %v491_v46  ;;  %v459_v6 = vor.u32 %v559_v1, %v458_v0  ;;  %v434_v7 = vld [vmem:[%s895_s1 + $0x20] sm:$0xf]  ;;  %v554_v8 = vld [vmem:[%s895_s1 + $0x2c] sm:$0xf0]  ;;  %v552_v9 = vld [vmem:[%s895_s1 + $0x24] sm:$0xf]  ;;  %v463_v10 = vor.u32 %v557_v2, %v460_v3 }
  0x12   :  { %338 = vmatpush.bf16.msra.mxu3 %v495_v50  ;;  %v436_v11 = vld [vmem:[%s895_s1 + $0x30] sm:$0xf0]  ;;  %v442_v12 = vld [vmem:[%s895_s1 + $0x28] sm:$0xf]  ;;  %v555_v13 = vld [vmem:[%s895_s1 + $0x34] sm:$0xf0]  ;;  %v435_v16 = vor.u32 %v554_v8, %v434_v7 }
  0x13   :  { %v553_v14 = vld [vmem:[%s895_s1 + $0x2c] sm:$0xf]  ;;  %v444_v15 = vld [vmem:[%s895_s1 + $0x38] sm:$0xf0]  ;;  %v439_v17 = vor.u32 %v552_v9, %v436_v11  ;;  %v443_v18 = vor.u32 %v555_v13, %v442_v12  ;;  %v418_v19 = vld [vmem:[%s895_s1] sm:$0xf] }
  0x14   :  { %252 = vmatpush.bf16.msra.mxu0 %v467_v56  ;;  %v550_v20 = vld [vmem:[%s895_s1 + $0xc] sm:$0xf0]  ;;  %v548_v21 = vld [vmem:[%s895_s1 + $0x4] sm:$0xf]  ;;  %v447_v22 = vor.u32 %v553_v14, %v444_v15  ;;  %v420_v23 = vld [vmem:[%s895_s1 + $0x10] sm:$0xf0] }
  0x15   :  { %281 = vmatpush.bf16.msra.mxu1 %v471_v57  ;;  %310 = vmatpush.bf16.msra.mxu2 %v475_v58  ;;  %v426_v24 = vld [vmem:[%s895_s1 + $0x8] sm:$0xf]  ;;  %v551_v25 = vld [vmem:[%s895_s1 + $0x14] sm:$0xf0]  ;;  %v549_v26 = vld [vmem:[%s895_s1 + $0xc] sm:$0xf]  ;;  %v419_v28 = vor.u32 %v550_v20, %v418_v19  ;;  %v423_v29 = vor.u32 %v548_v21, %v420_v23 }
  0x16   :  { %339 = vmatpush.bf16.msra.mxu3 %v479_v62  ;;  %v428_v27 = vld [vmem:[%s895_s1 + $0x18] sm:$0xf0]  ;;  %v427_v30 = vor.u32 %v551_v25, %v426_v24  ;;  %v544_v32 = vld [vmem:[%s896_s0] sm:$0xff]  ;;  %v545_v33 = vld [vmem:[%s896_s0 + $0x8] sm:$0xff] }
  0x17   :  { %v431_v31 = vor.u32 %v549_v26, %v428_v27  ;;  %v546_v34 = vld [vmem:[%s896_s0 + $0x10] sm:$0xff]  ;;  %v547_v35 = vld [vmem:[%s896_s0 + $0x18] sm:$0xff]  ;;  %v54_v36 = vld [vmem:[%s897_s2] sm:$0xf] }
  0x18   :  { %253 = vmatpush.bf16.msra.mxu0 %v451_v4  ;;  %v807_v37 = vperm.slane %v54_v36, 0  ;;  %v809_v38 = vperm.slane %v54_v36, 1  ;;  %v813_v44 = vperm.slane %v54_v36, 2  ;;  %v815_v45 = vperm.slane %v54_v36, 3 }
  0x19   :  { %282 = vmatpush.bf16.msra.mxu1 %v455_v5  ;;  %311 = vmatpush.bf16.msra.mxu2 %v459_v6 }
  0x1a   :  { %340 = vmatpush.bf16.msra.mxu3 %v463_v10 }
  0x1c   :  { %254 = vmatpush.bf16.msra.mxu0 %v435_v16 }
  0x1d   :  { %283 = vmatpush.bf16.msra.mxu1 %v439_v17  ;;  %312 = vmatpush.bf16.msra.mxu2 %v443_v18 }
  0x1e   :  { %341 = vmatpush.bf16.msra.mxu3 %v447_v22 }
  0x20   :  { %255 = vmatpush.bf16.msra.mxu0 %v419_v28 }
  0x21   :  { %284 = vmatpush.bf16.msra.mxu1 %v423_v29  ;;  %313 = vmatpush.bf16.msra.mxu2 %v427_v30 }
  0x22   :  { %342 = vmatpush.bf16.msra.mxu3 %v431_v31 }
  0x23   :  { %256 = vmatmul.bf16.vlgmr.msra.gmra.mxu0 %v544_v32 }
  0x24   :  { %285 = vmatmul.bf16.vlgmr.msra.gmra.mxu1 %v544_v32  ;;  %314 = vmatmul.bf16.vlgmr.msra.gmra.mxu2 %v544_v32 }
  0x25   :  { %343 = vmatmul.bf16.vlgmr.msra.gmra.mxu3 %v544_v32 }
  0x33   :  { %261 = vmatmul.bf16.gmra.mxu0 %v545_v33 }
  0x34   :  { %290 = vmatmul.bf16.gmra.mxu1 %v545_v33  ;;  %319 = vmatmul.bf16.gmra.mxu2 %v545_v33 }
  0x35   :  { %348 = vmatmul.bf16.gmra.mxu3 %v545_v33 }
  0x43   :  { %266 = vmatmul.bf16.gmra.mxu0 %v546_v34 }
  0x44   :  { %295 = vmatmul.bf16.gmra.mxu1 %v546_v34  ;;  %324 = vmatmul.bf16.gmra.mxu2 %v546_v34 }
  0x45   :  { %353 = vmatmul.bf16.gmra.mxu3 %v546_v34 }
  0x53   :  { %271 = vmatmul.bf16.gmra.mxu0 %v547_v35 }
  0x54   :  { %300 = vmatmul.bf16.gmra.mxu1 %v547_v35  ;;  %329 = vmatmul.bf16.gmra.mxu2 %v547_v35 }
  0x55   :  { %358 = vmatmul.bf16.gmra.mxu3 %v547_v35 }
  0xa0   :  { %v257_v39 = vpop.f32.mrf.mxu0 }
  0xa1   :  { %v258_v40 = vadd.f32 %v257_v39, %v807_v37  ;;  %v286_v41 = vpop.f32.mrf.mxu1 }
  0xa2   :  { %v287_v42 = vadd.f32 %v286_v41, %v809_v38 }
  0xa4   :  { %v364_v43 = vpack.c.bf16 %v287_v42, %v258_v40 }
  0xa6   :  { %380 = vst [vmem:[%s898_s3] sm:$0xff] %v364_v43 }
  0xa7   :  { %v315_v46 = vpop.f32.mrf.mxu2 }
  0xa8   :  { %v316_v47 = vadd.f32 %v315_v46, %v813_v44  ;;  %v344_v48 = vpop.f32.mrf.mxu3  ;;  %v259_v49 = vpop.f32.mrf.mxu0 }
  0xa9   :  { %v345_v50 = vadd.f32 %v344_v48, %v815_v45  ;;  %v260_v51 = vadd.f32 %v259_v49, %v807_v37  ;;  %v288_v52 = vpop.f32.mrf.mxu1 }
  0xaa   :  { %v289_v53 = vadd.f32 %v288_v52, %v809_v38 }
  0xab   :  { %v365_v54 = vpack.c.bf16 %v345_v50, %v316_v47 }
  0xac   :  { %v366_v55 = vpack.c.bf16 %v289_v53, %v260_v51 }
  0xad   :  { %381 = vst [vmem:[%s898_s3 + $0x8] sm:$0xff] %v365_v54 }
  0xae   :  { %382 = vst [vmem:[%s898_s3 + $0x10] sm:$0xff] %v366_v55 }
  0xaf   :  { %v317_v56 = vpop.f32.mrf.mxu2 }
  0xb0   :  { %v318_v57 = vadd.f32 %v317_v56, %v813_v44  ;;  %v346_v58 = vpop.f32.mrf.mxu3  ;;  %v262_v59 = vpop.f32.mrf.mxu0 }
  0xb1   :  { %v347_v60 = vadd.f32 %v346_v58, %v815_v45  ;;  %v263_v61 = vadd.f32 %v262_v59, %v807_v37  ;;  %v291_v62 = vpop.f32.mrf.mxu1 }
  0xb2   :  { %v292_v63 = vadd.f32 %v291_v62, %v809_v38 }
  0xb3   :  { %v367_v0 = vpack.c.bf16 %v347_v60, %v318_v57 }
  0xb4   :  { %v368_v1 = vpack.c.bf16 %v292_v63, %v263_v61 }
  0xb5   :  { %383 = vst [vmem:[%s898_s3 + $0x18] sm:$0xff] %v367_v0 }
  0xb6   :  { %384 = vst [vmem:[%s898_s3 + $0x20] sm:$0xff] %v368_v1 }
  0xb7   :  { %v320_v2 = vpop.f32.mrf.mxu2 }
  0xb8   :  { %v321_v3 = vadd.f32 %v320_v2, %v813_v44  ;;  %v349_v4 = vpop.f32.mrf.mxu3  ;;  %v264_v5 = vpop.f32.mrf.mxu0 }
  0xb9   :  { %v350_v6 = vadd.f32 %v349_v4, %v815_v45  ;;  %v265_v7 = vadd.f32 %v264_v5, %v807_v37  ;;  %v293_v8 = vpop.f32.mrf.mxu1 }
  0xba   :  { %v294_v9 = vadd.f32 %v293_v8, %v809_v38 }
  0xbb   :  { %v369_v10 = vpack.c.bf16 %v350_v6, %v321_v3 }
  0xbc   :  { %v370_v11 = vpack.c.bf16 %v294_v9, %v265_v7 }
  0xbd   :  { %385 = vst [vmem:[%s898_s3 + $0x28] sm:$0xff] %v369_v10 }
  0xbe   :  { %386 = vst [vmem:[%s898_s3 + $0x30] sm:$0xff] %v370_v11 }
  0xbf   :  { %v322_v12 = vpop.f32.mrf.mxu2 }
  0xc0   :  { %v323_v13 = vadd.f32 %v322_v12, %v813_v44  ;;  %v351_v14 = vpop.f32.mrf.mxu3  ;;  %v267_v15 = vpop.f32.mrf.mxu0 }
  0xc1   :  { %v352_v16 = vadd.f32 %v351_v14, %v815_v45  ;;  %v268_v17 = vadd.f32 %v267_v15, %v807_v37  ;;  %v296_v18 = vpop.f32.mrf.mxu1 }
  0xc2   :  { %v297_v19 = vadd.f32 %v296_v18, %v809_v38 }
  0xc3   :  { %v371_v20 = vpack.c.bf16 %v352_v16, %v323_v13 }
  0xc4   :  { %v372_v21 = vpack.c.bf16 %v297_v19, %v268_v17 }
  0xc5   :  { %387 = vst [vmem:[%s898_s3 + $0x38] sm:$0xff] %v371_v20 }
  0xc6   :  { %388 = vst [vmem:[%s898_s3 + $0x40] sm:$0xff] %v372_v21 }
  0xc7   :  { %v325_v22 = vpop.f32.mrf.mxu2 }
  0xc8   :  { %v326_v23 = vadd.f32 %v325_v22, %v813_v44  ;;  %v354_v24 = vpop.f32.mrf.mxu3  ;;  %v269_v25 = vpop.f32.mrf.mxu0 }
  0xc9   :  { %v355_v26 = vadd.f32 %v354_v24, %v815_v45  ;;  %v270_v27 = vadd.f32 %v269_v25, %v807_v37  ;;  %v298_v28 = vpop.f32.mrf.mxu1 }
  0xca   :  { %v299_v29 = vadd.f32 %v298_v28, %v809_v38 }
  0xcb   :  { %v373_v30 = vpack.c.bf16 %v355_v26, %v326_v23 }
  0xcc   :  { %v374_v31 = vpack.c.bf16 %v299_v29, %v270_v27 }
  0xcd   :  { %389 = vst [vmem:[%s898_s3 + $0x48] sm:$0xff] %v373_v30 }
  0xce   :  { %390 = vst [vmem:[%s898_s3 + $0x50] sm:$0xff] %v374_v31 }
  0xcf   :  { %v327_v32 = vpop.f32.mrf.mxu2 }
  0xd0   :  { %v328_v33 = vadd.f32 %v327_v32, %v813_v44  ;;  %v356_v34 = vpop.f32.mrf.mxu3  ;;  %v272_v35 = vpop.f32.mrf.mxu0 }
  0xd1   :  { %v357_v36 = vadd.f32 %v356_v34, %v815_v45  ;;  %v273_v39 = vadd.f32 %v272_v35, %v807_v37  ;;  %v301_v40 = vpop.f32.mrf.mxu1 }
  0xd2   :  { %v302_v41 = vadd.f32 %v301_v40, %v809_v38 }
  0xd3   :  { %v375_v42 = vpack.c.bf16 %v357_v36, %v328_v33 }
  0xd4   :  { %v376_v43 = vpack.c.bf16 %v302_v41, %v273_v39 }
  0xd5   :  { %391 = vst [vmem:[%s898_s3 + $0x58] sm:$0xff] %v375_v42 }
  0xd6   :  { %392 = vst [vmem:[%s898_s3 + $0x60] sm:$0xff] %v376_v43 }
  0xd7   :  { %v330_v46 = vpop.f32.mrf.mxu2 }
  0xd8   :  { %v331_v47 = vadd.f32 %v330_v46, %v813_v44  ;;  %v359_v48 = vpop.f32.mrf.mxu3  ;;  %v274_v49 = vpop.f32.mrf.mxu0 }
  0xd9   :  { %v360_v50 = vadd.f32 %v359_v48, %v815_v45  ;;  %v275_v51 = vadd.f32 %v274_v49, %v807_v37  ;;  %v303_v52 = vpop.f32.mrf.mxu1 }
  0xda   :  { %v304_v53 = vadd.f32 %v303_v52, %v809_v38 }
  0xdb   :  { %v377_v54 = vpack.c.bf16 %v360_v50, %v331_v47 }
  0xdc   :  { %v378_v55 = vpack.c.bf16 %v304_v53, %v275_v51 }
  0xdd   :  { %393 = vst [vmem:[%s898_s3 + $0x68] sm:$0xff] %v377_v54 }
  0xde   :  { %394 = vst [vmem:[%s898_s3 + $0x70] sm:$0xff] %v378_v55 }
  0xdf   :  { %v332_v56 = vpop.f32.mrf.mxu2 }
  0xe0   :  { %v333_v57 = vadd.f32 %v332_v56, %v813_v44  ;;  %v361_v58 = vpop.f32.mrf.mxu3 }
  0xe1   :  { %v362_v59 = vadd.f32 %v361_v58, %v815_v45 }
  0xe3   :  { %v379_v37 = vpack.c.bf16 %v362_v59, %v333_v57 }
  0xe5   :  { %395 = vst [vmem:[%s898_s3 + $0x78] sm:$0xff] %v379_v37 }

// kernel: rnn_module_forward.4
= control target key start
LH: loop header
LB: loop body
LE: loop exit
PB: predicated region body
PF: predicated region fallthrough
CT: control target
= control target key end

     0   :  { %vm351_vm12 = vcmask 1040384   ;;  %vm356_vm13 = vcmask 1041409   ;;  %vm360_vm14 = vcmask 1042434   ;;  %vm364_vm15 = vcmask 1043459   ;;  %s3693_s3 = inlined_call_operand.vmem [shape: bf16[128,512], index: 3, kind: input, shape index: {}]   ;;  %s3694_s1 = inlined_call_operand.vmem [shape: f32[8,128], index: 1, kind: input, shape index: {}]   ;;  %s3695_s0 = inlined_call_operand.vmem [shape: bf16[8,8,512], index: 0, kind: input, shape index: {}]   ;;  %s3696_s2 = inlined_call_operand.vmem [shape: f32[8,128], index: 2, kind: input, shape index: {}]   ;;  %s3697_s4 = inlined_call_operand.vmem [shape: bf16[8,8,128], index: 4, kind: output, shape index: {0}]   ;;  %s3698_s6 = inlined_call_operand.vmem [shape: f32[8,128], index: 6, kind: output, shape index: {2}]   ;;  %s3699_s5 = inlined_call_operand.vmem [shape: f32[8,128], index: 5, kind: output, shape index: {1}]  }
   0x1   :  { %v2157_v0 = vld [vmem:[%s3693_s3 + $0xe0] sm:$0xf]  ;;  %v2271_v1 = vld [vmem:[%s3693_s3 + $0xec] sm:$0xf0]  ;;  %v2269_v2 = vld [vmem:[%s3693_s3 + $0xe4] sm:$0xf] }
   0x2   :  { %v2447_v3 = vor.u32 %v2271_v1, %v2157_v0  ;;  %v2159_v4 = vld [vmem:[%s3693_s3 + $0xf0] sm:$0xf0]  ;;  %v2270_v5 = vld [vmem:[%s3693_s3 + $0xec] sm:$0xf]  ;;  %v2167_v6 = vld [vmem:[%s3693_s3 + $0xf8] sm:$0xf0] }
   0x3   :  { %v2458_v7 = vor.u32 %v2269_v2, %v2159_v4  ;;  %v2460_v8 = vor.u32 %v2270_v5, %v2167_v6  ;;  %v2141_v9 = vld [vmem:[%s3693_s3 + $0xc0] sm:$0xf]  ;;  %v2267_v10 = vld [vmem:[%s3693_s3 + $0xcc] sm:$0xf0]  ;;  %v2265_v11 = vld [vmem:[%s3693_s3 + $0xc4] sm:$0xf] }
   0x4   :  { %229 = vmatpush.bf16.msra.mxu0 %v2447_v3  ;;  %v2472_v12 = vor.u32 %v2267_v10, %v2141_v9  ;;  %v2143_v13 = vld [vmem:[%s3693_s3 + $0xd0] sm:$0xf0]  ;;  %v2266_v14 = vld [vmem:[%s3693_s3 + $0xcc] sm:$0xf]  ;;  %v2151_v15 = vld [vmem:[%s3693_s3 + $0xd8] sm:$0xf0] }
   0x5   :  { %242 = vmatpush.bf16.msra.mxu1 %v2458_v7  ;;  %268 = vmatpush.bf16.msra.mxu3 %v2460_v8  ;;  %v2485_v16 = vor.u32 %v2265_v11, %v2143_v13  ;;  %v2487_v17 = vor.u32 %v2266_v14, %v2151_v15  ;;  %v2165_v18 = vld [vmem:[%s3693_s3 + $0xe8] sm:$0xf]  ;;  %v2272_v19 = vld [vmem:[%s3693_s3 + $0xf4] sm:$0xf0]  ;;  %v2125_v20 = vld [vmem:[%s3693_s3 + $0xa0] sm:$0xf] }
   0x6   :  { %v2498_v21 = vor.u32 %v2272_v19, %v2165_v18  ;;  %v2263_v22 = vld [vmem:[%s3693_s3 + $0xac] sm:$0xf0]  ;;  %v2261_v23 = vld [vmem:[%s3693_s3 + $0xa4] sm:$0xf]  ;;  %v2127_v24 = vld [vmem:[%s3693_s3 + $0xb0] sm:$0xf0] }
   0x7   :  { %v2262_v25 = vld [vmem:[%s3693_s3 + $0xac] sm:$0xf]  ;;  %v2135_v26 = vld [vmem:[%s3693_s3 + $0xb8] sm:$0xf0]  ;;  %v2149_v27 = vld [vmem:[%s3693_s3 + $0xc8] sm:$0xf]  ;;  %v2520_v28 = vor.u32 %v2263_v22, %v2125_v20  ;;  %v2533_v32 = vor.u32 %v2261_v23, %v2127_v24 }
   0x8   :  { %230 = vmatpush.bf16.msra.mxu0 %v2472_v12  ;;  %255 = vmatpush.bf16.msra.mxu2 %v2498_v21  ;;  %v2268_v29 = vld [vmem:[%s3693_s3 + $0xd4] sm:$0xf0]  ;;  %v2109_v30 = vld [vmem:[%s3693_s3 + $0x80] sm:$0xf]  ;;  %v2259_v31 = vld [vmem:[%s3693_s3 + $0x8c] sm:$0xf0]  ;;  %v2535_v33 = vor.u32 %v2262_v25, %v2135_v26 }
   0x9   :  { %243 = vmatpush.bf16.msra.mxu1 %v2485_v16  ;;  %269 = vmatpush.bf16.msra.mxu3 %v2487_v17  ;;  %v2537_v34 = vor.u32 %v2268_v29, %v2149_v27  ;;  %v2257_v35 = vld [vmem:[%s3693_s3 + $0x84] sm:$0xf]  ;;  %v2111_v36 = vld [vmem:[%s3693_s3 + $0x90] sm:$0xf0]  ;;  %v2258_v37 = vld [vmem:[%s3693_s3 + $0x8c] sm:$0xf]  ;;  %v2559_v41 = vor.u32 %v2259_v31, %v2109_v30 }
   0xa   :  { %v2119_v38 = vld [vmem:[%s3693_s3 + $0x98] sm:$0xf0]  ;;  %v2133_v39 = vld [vmem:[%s3693_s3 + $0xa8] sm:$0xf]  ;;  %v2264_v40 = vld [vmem:[%s3693_s3 + $0xb4] sm:$0xf0]  ;;  %v2571_v45 = vor.u32 %v2257_v35, %v2111_v36 }
   0xb   :  { %v2561_v42 = vor.u32 %v2264_v40, %v2133_v39  ;;  %v2093_v43 = vld [vmem:[%s3693_s3 + $0x60] sm:$0xf]  ;;  %v2255_v44 = vld [vmem:[%s3693_s3 + $0x6c] sm:$0xf0]  ;;  %v2573_v46 = vor.u32 %v2258_v37, %v2119_v38  ;;  %v2253_v47 = vld [vmem:[%s3693_s3 + $0x64] sm:$0xf] }
   0xc   :  { %231 = vmatpush.bf16.msra.mxu0 %v2520_v28  ;;  %256 = vmatpush.bf16.msra.mxu2 %v2537_v34  ;;  %v2117_v48 = vld [vmem:[%s3693_s3 + $0x88] sm:$0xf]  ;;  %v2260_v49 = vld [vmem:[%s3693_s3 + $0x94] sm:$0xf0]  ;;  %v2095_v50 = vld [vmem:[%s3693_s3 + $0x70] sm:$0xf0]  ;;  %v2595_v53 = vor.u32 %v2255_v44, %v2093_v43 }
   0xd   :  { %244 = vmatpush.bf16.msra.mxu1 %v2533_v32  ;;  %270 = vmatpush.bf16.msra.mxu3 %v2535_v33  ;;  %v2254_v51 = vld [vmem:[%s3693_s3 + $0x6c] sm:$0xf]  ;;  %v2103_v52 = vld [vmem:[%s3693_s3 + $0x78] sm:$0xf0]  ;;  %v2597_v54 = vor.u32 %v2260_v49, %v2117_v48  ;;  %v2077_v55 = vld [vmem:[%s3693_s3 + $0x40] sm:$0xf]  ;;  %v2607_v57 = vor.u32 %v2253_v47, %v2095_v50 }
   0xe   :  { %v2251_v56 = vld [vmem:[%s3693_s3 + $0x4c] sm:$0xf0]  ;;  %v2609_v58 = vor.u32 %v2254_v51, %v2103_v52  ;;  %v2249_v59 = vld [vmem:[%s3693_s3 + $0x44] sm:$0xf]  ;;  %v2101_v60 = vld [vmem:[%s3693_s3 + $0x68] sm:$0xf] }
   0xf   :  { %v2256_v61 = vld [vmem:[%s3693_s3 + $0x74] sm:$0xf0]  ;;  %v2079_v62 = vld [vmem:[%s3693_s3 + $0x50] sm:$0xf0]  ;;  %v2250_v63 = vld [vmem:[%s3693_s3 + $0x4c] sm:$0xf]  ;;  %v2631_v1 = vor.u32 %v2251_v56, %v2077_v55 }
  0x10   :  { %232 = vmatpush.bf16.msra.mxu0 %v2559_v41  ;;  %257 = vmatpush.bf16.msra.mxu2 %v2561_v42  ;;  %v2087_v0 = vld [vmem:[%s3693_s3 + $0x58] sm:$0xf0]  ;;  %v2633_v2 = vor.u32 %v2256_v61, %v2101_v60  ;;  %v2061_v4 = vld [vmem:[%s3693_s3 + $0x20] sm:$0xf]  ;;  %v2247_v5 = vld [vmem:[%s3693_s3 + $0x2c] sm:$0xf0]  ;;  %v2643_v6 = vor.u32 %v2249_v59, %v2079_v62 }
  0x11   :  { %245 = vmatpush.bf16.msra.mxu1 %v2571_v45  ;;  %271 = vmatpush.bf16.msra.mxu3 %v2573_v46  ;;  %v2645_v9 = vor.u32 %v2250_v63, %v2087_v0  ;;  %v2245_v10 = vld [vmem:[%s3693_s3 + $0x24] sm:$0xf]  ;;  %v2085_v11 = vld [vmem:[%s3693_s3 + $0x48] sm:$0xf]  ;;  %v2252_v13 = vld [vmem:[%s3693_s3 + $0x54] sm:$0xf0]  ;;  %v2667_v19 = vor.u32 %v2247_v5, %v2061_v4 }
  0x12   :  { %v2063_v14 = vld [vmem:[%s3693_s3 + $0x30] sm:$0xf0]  ;;  %v2246_v15 = vld [vmem:[%s3693_s3 + $0x2c] sm:$0xf]  ;;  %v2071_v18 = vld [vmem:[%s3693_s3 + $0x38] sm:$0xf0]  ;;  %v2669_v20 = vor.u32 %v2252_v13, %v2085_v11 }
  0x13   :  { %v2045_v22 = vld [vmem:[%s3693_s3] sm:$0xf]  ;;  %v2243_v23 = vld [vmem:[%s3693_s3 + $0xc] sm:$0xf0]  ;;  %v2679_v24 = vor.u32 %v2245_v10, %v2063_v14  ;;  %v2681_v25 = vor.u32 %v2246_v15, %v2071_v18  ;;  %v2241_v26 = vld [vmem:[%s3693_s3 + $0x4] sm:$0xf] }
  0x14   :  { %233 = vmatpush.bf16.msra.mxu0 %v2595_v53  ;;  %258 = vmatpush.bf16.msra.mxu2 %v2597_v54  ;;  %v2069_v27 = vld [vmem:[%s3693_s3 + $0x28] sm:$0xf]  ;;  %v2248_v29 = vld [vmem:[%s3693_s3 + $0x34] sm:$0xf0]  ;;  %v2047_v30 = vld [vmem:[%s3693_s3 + $0x10] sm:$0xf0]  ;;  %v2703_v36 = vor.u32 %v2243_v23, %v2045_v22 }
  0x15   :  { %246 = vmatpush.bf16.msra.mxu1 %v2607_v57  ;;  %272 = vmatpush.bf16.msra.mxu3 %v2609_v58  ;;  %v2242_v31 = vld [vmem:[%s3693_s3 + $0xc] sm:$0xf]  ;;  %v2055_v35 = vld [vmem:[%s3693_s3 + $0x18] sm:$0xf0]  ;;  %v24_v37 = vld [vmem:[%s3694_s1] sm:$0xff]  ;;  %v2708_v38 = vor.u32 %v2248_v29, %v2069_v27  ;;  %v2712_v39 = vor.u32 %v2241_v26, %v2047_v30 }
  0x16   :  { %v2714_v40 = vor.u32 %v2242_v31, %v2055_v35  ;;  %v2053_v43 = vld [vmem:[%s3693_s3 + $0x8] sm:$0xf]  ;;  %v2244_v44 = vld [vmem:[%s3693_s3 + $0x14] sm:$0xf0]  ;;  %v68_v47 = vpack.c.bf16 %v24_v37, %v24_v37  ;;  %v62_v49 = vld [vmem:[%s3695_s0] sm:$0xff] }
  0x17   :  { %v2726_v48 = vor.u32 %v2244_v44, %v2053_v43  ;;  %v64_v50 = vunpack.c.l.bf16 %v62_v49  ;;  %v65_v51 = vunpack.c.h.bf16 %v62_v49  ;;  %v63_v59 = vld [vmem:[%s3695_s0 + $0x8] sm:$0xff] }
  0x18   :  { %234 = vmatpush.bf16.msra.mxu0 %v2631_v1  ;;  %259 = vmatpush.bf16.msra.mxu2 %v2633_v2  ;;  %v67_v63 = vunpack.c.h.bf16 %v63_v59  ;;  %v66_v23 = vunpack.c.l.bf16 %v63_v59 }
  0x19   :  { %247 = vmatpush.bf16.msra.mxu1 %v2643_v6  ;;  %273 = vmatpush.bf16.msra.mxu3 %v2645_v9 }
  0x1c   :  { %235 = vmatpush.bf16.msra.mxu0 %v2667_v19  ;;  %260 = vmatpush.bf16.msra.mxu2 %v2669_v20 }
  0x1d   :  { %248 = vmatpush.bf16.msra.mxu1 %v2679_v24  ;;  %274 = vmatpush.bf16.msra.mxu3 %v2681_v25 }
  0x20   :  { %236 = vmatpush.bf16.msra.mxu0 %v2703_v36  ;;  %261 = vmatpush.bf16.msra.mxu2 %v2708_v38 }
  0x21   :  { %249 = vmatpush.bf16.msra.mxu1 %v2712_v39  ;;  %275 = vmatpush.bf16.msra.mxu3 %v2714_v40 }
  0x23   :  { %237 = vmatmul.bf16.vlgmr.msra.gmra.mxu0 %v68_v47 }
  0x24   :  { %458 = vmatpush.bf16.msrb.mxu0 %v2447_v3  ;;  %250 = vmatmul.bf16.vlgmr.msra.gmra.mxu1 %v68_v47 }
  0x25   :  { %471 = vmatpush.bf16.msrb.mxu1 %v2458_v7  ;;  %497 = vmatpush.bf16.msrb.mxu3 %v2460_v8 }
  0x26   :  { %276 = vmatmul.bf16.vlgmr.msra.gmra.mxu3 %v68_v47  ;;  %262 = vmatpush.bf16.msra.mxu2 %v2726_v48 }
  0x28   :  { %459 = vmatpush.bf16.msrb.mxu0 %v2472_v12 }
  0x29   :  { %472 = vmatpush.bf16.msrb.mxu1 %v2485_v16  ;;  %498 = vmatpush.bf16.msrb.mxu3 %v2487_v17 }
  0x2a   :  { %484 = vmatpush.bf16.msrb.mxu2 %v2498_v21 }
  0x2b   :  { %263 = vmatmul.bf16.vlgmr.msra.gmra.mxu2 %v68_v47 }
  0x2c   :  { %460 = vmatpush.bf16.msrb.mxu0 %v2520_v28 }
  0x2d   :  { %473 = vmatpush.bf16.msrb.mxu1 %v2533_v32  ;;  %499 = vmatpush.bf16.msrb.mxu3 %v2535_v33 }
  0x2e   :  { %485 = vmatpush.bf16.msrb.mxu2 %v2537_v34 }
  0x30   :  { %461 = vmatpush.bf16.msrb.mxu0 %v2559_v41 }
  0x31   :  { %474 = vmatpush.bf16.msrb.mxu1 %v2571_v45  ;;  %500 = vmatpush.bf16.msrb.mxu3 %v2573_v46 }
  0x32   :  { %486 = vmatpush.bf16.msrb.mxu2 %v2561_v42 }
  0x34   :  { %462 = vmatpush.bf16.msrb.mxu0 %v2595_v53 }
  0x35   :  { %475 = vmatpush.bf16.msrb.mxu1 %v2607_v57  ;;  %501 = vmatpush.bf16.msrb.mxu3 %v2609_v58 }
  0x36   :  { %487 = vmatpush.bf16.msrb.mxu2 %v2597_v54 }
  0x38   :  { %463 = vmatpush.bf16.msrb.mxu0 %v2631_v1 }
  0x39   :  { %476 = vmatpush.bf16.msrb.mxu1 %v2643_v6  ;;  %502 = vmatpush.bf16.msrb.mxu3 %v2645_v9 }
  0x3a   :  { %488 = vmatpush.bf16.msrb.mxu2 %v2633_v2 }
  0x3c   :  { %464 = vmatpush.bf16.msrb.mxu0 %v2667_v19 }
  0x3d   :  { %477 = vmatpush.bf16.msrb.mxu1 %v2679_v24  ;;  %503 = vmatpush.bf16.msrb.mxu3 %v2681_v25 }
  0x3e   :  { %489 = vmatpush.bf16.msrb.mxu2 %v2669_v20 }
  0x40   :  { %465 = vmatpush.bf16.msrb.mxu0 %v2703_v36 }
  0x41   :  { %478 = vmatpush.bf16.msrb.mxu1 %v2712_v39  ;;  %504 = vmatpush.bf16.msrb.mxu3 %v2714_v40 }
  0x42   :  { %490 = vmatpush.bf16.msrb.mxu2 %v2708_v38 }
  0x44   :  { %682 = vmatpush.bf16.msra.mxu0 %v2447_v3 }
  0x45   :  { %695 = vmatpush.bf16.msra.mxu1 %v2458_v7  ;;  %721 = vmatpush.bf16.msra.mxu3 %v2460_v8 }
  0x46   :  { %491 = vmatpush.bf16.msrb.mxu2 %v2726_v48 }
  0x48   :  { %683 = vmatpush.bf16.msra.mxu0 %v2472_v12 }
  0x49   :  { %696 = vmatpush.bf16.msra.mxu1 %v2485_v16  ;;  %722 = vmatpush.bf16.msra.mxu3 %v2487_v17 }
  0x4a   :  { %708 = vmatpush.bf16.msra.mxu2 %v2498_v21 }
  0x4c   :  { %684 = vmatpush.bf16.msra.mxu0 %v2520_v28 }
  0x4d   :  { %697 = vmatpush.bf16.msra.mxu1 %v2533_v32  ;;  %723 = vmatpush.bf16.msra.mxu3 %v2535_v33 }
  0x4e   :  { %709 = vmatpush.bf16.msra.mxu2 %v2537_v34 }
  0x50   :  { %685 = vmatpush.bf16.msra.mxu0 %v2559_v41 }
  0x51   :  { %698 = vmatpush.bf16.msra.mxu1 %v2571_v45  ;;  %724 = vmatpush.bf16.msra.mxu3 %v2573_v46 }
  0x52   :  { %710 = vmatpush.bf16.msra.mxu2 %v2561_v42 }
  0x54   :  { %686 = vmatpush.bf16.msra.mxu0 %v2595_v53 }
  0x55   :  { %699 = vmatpush.bf16.msra.mxu1 %v2607_v57  ;;  %725 = vmatpush.bf16.msra.mxu3 %v2609_v58 }
  0x56   :  { %711 = vmatpush.bf16.msra.mxu2 %v2597_v54 }
  0x58   :  { %687 = vmatpush.bf16.msra.mxu0 %v2631_v1 }
  0x59   :  { %700 = vmatpush.bf16.msra.mxu1 %v2643_v6  ;;  %726 = vmatpush.bf16.msra.mxu3 %v2645_v9 }
  0x5a   :  { %712 = vmatpush.bf16.msra.mxu2 %v2633_v2 }
  0x5c   :  { %688 = vmatpush.bf16.msra.mxu0 %v2667_v19 }
  0x5d   :  { %701 = vmatpush.bf16.msra.mxu1 %v2679_v24  ;;  %727 = vmatpush.bf16.msra.mxu3 %v2681_v25 }
  0x5e   :  { %713 = vmatpush.bf16.msra.mxu2 %v2669_v20 }
  0x60   :  { %689 = vmatpush.bf16.msra.mxu0 %v2703_v36 }
  0x61   :  { %702 = vmatpush.bf16.msra.mxu1 %v2712_v39  ;;  %728 = vmatpush.bf16.msra.mxu3 %v2714_v40 }
  0x62   :  { %714 = vmatpush.bf16.msra.mxu2 %v2708_v38 }
  0x66   :  { %715 = vmatpush.bf16.msra.mxu2 %v2726_v48 }
  0xa0   :  { %v238_v52 = vpop.f32.mrf.mxu0 }
  0xa1   :  { %v281_v55 = vadd.f32 %v238_v52, %v64_v50  ;;  %v251_v56 = vpop.f32.mrf.mxu1 }
  0xa2   :  { %v282_v60 = vadd.f32 %v251_v56, %v65_v51 }
  0xa3   :  { %v2171_v61 = vmul.f32 -1.442695, %v281_v55 }
  0xa4   :  { %v2172_v62 = vmul.f32 -1.442695, %v282_v60 }
  0xa5   :  { %2274 = vpow2.f32 %v2171_v61 }
  0xa6   :  { %2276 = vpow2.f32 %v2172_v62 }
  0xa8   :  { %v240_v5 = vpop.f32.mrf.mxu0 }
  0xa9   :  { %v277_v0 = vpop.f32.mrf.mxu3  ;;  %v253_v10 = vpop.f32.mrf.mxu1 }
  0xaa   :  { %v284_v4 = vadd.f32 %v277_v0, %v67_v63  ;;  %v26_v10 = vld [vmem:[%s3696_s2] sm:$0xff] }
  0xab   :  { %v2275_v13 = vpop.eup %2274 }
  0xac   :  { %v2173_v11 = vmul.f32 -1.442695, %v284_v4  ;;  %v2277_v15 = vpop.eup %2276  ;;  %v288_v18 = vadd.f32 1.0, %v2275_v13 }
  0xad   :  { %v307_v22 = vadd.f32 1.0, %v2277_v15 }
  0xae   :  { %v264_v14 = vpop.f32.mrf.mxu2  ;;  %2278 = vpow2.f32 %v2173_v11  ;;  %v300_v50 = vand.u32 2147483648, %v288_v18  ;;  %v298_v55 = vand.u32 2147483647, %v288_v18  ;;  %vm294_vm2 = vweird.f32 %v288_v18 }
  0xaf   :  { %2280 = vrcp.f32 %v288_v18  ;;  %v283_v29 = vadd.f32 %v264_v14, %v66_v23  ;;  %v319_v51 = vand.u32 2147483648, %v307_v22  ;;  %v317_v59 = vand.u32 2147483647, %v307_v22 }
  0xb0   :  { %2282 = vrcp.f32 %v307_v22  ;;  %vm313_vm3 = vweird.f32 %v307_v22  ;;  %v301_v0 = vor.u32 1.1754944e-38, %v300_v50  ;;  %vm299_vm6 = vcmp.eq.f32.partialorder %v298_v55, 8.507059e+37 }
  0xb1   :  { %v279_v26 = vpop.f32.mrf.mxu3  ;;  %v320_v5 = vor.u32 1.1754944e-38, %v319_v51  ;;  %vm318_vm7 = vcmp.eq.f32.partialorder %v317_v59, 8.507059e+37  ;;  %v2402_v51 = vmov 286326784  }
  0xb4   :  { %v2279_v27 = vpop.eup %2278 }
  0xb5   :  { %v327_v30 = vadd.f32 1.0, %v2279_v27  ;;  %v2281_v35 = vpop.eup %2280 }
  0xb6   :  { %v266_v31 = vpop.f32.mrf.mxu2  ;;  %v2283_v37 = vpop.eup %2282  ;;  %v290_v43 = vmul.f32 %v2281_v35, %v288_v18  ;;  %vm295_vm0 = vweird.f32 %v2281_v35 }
  0xb7   :  { %2284 = vrcp.f32 %v327_v30  ;;  %v309_v44 = vmul.f32 %v2283_v37, %v307_v22  ;;  %vm314_vm1 = vweird.f32 %v2283_v37  ;;  %vm296_vm4 = vmor %vm294_vm2, %vm295_vm0  ;;  %v339_v31 = vand.u32 2147483648, %v327_v30 }
  0xb8   :  { %2286 = vtanh.f32 %v283_v29  ;;  %v291_v47 = vsub.f32 1.0, %v290_v43  ;;  %vm315_vm5 = vmor %vm313_vm3, %vm314_vm1  ;;  %vm333_vm9 = vweird.f32 %v327_v30  ;;  %v337_v43 = vand.u32 2147483647, %v327_v30 }
  0xb9   :  { %v310_v49 = vsub.f32 1.0, %v309_v44  ;;  %v340_v44 = vor.u32 1.1754944e-38, %v339_v31  ;;  %vm425_vm0 = vsmask.f32 256  ;;  %v430_v31 = vld [vmem:[%s3697_s4 + $0x4] sm:$0x1] }
  0xba   :  { %v292_v52 = vmul.f32 %v2281_v35, %v291_v47  ;;  %vm338_vm11 = vcmp.eq.f32.partialorder %v337_v43, 8.507059e+37  ;;  %vm2820_vm1 = vmand %vm351_vm12, %vm425_vm0 }
  0xbb   :  { %v311_v56 = vmul.f32 %v2283_v37, %v310_v49 }
  0xbc   :  { %v293_v61 = vadd.f32 %v2281_v35, %v292_v52  ;;  %v385_v52 = vunpack.c.l.s4 %v2402_v51 }
  0xbd   :  { %v2285_v60 = vpop.eup %2284  ;;  %v312_v4 = vadd.f32 %v2283_v37, %v311_v56 }
  0xbe   :  { %v2287_v62 = vpop.eup %2286  ;;  %v329_v63 = vmul.f32 %v2285_v60, %v327_v30  ;;  %v297_v11 = vsel %vm296_vm4, %v2281_v35, %v293_v61  ;;  %vm334_vm8 = vweird.f32 %v2285_v60 }
  0xbf   :  { %v302_v14 = vsel %vm299_vm6, %v301_v0, %v297_v11  ;;  %v316_v15 = vsel %vm315_vm5, %v2283_v37, %v312_v4  ;;  %vm335_vm10 = vmor %vm333_vm9, %vm334_vm8 }
  0xc0   :  { %v330_v13 = vsub.f32 1.0, %v329_v63  ;;  %v321_v23 = vsel %vm318_vm7, %v320_v5, %v316_v15  ;;  %v344_v18 = vmul.f32 %v2287_v62, %v302_v14 }
  0xc1   :  { %v343_v22 = vmul.f32 %v321_v23, %v26_v10 }
  0xc2   :  { %v331_v26 = vmul.f32 %v2285_v60, %v330_v13 }
  0xc3   :  { %v2802_v27 = vadd.f32 %v344_v18, %v343_v22 }
  0xc4   :  { %v332_v29 = vadd.f32 %v2285_v60, %v331_v26 }
  0xc5   :  { %2288 = vtanh.f32 %v2802_v27 }
  0xc6   :  { %v336_v35 = vsel %vm335_vm10, %v2285_v60, %v332_v29  ;;  %v2810_v60 = vunpack.c.0.s8 %v385_v52  ;;  %v427_v29 = vld [vmem:[%s3697_s4] sm:$0x1]  ;;  %v436_v52 = vld [vmem:[%s3697_s4 + $0xc] sm:$0x1] }
  0xc7   :  { %v341_v37 = vsel %vm338_vm11, %v340_v44, %v336_v35 }
  0xcb   :  { %v2289_v47 = vpop.eup %2288 }
  0xcc   :  { %v347_v49 = vmul.f32 %v2289_v47, %v341_v37  ;;  %v433_v47 = vld [vmem:[%s3697_s4 + $0x8] sm:$0x1] }
  0xce   :  { %v348_v50 = vpack.c.bf16 %v347_v49, %v347_v49 }
  0xd0   :  { %v350_v55 = vrot.slane %v348_v50, 3  ;;  %466 = vmatmul.bf16.vlgmr.msrb.gmra.mxu0 %v348_v50  ;;  %479 = vmatmul.bf16.vlgmr.msrb.gmra.mxu1 %v348_v50 }
  0xd1   :  { %492 = vmatmul.bf16.vlgmr.msrb.gmra.mxu2 %v348_v50  ;;  %505 = vmatmul.bf16.vlgmr.msrb.gmra.mxu3 %v348_v50 }
  0xd2   :  { %907 = vmatpush.bf16.msrb.mxu0 %v2447_v3  ;;  %920 = vmatpush.bf16.msrb.mxu1 %v2458_v7  ;;  %v354_v30 = vsel %vm351_vm12, %v348_v50, %v350_v55  ;;  %v357_v56 = vsel %vm356_vm13, %v348_v50, %v350_v55  ;;  %v361_v59 = vsel %vm360_vm14, %v348_v50, %v350_v55 }
  0xd3   :  { %933 = vmatpush.bf16.msrb.mxu2 %v2498_v21  ;;  %946 = vmatpush.bf16.msrb.mxu3 %v2460_v8  ;;  %v359_v61 = vrot.slane %v357_v56, 1  ;;  %v363_v62 = vrot.slane %v361_v59, 2  ;;  %v365_v63 = vsel %vm364_vm15, %v348_v50, %v350_v55  ;;  %v369_v0 = vunpack.i.h.s16 %v354_v30  ;;  %v439_v55 = vld [vmem:[%s3697_s4 + $0x10] sm:$0x1] }
  0xd4   :  { %v367_v4 = vrot.slane %v365_v63, 3  ;;  %v2174_v5 = vpack.i.b16 %v354_v30, %v354_v30 }
  0xd5   :  { %v371_v10 = vunpack.i.h.s16 %v359_v61  ;;  %v373_v11 = vunpack.i.h.s16 %v363_v62  ;;  %v377_v13 = vpack.i.b16 %v369_v0, %v369_v0  ;;  %v2175_v14 = vpack.i.b16 %v359_v61, %v359_v61 }
  0xd6   :  { %908 = vmatpush.bf16.msrb.mxu0 %v2472_v12  ;;  %921 = vmatpush.bf16.msrb.mxu1 %v2485_v16  ;;  %v375_v15 = vunpack.i.h.s16 %v367_v4  ;;  %v2176_v23 = vpack.i.b16 %v363_v62, %v363_v62  ;;  %v2177_v18 = vpack.i.b16 %v367_v4, %v367_v4  ;;  %v387_v26 = vperm.slane %v2174_v5, %v2810_v60  ;;  %v442_v62 = vld [vmem:[%s3697_s4 + $0x14] sm:$0x1]  ;;  %v445_v4 = vld [vmem:[%s3697_s4 + $0x18] sm:$0x1] }
  0xd7   :  { %934 = vmatpush.bf16.msrb.mxu2 %v2537_v34  ;;  %947 = vmatpush.bf16.msrb.mxu3 %v2487_v17  ;;  %v379_v43 = vpack.i.b16 %v371_v10, %v371_v10  ;;  %v381_v35 = vpack.i.b16 %v373_v11, %v373_v11  ;;  %v391_v44 = vperm.slane %v377_v13, %v2810_v60  ;;  %v448_v11 = vld [vmem:[%s3697_s4 + $0x1c] sm:$0x1] }
  0xd8   :  { %v383_v37 = vpack.i.b16 %v375_v15, %v375_v15  ;;  %v395_v49 = vperm.slane %v2175_v14, %v2810_v60  ;;  %v403_v50 = vperm.slane %v2176_v23, %v2810_v60  ;;  %v411_v51 = vperm.slane %v2177_v18, %v2810_v60  ;;  %v2178_v23 = vld [vmem:[%s3695_s0 + $0x10] sm:$0xff] }
  0xd9   :  { %v399_v30 = vperm.slane %v379_v43, %v2810_v60  ;;  %v407_v56 = vperm.slane %v381_v35, %v2810_v60  ;;  %v428_v59 = vsel %vm2820_vm1, %v387_v26, %v427_v29  ;;  %v431_v61 = vsel %vm2820_vm1, %v391_v44, %v430_v31  ;;  %v2179_v35 = vld [vmem:[%s3695_s0 + $0x18] sm:$0xff] }
  0xda   :  { %909 = vmatpush.bf16.msrb.mxu0 %v2520_v28  ;;  %922 = vmatpush.bf16.msrb.mxu1 %v2533_v32  ;;  %v415_v63 = vperm.slane %v383_v37, %v2810_v60  ;;  %429 = vst [vmem:[%s3697_s4] sm:$0x1] %v428_v59  ;;  %v434_v0 = vsel %vm2820_vm1, %v395_v49, %v433_v47  ;;  %v454_v18 = vunpack.c.l.bf16 %v2178_v23  ;;  %v455_v26 = vunpack.c.h.bf16 %v2178_v23 }
  0xdb   :  { %935 = vmatpush.bf16.msrb.mxu2 %v2561_v42  ;;  %948 = vmatpush.bf16.msrb.mxu3 %v2535_v33  ;;  %432 = vst [vmem:[%s3697_s4 + $0x4] sm:$0x1] %v431_v61  ;;  %v437_v5 = vsel %vm2820_vm1, %v399_v30, %v436_v52  ;;  %v440_v10 = vsel %vm2820_vm1, %v403_v50, %v439_v55  ;;  %v457_v37 = vunpack.c.h.bf16 %v2179_v35 }
  0xdc   :  { %435 = vst [vmem:[%s3697_s4 + $0x8] sm:$0x1] %v434_v0  ;;  %v443_v13 = vsel %vm2820_vm1, %v407_v56, %v442_v62  ;;  %v446_v14 = vsel %vm2820_vm1, %v411_v51, %v445_v4  ;;  %v449_v15 = vsel %vm2820_vm1, %v415_v63, %v448_v11  ;;  %v456_v4 = vunpack.c.l.bf16 %v2179_v35 }
  0xdd   :  { %438 = vst [vmem:[%s3697_s4 + $0xc] sm:$0x1] %v437_v5 }
  0xde   :  { %910 = vmatpush.bf16.msrb.mxu0 %v2559_v41  ;;  %923 = vmatpush.bf16.msrb.mxu1 %v2571_v45  ;;  %441 = vst [vmem:[%s3697_s4 + $0x10] sm:$0x1] %v440_v10 }
  0xdf   :  { %936 = vmatpush.bf16.msrb.mxu2 %v2597_v54  ;;  %949 = vmatpush.bf16.msrb.mxu3 %v2573_v46  ;;  %444 = vst [vmem:[%s3697_s4 + $0x14] sm:$0x1] %v443_v13 }
  0xe0   :  { %447 = vst [vmem:[%s3697_s4 + $0x18] sm:$0x1] %v446_v14 }
  0xe1   :  { %450 = vst [vmem:[%s3697_s4 + $0x1c] sm:$0x1] %v449_v15 }
  0xe2   :  { %911 = vmatpush.bf16.msrb.mxu0 %v2595_v53  ;;  %924 = vmatpush.bf16.msrb.mxu1 %v2607_v57 }
  0xe3   :  { %937 = vmatpush.bf16.msrb.mxu2 %v2633_v2  ;;  %950 = vmatpush.bf16.msrb.mxu3 %v2609_v58 }
  0xe6   :  { %912 = vmatpush.bf16.msrb.mxu0 %v2631_v1  ;;  %925 = vmatpush.bf16.msrb.mxu1 %v2643_v6 }
  0xe7   :  { %938 = vmatpush.bf16.msrb.mxu2 %v2669_v20  ;;  %951 = vmatpush.bf16.msrb.mxu3 %v2645_v9 }
  0xea   :  { %913 = vmatpush.bf16.msrb.mxu0 %v2667_v19  ;;  %926 = vmatpush.bf16.msrb.mxu1 %v2679_v24 }
  0xeb   :  { %939 = vmatpush.bf16.msrb.mxu2 %v2708_v38  ;;  %952 = vmatpush.bf16.msrb.mxu3 %v2681_v25 }
  0xee   :  { %914 = vmatpush.bf16.msrb.mxu0 %v2703_v36  ;;  %927 = vmatpush.bf16.msrb.mxu1 %v2712_v39 }
  0xef   :  { %940 = vmatpush.bf16.msrb.mxu2 %v2726_v48  ;;  %953 = vmatpush.bf16.msrb.mxu3 %v2714_v40 }
 0x14d   :  { %v467_v22 = vpop.f32.mrf.mxu0  ;;  %v480_v29 = vpop.f32.mrf.mxu1 }
 0x14e   :  { %v510_v31 = vadd.f32 %v467_v22, %v454_v18  ;;  %v511_v43 = vadd.f32 %v480_v29, %v455_v26 }
 0x150   :  { %v2180_v44 = vmul.f32 -1.442695, %v510_v31  ;;  %v2181_v47 = vmul.f32 -1.442695, %v511_v43 }
 0x152   :  { %2290 = vpow2.f32 %v2180_v44 }
 0x153   :  { %2292 = vpow2.f32 %v2181_v47 }
 0x154   :  { %v493_v49 = vpop.f32.mrf.mxu2  ;;  %v506_v50 = vpop.f32.mrf.mxu3 }
 0x155   :  { %v513_v51 = vadd.f32 %v506_v50, %v457_v37  ;;  %v469_v52 = vpop.f32.mrf.mxu0  ;;  %v482_v55 = vpop.f32.mrf.mxu1  ;;  %v512_v13 = vadd.f32 %v493_v49, %v456_v4 }
 0x157   :  { %v2182_v30 = vmul.f32 -1.442695, %v513_v51 }
 0x158   :  { %v2291_v56 = vpop.eup %2290 }
 0x159   :  { %v2293_v59 = vpop.eup %2292  ;;  %v517_v61 = vadd.f32 1.0, %v2291_v56  ;;  %2294 = vpow2.f32 %v2182_v30 }
 0x15a   :  { %v536_v62 = vadd.f32 1.0, %v2293_v59 }
 0x15b   :  { %2296 = vrcp.f32 %v517_v61  ;;  %v529_v22 = vand.u32 2147483648, %v517_v61  ;;  %v527_v43 = vand.u32 2147483647, %v517_v61  ;;  %vm523_vm4 = vweird.f32 %v517_v61 }
 0x15c   :  { %2298 = vrcp.f32 %v536_v62  ;;  %v495_v63 = vpop.f32.mrf.mxu2  ;;  %v508_v0 = vpop.f32.mrf.mxu3  ;;  %v548_v29 = vand.u32 2147483648, %v536_v62  ;;  %v546_v47 = vand.u32 2147483647, %v536_v62  ;;  %vm542_vm5 = vweird.f32 %v536_v62 }
 0x15d   :  { %v530_v49 = vor.u32 1.1754944e-38, %v529_v22  ;;  %vm528_vm8 = vcmp.eq.f32.partialorder %v527_v43, 8.507059e+37 }
 0x15e   :  { %v549_v52 = vor.u32 1.1754944e-38, %v548_v29  ;;  %vm547_vm9 = vcmp.eq.f32.partialorder %v546_v47, 8.507059e+37 }
 0x15f   :  { %v2295_v5 = vpop.eup %2294 }
 0x160   :  { %v556_v10 = vadd.f32 1.0, %v2295_v5 }
 0x161   :  { %v2297_v11 = vpop.eup %2296 }
 0x162   :  { %v2299_v14 = vpop.eup %2298  ;;  %v519_v15 = vmul.f32 %v2297_v11, %v517_v61  ;;  %2300 = vrcp.f32 %v556_v10  ;;  %vm524_vm2 = vweird.f32 %v2297_v11  ;;  %vm562_vm11 = vweird.f32 %v556_v10 }
 0x163   :  { %v538_v23 = vmul.f32 %v2299_v14, %v536_v62  ;;  %2302 = vtanh.f32 %v512_v13  ;;  %vm543_vm3 = vweird.f32 %v2299_v14  ;;  %vm525_vm6 = vmor %vm523_vm4, %vm524_vm2  ;;  %vm649_vm2 = vsmask.f32 7938 }
 0x164   :  { %v520_v18 = vsub.f32 1.0, %v519_v15  ;;  %vm544_vm7 = vmor %vm542_vm5, %vm543_vm3  ;;  %v568_v15 = vand.u32 2147483648, %v556_v10 }
 0x165   :  { %v539_v26 = vsub.f32 1.0, %v538_v23  ;;  %vm2944_vm3 = vmand %vm351_vm12, %vm649_vm2 }
 0x166   :  { %v521_v31 = vmul.f32 %v2297_v11, %v520_v18  ;;  %v569_v18 = vor.u32 1.1754944e-38, %v568_v15 }
 0x167   :  { %v540_v44 = vmul.f32 %v2299_v14, %v539_v26 }
 0x168   :  { %v2301_v35 = vpop.eup %2300  ;;  %v522_v37 = vadd.f32 %v2297_v11, %v521_v31 }
 0x169   :  { %v541_v50 = vadd.f32 %v2299_v14, %v540_v44  ;;  %v558_v51 = vmul.f32 %v2301_v35, %v556_v10  ;;  %v2303_v30 = vpop.eup %2302  ;;  %vm563_vm10 = vweird.f32 %v2301_v35 }
 0x16a   :  { %v526_v55 = vsel %vm525_vm6, %v2297_v11, %v522_v37  ;;  %v566_v11 = vand.u32 2147483647, %v556_v10  ;;  %vm564_vm0 = vmor %vm562_vm11, %vm563_vm10 }
 0x16b   :  { %v531_v56 = vsel %vm528_vm8, %v530_v49, %v526_v55  ;;  %v545_v59 = vsel %vm544_vm7, %v2299_v14, %v541_v50  ;;  %v559_v63 = vsub.f32 1.0, %v558_v51 }
 0x16c   :  { %v550_v0 = vsel %vm547_vm9, %v549_v52, %v545_v59  ;;  %v573_v4 = vmul.f32 %v2303_v30, %v531_v56  ;;  %vm567_vm1 = vcmp.eq.f32.partialorder %v566_v11, 8.507059e+37 }
 0x16d   :  { %v572_v5 = vmul.f32 %v550_v0, %v2802_v27  ;;  %v560_v13 = vmul.f32 %v2301_v35, %v559_v63 }
 0x16f   :  { %v2928_v61 = vadd.f32 %v573_v4, %v572_v5  ;;  %v561_v62 = vadd.f32 %v2301_v35, %v560_v13 }
 0x171   :  { %2304 = vtanh.f32 %v2928_v61  ;;  %v565_v23 = vsel %vm564_vm0, %v2301_v35, %v561_v62 }
 0x172   :  { %v570_v26 = vsel %vm567_vm1, %v569_v18, %v565_v23 }
 0x177   :  { %v2305_v14 = vpop.eup %2304 }
 0x178   :  { %v576_v22 = vmul.f32 %v2305_v14, %v570_v26  ;;  %v651_v14 = vld [vmem:[%s3697_s4] sm:$0x1]  ;;  %v654_v26 = vld [vmem:[%s3697_s4 + $0x4] sm:$0x1] }
 0x17a   :  { %v577_v29 = vpack.c.bf16 %v576_v22, %v576_v22 }
 0x17c   :  { %v579_v31 = vrot.slane %v577_v29, 3  ;;  %690 = vmatmul.bf16.vlgmr.msra.gmra.mxu0 %v577_v29  ;;  %703 = vmatmul.bf16.vlgmr.msra.gmra.mxu1 %v577_v29 }
 0x17d   :  { %716 = vmatmul.bf16.vlgmr.msra.gmra.mxu2 %v577_v29  ;;  %729 = vmatmul.bf16.vlgmr.msra.gmra.mxu3 %v577_v29 }
 0x17e   :  { %1131 = vmatpush.bf16.msra.mxu0 %v2447_v3  ;;  %1144 = vmatpush.bf16.msra.mxu1 %v2458_v7  ;;  %v582_v27 = vsel %vm351_vm12, %v577_v29, %v579_v31  ;;  %v584_v10 = vsel %vm356_vm13, %v577_v29, %v579_v31  ;;  %v587_v43 = vsel %vm360_vm14, %v577_v29, %v579_v31 }
 0x17f   :  { %1157 = vmatpush.bf16.msra.mxu2 %v2498_v21  ;;  %1170 = vmatpush.bf16.msra.mxu3 %v2460_v8  ;;  %v586_v44 = vrot.slane %v584_v10, 1  ;;  %v589_v47 = vrot.slane %v587_v43, 2  ;;  %v590_v35 = vsel %vm364_vm15, %v577_v29, %v579_v31  ;;  %v594_v37 = vunpack.i.h.s16 %v582_v27  ;;  %v657_v10 = vld [vmem:[%s3697_s4 + $0x8] sm:$0x1] }
 0x180   :  { %v592_v49 = vrot.slane %v590_v35, 3  ;;  %v2183_v50 = vpack.i.b16 %v582_v27, %v582_v27  ;;  %v663_v35 = vld [vmem:[%s3697_s4 + $0x10] sm:$0x1] }
 0x181   :  { %v596_v51 = vunpack.i.h.s16 %v586_v44  ;;  %v598_v52 = vunpack.i.h.s16 %v589_v47  ;;  %v602_v55 = vpack.i.b16 %v594_v37, %v594_v37  ;;  %v2184_v30 = vpack.i.b16 %v586_v44, %v586_v44 }
 0x182   :  { %1132 = vmatpush.bf16.msra.mxu0 %v2472_v12  ;;  %1145 = vmatpush.bf16.msra.mxu1 %v2485_v16  ;;  %v600_v56 = vunpack.i.h.s16 %v592_v49  ;;  %v2185_v59 = vpack.i.b16 %v589_v47, %v589_v47  ;;  %v2186_v63 = vpack.i.b16 %v592_v49, %v592_v49  ;;  %v612_v0 = vperm.slane %v2183_v50, %v2810_v60  ;;  %v660_v47 = vld [vmem:[%s3697_s4 + $0xc] sm:$0x1]  ;;  %v666_v50 = vld [vmem:[%s3697_s4 + $0x14] sm:$0x1] }
 0x183   :  { %1158 = vmatpush.bf16.msra.mxu2 %v2537_v34  ;;  %1171 = vmatpush.bf16.msra.mxu3 %v2487_v17  ;;  %v604_v5 = vpack.i.b16 %v596_v51, %v596_v51  ;;  %v606_v13 = vpack.i.b16 %v598_v52, %v598_v52  ;;  %v616_v62 = vperm.slane %v602_v55, %v2810_v60  ;;  %v669_v52 = vld [vmem:[%s3697_s4 + $0x18] sm:$0x1] }
 0x184   :  { %v608_v15 = vpack.i.b16 %v600_v56, %v600_v56  ;;  %v620_v11 = vperm.slane %v2184_v30, %v2810_v60  ;;  %v628_v23 = vperm.slane %v2185_v59, %v2810_v60  ;;  %v636_v18 = vperm.slane %v2186_v63, %v2810_v60  ;;  %v672_v30 = vld [vmem:[%s3697_s4 + $0x1c] sm:$0x1]  ;;  %v2187_v59 = vld [vmem:[%s3695_s0 + $0x20] sm:$0xff] }
 0x185   :  { %v624_v22 = vperm.slane %v604_v5, %v2810_v60  ;;  %v632_v29 = vperm.slane %v606_v13, %v2810_v60  ;;  %v652_v31 = vsel %vm2944_vm3, %v612_v0, %v651_v14  ;;  %v655_v27 = vsel %vm2944_vm3, %v616_v62, %v654_v26 }
 0x186   :  { %1133 = vmatpush.bf16.msra.mxu0 %v2520_v28  ;;  %1146 = vmatpush.bf16.msra.mxu1 %v2533_v32  ;;  %v640_v43 = vperm.slane %v608_v15, %v2810_v60  ;;  %653 = vst [vmem:[%s3697_s4] sm:$0x1] %v652_v31  ;;  %v658_v44 = vsel %vm2944_vm3, %v620_v11, %v657_v10  ;;  %v678_v63 = vunpack.c.l.bf16 %v2187_v59  ;;  %v679_v0 = vunpack.c.h.bf16 %v2187_v59  ;;  %v2188_v15 = vld [vmem:[%s3695_s0 + $0x28] sm:$0xff] }
 0x187   :  { %1159 = vmatpush.bf16.msra.mxu2 %v2561_v42  ;;  %1172 = vmatpush.bf16.msra.mxu3 %v2535_v33  ;;  %656 = vst [vmem:[%s3697_s4 + $0x4] sm:$0x1] %v655_v27  ;;  %v661_v37 = vsel %vm2944_vm3, %v624_v22, %v660_v47  ;;  %v664_v49 = vsel %vm2944_vm3, %v628_v23, %v663_v35 }
 0x188   :  { %659 = vst [vmem:[%s3697_s4 + $0x8] sm:$0x1] %v658_v44  ;;  %v667_v51 = vsel %vm2944_vm3, %v632_v29, %v666_v50  ;;  %v670_v55 = vsel %vm2944_vm3, %v636_v18, %v669_v52  ;;  %v673_v56 = vsel %vm2944_vm3, %v640_v43, %v672_v30  ;;  %v681_v18 = vunpack.c.h.bf16 %v2188_v15 }
 0x189   :  { %662 = vst [vmem:[%s3697_s4 + $0xc] sm:$0x1] %v661_v37 }
 0x18a   :  { %1134 = vmatpush.bf16.msra.mxu0 %v2559_v41  ;;  %1147 = vmatpush.bf16.msra.mxu1 %v2571_v45  ;;  %665 = vst [vmem:[%s3697_s4 + $0x10] sm:$0x1] %v664_v49  ;;  %v680_v49 = vunpack.c.l.bf16 %v2188_v15 }
 0x18b   :  { %1160 = vmatpush.bf16.msra.mxu2 %v2597_v54  ;;  %1173 = vmatpush.bf16.msra.mxu3 %v2573_v46  ;;  %668 = vst [vmem:[%s3697_s4 + $0x14] sm:$0x1] %v667_v51 }
 0x18c   :  { %671 = vst [vmem:[%s3697_s4 + $0x18] sm:$0x1] %v670_v55 }
 0x18d   :  { %674 = vst [vmem:[%s3697_s4 + $0x1c] sm:$0x1] %v673_v56 }
 0x18e   :  { %1135 = vmatpush.bf16.msra.mxu0 %v2595_v53  ;;  %1148 = vmatpush.bf16.msra.mxu1 %v2607_v57 }
 0x18f   :  { %1161 = vmatpush.bf16.msra.mxu2 %v2633_v2  ;;  %1174 = vmatpush.bf16.msra.mxu3 %v2609_v58 }
 0x192   :  { %1136 = vmatpush.bf16.msra.mxu0 %v2631_v1  ;;  %1149 = vmatpush.bf16.msra.mxu1 %v2643_v6 }
 0x193   :  { %1162 = vmatpush.bf16.msra.mxu2 %v2669_v20  ;;  %1175 = vmatpush.bf16.msra.mxu3 %v2645_v9 }
 0x196   :  { %1137 = vmatpush.bf16.msra.mxu0 %v2667_v19  ;;  %1150 = vmatpush.bf16.msra.mxu1 %v2679_v24 }
 0x197   :  { %1163 = vmatpush.bf16.msra.mxu2 %v2708_v38  ;;  %1176 = vmatpush.bf16.msra.mxu3 %v2681_v25 }
 0x19a   :  { %1138 = vmatpush.bf16.msra.mxu0 %v2703_v36  ;;  %1151 = vmatpush.bf16.msra.mxu1 %v2712_v39 }
 0x19b   :  { %1164 = vmatpush.bf16.msra.mxu2 %v2726_v48  ;;  %1177 = vmatpush.bf16.msra.mxu3 %v2714_v40 }
 0x1f9   :  { %v691_v4 = vpop.f32.mrf.mxu0  ;;  %v704_v5 = vpop.f32.mrf.mxu1 }
 0x1fa   :  { %v734_v13 = vadd.f32 %v691_v4, %v678_v63  ;;  %v735_v62 = vadd.f32 %v704_v5, %v679_v0 }
 0x1fc   :  { %v2189_v11 = vmul.f32 -1.442695, %v734_v13  ;;  %v2190_v23 = vmul.f32 -1.442695, %v735_v62 }
 0x1fe   :  { %2306 = vpow2.f32 %v2189_v11 }
 0x1ff   :  { %2308 = vpow2.f32 %v2190_v23 }
 0x200   :  { %v717_v14 = vpop.f32.mrf.mxu2  ;;  %v730_v26 = vpop.f32.mrf.mxu3 }
 0x201   :  { %v737_v22 = vadd.f32 %v730_v26, %v681_v18  ;;  %v693_v29 = vpop.f32.mrf.mxu0  ;;  %v706_v31 = vpop.f32.mrf.mxu1  ;;  %v736_v55 = vadd.f32 %v717_v14, %v680_v49 }
 0x203   :  { %v2191_v27 = vmul.f32 -1.442695, %v737_v22 }
 0x204   :  { %v2307_v10 = vpop.eup %2306 }
 0x205   :  { %v2309_v43 = vpop.eup %2308  ;;  %v741_v44 = vadd.f32 1.0, %v2307_v10  ;;  %2310 = vpow2.f32 %v2191_v27 }
 0x206   :  { %v760_v47 = vadd.f32 1.0, %v2309_v43 }
 0x207   :  { %2312 = vrcp.f32 %v741_v44  ;;  %v753_v4 = vand.u32 2147483648, %v741_v44  ;;  %v751_v62 = vand.u32 2147483647, %v741_v44  ;;  %vm747_vm6 = vweird.f32 %v741_v44 }
 0x208   :  { %2314 = vrcp.f32 %v760_v47  ;;  %v719_v35 = vpop.f32.mrf.mxu2  ;;  %v732_v37 = vpop.f32.mrf.mxu3  ;;  %v772_v5 = vand.u32 2147483648, %v760_v47  ;;  %v770_v23 = vand.u32 2147483647, %v760_v47  ;;  %vm766_vm7 = vweird.f32 %v760_v47 }
 0x209   :  { %v754_v14 = vor.u32 1.1754944e-38, %v753_v4  ;;  %vm752_vm10 = vcmp.eq.f32.partialorder %v751_v62, 8.507059e+37 }
 0x20a   :  { %v773_v29 = vor.u32 1.1754944e-38, %v772_v5  ;;  %vm771_vm11 = vcmp.eq.f32.partialorder %v770_v23, 8.507059e+37 }
 0x20b   :  { %v2311_v50 = vpop.eup %2310 }
 0x20c   :  { %v780_v51 = vadd.f32 1.0, %v2311_v50 }
 0x20d   :  { %v2313_v52 = vpop.eup %2312 }
 0x20e   :  { %v2315_v30 = vpop.eup %2314  ;;  %v743_v56 = vmul.f32 %v2313_v52, %v741_v44  ;;  %2316 = vrcp.f32 %v780_v51  ;;  %vm748_vm4 = vweird.f32 %v2313_v52  ;;  %vm786_vm1 = vweird.f32 %v780_v51 }
 0x20f   :  { %v762_v59 = vmul.f32 %v2315_v30, %v760_v47  ;;  %2318 = vtanh.f32 %v736_v55  ;;  %vm767_vm5 = vweird.f32 %v2315_v30  ;;  %vm749_vm8 = vmor %vm747_vm6, %vm748_vm4  ;;  %vm874_vm4 = vsmask.f32 1280 }
 0x210   :  { %v744_v63 = vsub.f32 1.0, %v743_v56  ;;  %vm768_vm9 = vmor %vm766_vm7, %vm767_vm5  ;;  %v792_v56 = vand.u32 2147483648, %v780_v51 }
 0x211   :  { %v763_v0 = vsub.f32 1.0, %v762_v59  ;;  %vm3068_vm5 = vmand %vm356_vm13, %vm874_vm4 }
 0x212   :  { %v745_v13 = vmul.f32 %v2313_v52, %v744_v63  ;;  %v793_v63 = vor.u32 1.1754944e-38, %v792_v56 }
 0x213   :  { %v764_v11 = vmul.f32 %v2315_v30, %v763_v0 }
 0x214   :  { %v2317_v15 = vpop.eup %2316  ;;  %v746_v18 = vadd.f32 %v2313_v52, %v745_v13 }
 0x215   :  { %v765_v26 = vadd.f32 %v2315_v30, %v764_v11  ;;  %v782_v22 = vmul.f32 %v2317_v15, %v780_v51  ;;  %v2319_v27 = vpop.eup %2318  ;;  %vm787_vm0 = vweird.f32 %v2317_v15 }
 0x216   :  { %v750_v31 = vsel %vm749_vm8, %v2313_v52, %v746_v18  ;;  %v790_v52 = vand.u32 2147483647, %v780_v51  ;;  %vm788_vm2 = vmor %vm786_vm1, %vm787_vm0 }
 0x217   :  { %v755_v10 = vsel %vm752_vm10, %v754_v14, %v750_v31  ;;  %v769_v43 = vsel %vm768_vm9, %v2315_v30, %v765_v26  ;;  %v783_v35 = vsub.f32 1.0, %v782_v22 }
 0x218   :  { %v774_v37 = vsel %vm771_vm11, %v773_v29, %v769_v43  ;;  %v797_v49 = vmul.f32 %v2319_v27, %v755_v10  ;;  %vm791_vm3 = vcmp.eq.f32.partialorder %v790_v52, 8.507059e+37 }
 0x219   :  { %v796_v50 = vmul.f32 %v774_v37, %v2928_v61  ;;  %v784_v55 = vmul.f32 %v2317_v15, %v783_v35 }
 0x21b   :  { %v3052_v44 = vadd.f32 %v797_v49, %v796_v50  ;;  %v785_v47 = vadd.f32 %v2317_v15, %v784_v55  ;;  %v876_v50 = vld [vmem:[%s3697_s4] sm:$0x2]  ;;  %v879_v55 = vld [vmem:[%s3697_s4 + $0x4] sm:$0x2] }
 0x21d   :  { %2320 = vtanh.f32 %v3052_v44  ;;  %v789_v59 = vsel %vm788_vm2, %v2317_v15, %v785_v47 }
 0x21e   :  { %v794_v0 = vsel %vm791_vm3, %v793_v63, %v789_v59  ;;  %v882_v59 = vld [vmem:[%s3697_s4 + $0x8] sm:$0x2] }
 0x223   :  { %v2321_v30 = vpop.eup %2320 }
 0x224   :  { %v800_v4 = vmul.f32 %v2321_v30, %v794_v0 }
 0x226   :  { %v801_v5 = vpack.c.bf16 %v800_v4, %v800_v4 }
 0x228   :  { %v803_v13 = vrot.slane %v801_v5, 3  ;;  %915 = vmatmul.bf16.vlgmr.msrb.gmra.mxu0 %v801_v5  ;;  %928 = vmatmul.bf16.vlgmr.msrb.gmra.mxu1 %v801_v5 }
 0x229   :  { %941 = vmatmul.bf16.vlgmr.msrb.gmra.mxu2 %v801_v5  ;;  %954 = vmatmul.bf16.vlgmr.msrb.gmra.mxu3 %v801_v5 }
 0x22a   :  { %1356 = vmatpush.bf16.msrb.mxu0 %v2447_v3  ;;  %1369 = vmatpush.bf16.msrb.mxu1 %v2458_v7  ;;  %v806_v61 = vsel %vm351_vm12, %v801_v5, %v803_v13  ;;  %v808_v51 = vsel %vm356_vm13, %v801_v5, %v803_v13  ;;  %v811_v62 = vsel %vm360_vm14, %v801_v5, %v803_v13 }
 0x22b   :  { %1382 = vmatpush.bf16.msrb.mxu2 %v2498_v21  ;;  %1395 = vmatpush.bf16.msrb.mxu3 %v2460_v8  ;;  %v810_v11 = vrot.slane %v808_v51, 1  ;;  %v813_v23 = vrot.slane %v811_v62, 2  ;;  %v814_v15 = vsel %vm364_vm15, %v801_v5, %v803_v13  ;;  %v818_v18 = vunpack.i.h.s16 %v806_v61  ;;  %v885_v5 = vld [vmem:[%s3697_s4 + $0xc] sm:$0x2]  ;;  %v888_v13 = vld [vmem:[%s3697_s4 + $0x10] sm:$0x2] }
 0x22c   :  { %v816_v14 = vrot.slane %v814_v15, 3  ;;  %v2192_v26 = vpack.i.b16 %v806_v61, %v806_v61 }
 0x22d   :  { %v820_v22 = vunpack.i.h.s16 %v810_v11  ;;  %v822_v29 = vunpack.i.h.s16 %v813_v23  ;;  %v826_v31 = vpack.i.b16 %v818_v18, %v818_v18  ;;  %v2193_v27 = vpack.i.b16 %v810_v11, %v810_v11 }
 0x22e   :  { %1357 = vmatpush.bf16.msrb.mxu0 %v2472_v12  ;;  %1370 = vmatpush.bf16.msrb.mxu1 %v2485_v16  ;;  %v824_v10 = vunpack.i.h.s16 %v816_v14  ;;  %v2194_v43 = vpack.i.b16 %v813_v23, %v813_v23  ;;  %v2195_v35 = vpack.i.b16 %v816_v14, %v816_v14  ;;  %v836_v37 = vperm.slane %v2192_v26, %v2810_v60  ;;  %v891_v23 = vld [vmem:[%s3697_s4 + $0x14] sm:$0x2]  ;;  %v894_v14 = vld [vmem:[%s3697_s4 + $0x18] sm:$0x2] }
 0x22f   :  { %1383 = vmatpush.bf16.msrb.mxu2 %v2537_v34  ;;  %1396 = vmatpush.bf16.msrb.mxu3 %v2487_v17  ;;  %v828_v47 = vpack.i.b16 %v820_v22, %v820_v22  ;;  %v830_v56 = vpack.i.b16 %v822_v29, %v822_v29  ;;  %v840_v52 = vperm.slane %v826_v31, %v2810_v60  ;;  %v897_v29 = vld [vmem:[%s3697_s4 + $0x1c] sm:$0x2] }
 0x230   :  { %v832_v63 = vpack.i.b16 %v824_v10, %v824_v10  ;;  %v844_v30 = vperm.slane %v2193_v27, %v2810_v60  ;;  %v852_v0 = vperm.slane %v2194_v43, %v2810_v60  ;;  %v860_v4 = vperm.slane %v2195_v35, %v2810_v60  ;;  %v2196_v43 = vld [vmem:[%s3695_s0 + $0x30] sm:$0xff] }
 0x231   :  { %v848_v61 = vperm.slane %v828_v47, %v2810_v60  ;;  %v856_v51 = vperm.slane %v830_v56, %v2810_v60  ;;  %v877_v62 = vsel %vm3068_vm5, %v836_v37, %v876_v50  ;;  %v880_v11 = vsel %vm3068_vm5, %v840_v52, %v879_v55  ;;  %v2197_v56 = vld [vmem:[%s3695_s0 + $0x38] sm:$0xff] }
 0x232   :  { %1358 = vmatpush.bf16.msrb.mxu0 %v2520_v28  ;;  %1371 = vmatpush.bf16.msrb.mxu1 %v2533_v32  ;;  %v864_v15 = vperm.slane %v832_v63, %v2810_v60  ;;  %878 = vst [vmem:[%s3697_s4] sm:$0x2] %v877_v62  ;;  %v883_v18 = vsel %vm3068_vm5, %v844_v30, %v882_v59  ;;  %v903_v35 = vunpack.c.l.bf16 %v2196_v43  ;;  %v904_v37 = vunpack.c.h.bf16 %v2196_v43 }
 0x233   :  { %1384 = vmatpush.bf16.msrb.mxu2 %v2561_v42  ;;  %1397 = vmatpush.bf16.msrb.mxu3 %v2535_v33  ;;  %881 = vst [vmem:[%s3697_s4 + $0x4] sm:$0x2] %v880_v11  ;;  %v886_v26 = vsel %vm3068_vm5, %v848_v61, %v885_v5  ;;  %v889_v22 = vsel %vm3068_vm5, %v852_v0, %v888_v13  ;;  %v906_v63 = vunpack.c.h.bf16 %v2197_v56 }
 0x234   :  { %884 = vst [vmem:[%s3697_s4 + $0x8] sm:$0x2] %v883_v18  ;;  %v892_v31 = vsel %vm3068_vm5, %v856_v51, %v891_v23  ;;  %v895_v27 = vsel %vm3068_vm5, %v860_v4, %v894_v14  ;;  %v898_v10 = vsel %vm3068_vm5, %v864_v15, %v897_v29  ;;  %v905_v14 = vunpack.c.l.bf16 %v2197_v56 }
 0x235   :  { %887 = vst [vmem:[%s3697_s4 + $0xc] sm:$0x2] %v886_v26 }
 0x236   :  { %1359 = vmatpush.bf16.msrb.mxu0 %v2559_v41  ;;  %1372 = vmatpush.bf16.msrb.mxu1 %v2571_v45  ;;  %890 = vst [vmem:[%s3697_s4 + $0x10] sm:$0x2] %v889_v22 }
 0x237   :  { %1385 = vmatpush.bf16.msrb.mxu2 %v2597_v54  ;;  %1398 = vmatpush.bf16.msrb.mxu3 %v2573_v46  ;;  %893 = vst [vmem:[%s3697_s4 + $0x14] sm:$0x2] %v892_v31 }
 0x238   :  { %896 = vst [vmem:[%s3697_s4 + $0x18] sm:$0x2] %v895_v27 }
 0x239   :  { %899 = vst [vmem:[%s3697_s4 + $0x1c] sm:$0x2] %v898_v10 }
 0x23a   :  { %1360 = vmatpush.bf16.msrb.mxu0 %v2595_v53  ;;  %1373 = vmatpush.bf16.msrb.mxu1 %v2607_v57 }
 0x23b   :  { %1386 = vmatpush.bf16.msrb.mxu2 %v2633_v2  ;;  %1399 = vmatpush.bf16.msrb.mxu3 %v2609_v58 }
 0x23e   :  { %1361 = vmatpush.bf16.msrb.mxu0 %v2631_v1  ;;  %1374 = vmatpush.bf16.msrb.mxu1 %v2643_v6 }
 0x23f   :  { %1387 = vmatpush.bf16.msrb.mxu2 %v2669_v20  ;;  %1400 = vmatpush.bf16.msrb.mxu3 %v2645_v9 }
 0x242   :  { %1362 = vmatpush.bf16.msrb.mxu0 %v2667_v19  ;;  %1375 = vmatpush.bf16.msrb.mxu1 %v2679_v24 }
 0x243   :  { %1388 = vmatpush.bf16.msrb.mxu2 %v2708_v38  ;;  %1401 = vmatpush.bf16.msrb.mxu3 %v2681_v25 }
 0x246   :  { %1363 = vmatpush.bf16.msrb.mxu0 %v2703_v36  ;;  %1376 = vmatpush.bf16.msrb.mxu1 %v2712_v39 }
 0x247   :  { %1389 = vmatpush.bf16.msrb.mxu2 %v2726_v48  ;;  %1402 = vmatpush.bf16.msrb.mxu3 %v2714_v40 }
 0x2a5   :  { %v916_v49 = vpop.f32.mrf.mxu0  ;;  %v929_v50 = vpop.f32.mrf.mxu1 }
 0x2a6   :  { %v959_v55 = vadd.f32 %v916_v49, %v903_v35  ;;  %v960_v47 = vadd.f32 %v929_v50, %v904_v37 }
 0x2a8   :  { %v2198_v52 = vmul.f32 -1.442695, %v959_v55  ;;  %v2199_v59 = vmul.f32 -1.442695, %v960_v47 }
 0x2aa   :  { %2322 = vpow2.f32 %v2198_v52 }
 0x2ab   :  { %2324 = vpow2.f32 %v2199_v59 }
 0x2ac   :  { %v942_v30 = vpop.f32.mrf.mxu2  ;;  %v955_v0 = vpop.f32.mrf.mxu3 }
 0x2ad   :  { %v962_v4 = vadd.f32 %v955_v0, %v906_v63  ;;  %v918_v5 = vpop.f32.mrf.mxu0  ;;  %v931_v13 = vpop.f32.mrf.mxu1  ;;  %v961_v31 = vadd.f32 %v942_v30, %v905_v14 }
 0x2af   :  { %v2200_v61 = vmul.f32 -1.442695, %v962_v4 }
 0x2b0   :  { %v2323_v51 = vpop.eup %2322 }
 0x2b1   :  { %v2325_v62 = vpop.eup %2324  ;;  %v966_v11 = vadd.f32 1.0, %v2323_v51  ;;  %2326 = vpow2.f32 %v2200_v61 }
 0x2b2   :  { %v985_v23 = vadd.f32 1.0, %v2325_v62 }
 0x2b3   :  { %2328 = vrcp.f32 %v966_v11  ;;  %v978_v49 = vand.u32 2147483648, %v966_v11  ;;  %v976_v47 = vand.u32 2147483647, %v966_v11  ;;  %vm972_vm8 = vweird.f32 %v966_v11 }
 0x2b4   :  { %2330 = vrcp.f32 %v985_v23  ;;  %v944_v15 = vpop.f32.mrf.mxu2  ;;  %v957_v18 = vpop.f32.mrf.mxu3  ;;  %v997_v50 = vand.u32 2147483648, %v985_v23  ;;  %v995_v59 = vand.u32 2147483647, %v985_v23  ;;  %vm991_vm9 = vweird.f32 %v985_v23 }
 0x2b5   :  { %v979_v30 = vor.u32 1.1754944e-38, %v978_v49  ;;  %vm977_vm0 = vcmp.eq.f32.partialorder %v976_v47, 8.507059e+37 }
 0x2b6   :  { %v998_v5 = vor.u32 1.1754944e-38, %v997_v50  ;;  %vm996_vm1 = vcmp.eq.f32.partialorder %v995_v59, 8.507059e+37 }
 0x2b7   :  { %v2327_v26 = vpop.eup %2326 }
 0x2b8   :  { %v1005_v22 = vadd.f32 1.0, %v2327_v26 }
 0x2b9   :  { %v2329_v29 = vpop.eup %2328 }
 0x2ba   :  { %v2331_v27 = vpop.eup %2330  ;;  %v968_v10 = vmul.f32 %v2329_v29, %v966_v11  ;;  %2332 = vrcp.f32 %v1005_v22  ;;  %vm973_vm6 = vweird.f32 %v2329_v29  ;;  %vm1011_vm3 = vweird.f32 %v1005_v22 }
 0x2bb   :  { %v987_v43 = vmul.f32 %v2331_v27, %v985_v23  ;;  %2334 = vtanh.f32 %v961_v31  ;;  %vm992_vm7 = vweird.f32 %v2331_v27  ;;  %vm974_vm10 = vmor %vm972_vm8, %vm973_vm6  ;;  %vm1098_vm6 = vsmask.f32 7942 }
 0x2bc   :  { %v969_v35 = vsub.f32 1.0, %v968_v10  ;;  %vm993_vm11 = vmor %vm991_vm9, %vm992_vm7  ;;  %v1017_v10 = vand.u32 2147483648, %v1005_v22 }
 0x2bd   :  { %v988_v37 = vsub.f32 1.0, %v987_v43  ;;  %vm3192_vm7 = vmand %vm356_vm13, %vm1098_vm6 }
 0x2be   :  { %v970_v55 = vmul.f32 %v2329_v29, %v969_v35  ;;  %v1018_v35 = vor.u32 1.1754944e-38, %v1017_v10 }
 0x2bf   :  { %v989_v52 = vmul.f32 %v2331_v27, %v988_v37 }
 0x2c0   :  { %v2333_v56 = vpop.eup %2332  ;;  %v971_v63 = vadd.f32 %v2329_v29, %v970_v55 }
 0x2c1   :  { %v990_v0 = vadd.f32 %v2331_v27, %v989_v52  ;;  %v1007_v4 = vmul.f32 %v2333_v56, %v1005_v22  ;;  %v2335_v61 = vpop.eup %2334  ;;  %vm1012_vm2 = vweird.f32 %v2333_v56 }
 0x2c2   :  { %v975_v13 = vsel %vm974_vm10, %v2329_v29, %v971_v63  ;;  %v1015_v29 = vand.u32 2147483647, %v1005_v22  ;;  %vm1013_vm4 = vmor %vm1011_vm3, %vm1012_vm2 }
 0x2c3   :  { %v980_v51 = vsel %vm977_vm0, %v979_v30, %v975_v13  ;;  %v994_v62 = vsel %vm993_vm11, %v2331_v27, %v990_v0  ;;  %v1008_v15 = vsub.f32 1.0, %v1007_v4 }
 0x2c4   :  { %v999_v18 = vsel %vm996_vm1, %v998_v5, %v994_v62  ;;  %v1022_v14 = vmul.f32 %v2335_v61, %v980_v51  ;;  %vm1016_vm5 = vcmp.eq.f32.partialorder %v1015_v29, 8.507059e+37 }
 0x2c5   :  { %v1021_v26 = vmul.f32 %v999_v18, %v3052_v44  ;;  %v1009_v31 = vmul.f32 %v2333_v56, %v1008_v15 }
 0x2c7   :  { %v3176_v11 = vadd.f32 %v1022_v14, %v1021_v26  ;;  %v1010_v23 = vadd.f32 %v2333_v56, %v1009_v31 }
 0x2c9   :  { %2336 = vtanh.f32 %v3176_v11  ;;  %v1014_v43 = vsel %vm1013_vm4, %v2333_v56, %v1010_v23 }
 0x2ca   :  { %v1019_v37 = vsel %vm1016_vm5, %v1018_v35, %v1014_v43 }
 0x2cf   :  { %v2337_v27 = vpop.eup %2336 }
 0x2d0   :  { %v1025_v49 = vmul.f32 %v2337_v27, %v1019_v37  ;;  %v1100_v27 = vld [vmem:[%s3697_s4] sm:$0x2]  ;;  %v1103_v37 = vld [vmem:[%s3697_s4 + $0x4] sm:$0x2] }
 0x2d2   :  { %v1026_v50 = vpack.c.bf16 %v1025_v49, %v1025_v49 }
 0x2d4   :  { %v1028_v55 = vrot.slane %v1026_v50, 3  ;;  %1139 = vmatmul.bf16.vlgmr.msra.gmra.mxu0 %v1026_v50  ;;  %1152 = vmatmul.bf16.vlgmr.msra.gmra.mxu1 %v1026_v50 }
 0x2d5   :  { %1165 = vmatmul.bf16.vlgmr.msra.gmra.mxu2 %v1026_v50  ;;  %1178 = vmatmul.bf16.vlgmr.msra.gmra.mxu3 %v1026_v50 }
 0x2d6   :  { %1580 = vmatpush.bf16.msra.mxu0 %v2447_v3  ;;  %1593 = vmatpush.bf16.msra.mxu1 %v2458_v7  ;;  %v1031_v44 = vsel %vm351_vm12, %v1026_v50, %v1028_v55  ;;  %v1033_v22 = vsel %vm356_vm13, %v1026_v50, %v1028_v55  ;;  %v1036_v47 = vsel %vm360_vm14, %v1026_v50, %v1028_v55 }
 0x2d7   :  { %1606 = vmatpush.bf16.msra.mxu2 %v2498_v21  ;;  %1619 = vmatpush.bf16.msra.mxu3 %v2460_v8  ;;  %v1035_v52 = vrot.slane %v1033_v22, 1  ;;  %v1038_v59 = vrot.slane %v1036_v47, 2  ;;  %v1039_v56 = vsel %vm364_vm15, %v1026_v50, %v1028_v55  ;;  %v1043_v63 = vunpack.i.h.s16 %v1031_v44  ;;  %v1106_v22 = vld [vmem:[%s3697_s4 + $0x8] sm:$0x2] }
 0x2d8   :  { %v1041_v30 = vrot.slane %v1039_v56, 3  ;;  %v2201_v0 = vpack.i.b16 %v1031_v44, %v1031_v44  ;;  %v1112_v56 = vld [vmem:[%s3697_s4 + $0x10] sm:$0x2] }
 0x2d9   :  { %v1045_v4 = vunpack.i.h.s16 %v1035_v52  ;;  %v1047_v5 = vunpack.i.h.s16 %v1038_v59  ;;  %v1051_v13 = vpack.i.b16 %v1043_v63, %v1043_v63  ;;  %v2202_v61 = vpack.i.b16 %v1035_v52, %v1035_v52 }
 0x2da   :  { %1581 = vmatpush.bf16.msra.mxu0 %v2472_v12  ;;  %1594 = vmatpush.bf16.msra.mxu1 %v2485_v16  ;;  %v1049_v51 = vunpack.i.h.s16 %v1041_v30  ;;  %v2203_v62 = vpack.i.b16 %v1038_v59, %v1038_v59  ;;  %v2204_v15 = vpack.i.b16 %v1041_v30, %v1041_v30  ;;  %v1061_v18 = vperm.slane %v2201_v0, %v2810_v60  ;;  %v1109_v59 = vld [vmem:[%s3697_s4 + $0xc] sm:$0x2]  ;;  %v1115_v0 = vld [vmem:[%s3697_s4 + $0x14] sm:$0x2] }
 0x2db   :  { %1607 = vmatpush.bf16.msra.mxu2 %v2537_v34  ;;  %1620 = vmatpush.bf16.msra.mxu3 %v2487_v17  ;;  %v1053_v26 = vpack.i.b16 %v1045_v4, %v1045_v4  ;;  %v1055_v31 = vpack.i.b16 %v1047_v5, %v1047_v5  ;;  %v1065_v23 = vperm.slane %v1051_v13, %v2810_v60  ;;  %v1118_v5 = vld [vmem:[%s3697_s4 + $0x18] sm:$0x2] }
 0x2dc   :  { %v1057_v10 = vpack.i.b16 %v1049_v51, %v1049_v51  ;;  %v1069_v29 = vperm.slane %v2202_v61, %v2810_v60  ;;  %v1077_v43 = vperm.slane %v2203_v62, %v2810_v60  ;;  %v1085_v35 = vperm.slane %v2204_v15, %v2810_v60  ;;  %v1121_v61 = vld [vmem:[%s3697_s4 + $0x1c] sm:$0x2]  ;;  %v2205_v62 = vld [vmem:[%s3695_s0 + $0x40] sm:$0xff] }
 0x2dd   :  { %v1073_v49 = vperm.slane %v1053_v26, %v2810_v60  ;;  %v1081_v50 = vperm.slane %v1055_v31, %v2810_v60  ;;  %v1101_v55 = vsel %vm3192_vm7, %v1061_v18, %v1100_v27  ;;  %v1104_v44 = vsel %vm3192_vm7, %v1065_v23, %v1103_v37 }
 0x2de   :  { %1582 = vmatpush.bf16.msra.mxu0 %v2520_v28  ;;  %1595 = vmatpush.bf16.msra.mxu1 %v2533_v32  ;;  %v1089_v47 = vperm.slane %v1057_v10, %v2810_v60  ;;  %1102 = vst [vmem:[%s3697_s4] sm:$0x2] %v1101_v55  ;;  %v1107_v52 = vsel %vm3192_vm7, %v1069_v29, %v1106_v22  ;;  %v1127_v15 = vunpack.c.l.bf16 %v2205_v62  ;;  %v1128_v18 = vunpack.c.h.bf16 %v2205_v62  ;;  %v2206_v10 = vld [vmem:[%s3695_s0 + $0x48] sm:$0xff] }
 0x2df   :  { %1608 = vmatpush.bf16.msra.mxu2 %v2561_v42  ;;  %1621 = vmatpush.bf16.msra.mxu3 %v2535_v33  ;;  %1105 = vst [vmem:[%s3697_s4 + $0x4] sm:$0x2] %v1104_v44  ;;  %v1110_v63 = vsel %vm3192_vm7, %v1073_v49, %v1109_v59  ;;  %v1113_v30 = vsel %vm3192_vm7, %v1077_v43, %v1112_v56 }
 0x2e0   :  { %1108 = vst [vmem:[%s3697_s4 + $0x8] sm:$0x2] %v1107_v52  ;;  %v1116_v4 = vsel %vm3192_vm7, %v1081_v50, %v1115_v0  ;;  %v1119_v13 = vsel %vm3192_vm7, %v1085_v35, %v1118_v5  ;;  %v1122_v51 = vsel %vm3192_vm7, %v1089_v47, %v1121_v61  ;;  %v1130_v35 = vunpack.c.h.bf16 %v2206_v10 }
 0x2e1   :  { %1111 = vst [vmem:[%s3697_s4 + $0xc] sm:$0x2] %v1110_v63 }
 0x2e2   :  { %1583 = vmatpush.bf16.msra.mxu0 %v2559_v41  ;;  %1596 = vmatpush.bf16.msra.mxu1 %v2571_v45  ;;  %1114 = vst [vmem:[%s3697_s4 + $0x10] sm:$0x2] %v1113_v30  ;;  %v1129_v30 = vunpack.c.l.bf16 %v2206_v10 }
 0x2e3   :  { %1609 = vmatpush.bf16.msra.mxu2 %v2597_v54  ;;  %1622 = vmatpush.bf16.msra.mxu3 %v2573_v46  ;;  %1117 = vst [vmem:[%s3697_s4 + $0x14] sm:$0x2] %v1116_v4 }
 0x2e4   :  { %1120 = vst [vmem:[%s3697_s4 + $0x18] sm:$0x2] %v1119_v13 }
 0x2e5   :  { %1123 = vst [vmem:[%s3697_s4 + $0x1c] sm:$0x2] %v1122_v51 }
 0x2e6   :  { %1584 = vmatpush.bf16.msra.mxu0 %v2595_v53  ;;  %1597 = vmatpush.bf16.msra.mxu1 %v2607_v57 }
 0x2e7   :  { %1610 = vmatpush.bf16.msra.mxu2 %v2633_v2  ;;  %1623 = vmatpush.bf16.msra.mxu3 %v2609_v58 }
 0x2ea   :  { %1585 = vmatpush.bf16.msra.mxu0 %v2631_v1  ;;  %1598 = vmatpush.bf16.msra.mxu1 %v2643_v6 }
 0x2eb   :  { %1611 = vmatpush.bf16.msra.mxu2 %v2669_v20  ;;  %1624 = vmatpush.bf16.msra.mxu3 %v2645_v9 }
 0x2ee   :  { %1586 = vmatpush.bf16.msra.mxu0 %v2667_v19  ;;  %1599 = vmatpush.bf16.msra.mxu1 %v2679_v24 }
 0x2ef   :  { %1612 = vmatpush.bf16.msra.mxu2 %v2708_v38  ;;  %1625 = vmatpush.bf16.msra.mxu3 %v2681_v25 }
 0x2f2   :  { %1587 = vmatpush.bf16.msra.mxu0 %v2703_v36  ;;  %1600 = vmatpush.bf16.msra.mxu1 %v2712_v39 }
 0x2f3   :  { %1613 = vmatpush.bf16.msra.mxu2 %v2726_v48  ;;  %1626 = vmatpush.bf16.msra.mxu3 %v2714_v40 }
 0x351   :  { %v1140_v14 = vpop.f32.mrf.mxu0  ;;  %v1153_v26 = vpop.f32.mrf.mxu1 }
 0x352   :  { %v1183_v31 = vadd.f32 %v1140_v14, %v1127_v15  ;;  %v1184_v23 = vadd.f32 %v1153_v26, %v1128_v18 }
 0x354   :  { %v2207_v29 = vmul.f32 -1.442695, %v1183_v31  ;;  %v2208_v43 = vmul.f32 -1.442695, %v1184_v23 }
 0x356   :  { %2338 = vpow2.f32 %v2207_v29 }
 0x357   :  { %2340 = vpow2.f32 %v2208_v43 }
 0x358   :  { %v1166_v27 = vpop.f32.mrf.mxu2  ;;  %v1179_v37 = vpop.f32.mrf.mxu3 }
 0x359   :  { %v1186_v49 = vadd.f32 %v1179_v37, %v1130_v35  ;;  %v1142_v50 = vpop.f32.mrf.mxu0  ;;  %v1155_v55 = vpop.f32.mrf.mxu1  ;;  %v1185_v13 = vadd.f32 %v1166_v27, %v1129_v30 }
 0x35b   :  { %v2209_v44 = vmul.f32 -1.442695, %v1186_v49 }
 0x35c   :  { %v2339_v22 = vpop.eup %2338 }
 0x35d   :  { %v2341_v47 = vpop.eup %2340  ;;  %v1190_v52 = vadd.f32 1.0, %v2339_v22  ;;  %2342 = vpow2.f32 %v2209_v44 }
 0x35e   :  { %v1209_v59 = vadd.f32 1.0, %v2341_v47 }
 0x35f   :  { %2344 = vrcp.f32 %v1190_v52  ;;  %v1202_v14 = vand.u32 2147483648, %v1190_v52  ;;  %v1200_v23 = vand.u32 2147483647, %v1190_v52  ;;  %vm1196_vm10 = vweird.f32 %v1190_v52 }
 0x360   :  { %2346 = vrcp.f32 %v1209_v59  ;;  %v1168_v56 = vpop.f32.mrf.mxu2  ;;  %v1181_v63 = vpop.f32.mrf.mxu3  ;;  %v1221_v26 = vand.u32 2147483648, %v1209_v59  ;;  %v1219_v43 = vand.u32 2147483647, %v1209_v59  ;;  %vm1215_vm11 = vweird.f32 %v1209_v59 }
 0x361   :  { %v1203_v27 = vor.u32 1.1754944e-38, %v1202_v14  ;;  %vm1201_vm2 = vcmp.eq.f32.partialorder %v1200_v23, 8.507059e+37 }
 0x362   :  { %v1222_v50 = vor.u32 1.1754944e-38, %v1221_v26  ;;  %vm1220_vm3 = vcmp.eq.f32.partialorder %v1219_v43, 8.507059e+37 }
 0x363   :  { %v2343_v0 = vpop.eup %2342 }
 0x364   :  { %v1229_v4 = vadd.f32 1.0, %v2343_v0 }
 0x365   :  { %v2345_v5 = vpop.eup %2344 }
 0x366   :  { %v2347_v61 = vpop.eup %2346  ;;  %v1192_v51 = vmul.f32 %v2345_v5, %v1190_v52  ;;  %2348 = vrcp.f32 %v1229_v4  ;;  %vm1197_vm8 = vweird.f32 %v2345_v5  ;;  %vm1235_vm5 = vweird.f32 %v1229_v4 }
 0x367   :  { %v1211_v62 = vmul.f32 %v2347_v61, %v1209_v59  ;;  %2350 = vtanh.f32 %v1185_v13  ;;  %vm1216_vm9 = vweird.f32 %v2347_v61  ;;  %vm1198_vm0 = vmor %vm1196_vm10, %vm1197_vm8  ;;  %vm1323_vm8 = vsmask.f32 2304 }
 0x368   :  { %v1193_v15 = vsub.f32 1.0, %v1192_v51  ;;  %vm1217_vm1 = vmor %vm1215_vm11, %vm1216_vm9  ;;  %v1241_v51 = vand.u32 2147483648, %v1229_v4 }
 0x369   :  { %v1212_v18 = vsub.f32 1.0, %v1211_v62  ;;  %vm3316_vm9 = vmand %vm360_vm14, %vm1323_vm8 }
 0x36a   :  { %v1194_v31 = vmul.f32 %v2345_v5, %v1193_v15  ;;  %v1242_v15 = vor.u32 1.1754944e-38, %v1241_v51 }
 0x36b   :  { %v1213_v29 = vmul.f32 %v2347_v61, %v1212_v18 }
 0x36c   :  { %v2349_v10 = vpop.eup %2348  ;;  %v1195_v35 = vadd.f32 %v2345_v5, %v1194_v31 }
 0x36d   :  { %v1214_v37 = vadd.f32 %v2347_v61, %v1213_v29  ;;  %v1231_v49 = vmul.f32 %v2349_v10, %v1229_v4  ;;  %v2351_v44 = vpop.eup %2350  ;;  %vm1236_vm4 = vweird.f32 %v2349_v10 }
 0x36e   :  { %v1199_v55 = vsel %vm1198_vm0, %v2345_v5, %v1195_v35  ;;  %v1239_v5 = vand.u32 2147483647, %v1229_v4  ;;  %vm1237_vm6 = vmor %vm1235_vm5, %vm1236_vm4 }
 0x36f   :  { %v1204_v22 = vsel %vm1201_vm2, %v1203_v27, %v1199_v55  ;;  %v1218_v47 = vsel %vm1217_vm1, %v2347_v61, %v1214_v37  ;;  %v1232_v56 = vsub.f32 1.0, %v1231_v49 }
 0x370   :  { %v1223_v63 = vsel %vm1220_vm3, %v1222_v50, %v1218_v47  ;;  %v1246_v30 = vmul.f32 %v2351_v44, %v1204_v22  ;;  %vm1240_vm7 = vcmp.eq.f32.partialorder %v1239_v5, 8.507059e+37  ;;  %v1325_v47 = vld [vmem:[%s3697_s4] sm:$0x4] }
 0x371   :  { %v1245_v0 = vmul.f32 %v1223_v63, %v3176_v11  ;;  %v1233_v13 = vmul.f32 %v2349_v10, %v1232_v56 }
 0x373   :  { %v3300_v52 = vadd.f32 %v1246_v30, %v1245_v0  ;;  %v1234_v59 = vadd.f32 %v2349_v10, %v1233_v13  ;;  %v1331_v30 = vld [vmem:[%s3697_s4 + $0x8] sm:$0x4] }
 0x375   :  { %2352 = vtanh.f32 %v3300_v52  ;;  %v1238_v62 = vsel %vm1237_vm6, %v2349_v10, %v1234_v59 }
 0x376   :  { %v1243_v18 = vsel %vm1240_vm7, %v1242_v15, %v1238_v62 }
 0x37b   :  { %v2353_v61 = vpop.eup %2352 }
 0x37c   :  { %v1249_v14 = vmul.f32 %v2353_v61, %v1243_v18  ;;  %v1340_v18 = vld [vmem:[%s3697_s4 + $0x14] sm:$0x4] }
 0x37e   :  { %v1250_v26 = vpack.c.bf16 %v1249_v14, %v1249_v14 }
 0x380   :  { %v1252_v31 = vrot.slane %v1250_v26, 3  ;;  %1364 = vmatmul.bf16.vlgmr.msrb.gmra.mxu0 %v1250_v26  ;;  %1377 = vmatmul.bf16.vlgmr.msrb.gmra.mxu1 %v1250_v26 }
 0x381   :  { %1390 = vmatmul.bf16.vlgmr.msrb.gmra.mxu2 %v1250_v26  ;;  %1403 = vmatmul.bf16.vlgmr.msrb.gmra.mxu3 %v1250_v26 }
 0x382   :  { %1805 = vmatpush.bf16.msrb.mxu0 %v2447_v3  ;;  %1818 = vmatpush.bf16.msrb.mxu1 %v2458_v7  ;;  %v1255_v11 = vsel %vm351_vm12, %v1250_v26, %v1252_v31  ;;  %v1257_v4 = vsel %vm356_vm13, %v1250_v26, %v1252_v31  ;;  %v1260_v23 = vsel %vm360_vm14, %v1250_v26, %v1252_v31 }
 0x383   :  { %1831 = vmatpush.bf16.msrb.mxu2 %v2498_v21  ;;  %1844 = vmatpush.bf16.msrb.mxu3 %v2460_v8  ;;  %v1259_v29 = vrot.slane %v1257_v4, 1  ;;  %v1262_v43 = vrot.slane %v1260_v23, 2  ;;  %v1263_v10 = vsel %vm364_vm15, %v1250_v26, %v1252_v31  ;;  %v1267_v35 = vunpack.i.h.s16 %v1255_v11  ;;  %v1343_v31 = vld [vmem:[%s3697_s4 + $0x18] sm:$0x4] }
 0x384   :  { %v1265_v27 = vrot.slane %v1263_v10, 3  ;;  %v2210_v3 = vpack.i.b16 %v1255_v11, %v1255_v11  ;;  %v1346_v11 = vld [vmem:[%s3697_s4 + $0x1c] sm:$0x4] }
 0x385   :  { %v1269_v37 = vunpack.i.h.s16 %v1259_v29  ;;  %v1271_v7 = vunpack.i.h.s16 %v1262_v43  ;;  %v1275_v49 = vpack.i.b16 %v1267_v35, %v1267_v35  ;;  %v2211_v50 = vpack.i.b16 %v1259_v29, %v1259_v29 }
 0x386   :  { %1806 = vmatpush.bf16.msrb.mxu0 %v2472_v12  ;;  %1819 = vmatpush.bf16.msrb.mxu1 %v2485_v16  ;;  %v1273_v55 = vunpack.i.h.s16 %v1265_v27  ;;  %v2212_v44 = vpack.i.b16 %v1262_v43, %v1262_v43  ;;  %v2213_v21 = vpack.i.b16 %v1265_v27, %v1265_v27  ;;  %v1285_v8 = vperm.slane %v2210_v3, %v2810_v60  ;;  %v1328_v12 = vld [vmem:[%s3697_s4 + $0x4] sm:$0x4] }
 0x387   :  { %1832 = vmatpush.bf16.msrb.mxu2 %v2537_v34  ;;  %1845 = vmatpush.bf16.msrb.mxu3 %v2487_v17  ;;  %v1277_v16 = vpack.i.b16 %v1269_v37, %v1269_v37  ;;  %v1279_v56 = vpack.i.b16 %v1271_v7, %v1271_v7  ;;  %v1289_v63 = vperm.slane %v1275_v49, %v2810_v60  ;;  %v1334_v34 = vld [vmem:[%s3697_s4 + $0xc] sm:$0x4]  ;;  %v1337_v17 = vld [vmem:[%s3697_s4 + $0x10] sm:$0x4] }
 0x388   :  { %v1281_v0 = vpack.i.b16 %v1273_v55, %v1273_v55  ;;  %v1293_v13 = vperm.slane %v2211_v50, %v2810_v60  ;;  %v1301_v59 = vperm.slane %v2212_v44, %v2810_v60  ;;  %v1309_v51 = vperm.slane %v2213_v21, %v2810_v60 }
 0x389   :  { %v1297_v5 = vperm.slane %v1277_v16, %v2810_v60  ;;  %v1305_v62 = vperm.slane %v1279_v56, %v2810_v60  ;;  %v1326_v15 = vsel %vm3316_vm9, %v1285_v8, %v1325_v47  ;;  %v1329_v61 = vsel %vm3316_vm9, %v1289_v63, %v1328_v12 }
 0x38a   :  { %1807 = vmatpush.bf16.msrb.mxu0 %v2520_v28  ;;  %1820 = vmatpush.bf16.msrb.mxu1 %v2533_v32  ;;  %v1313_v14 = vperm.slane %v1281_v0, %v2810_v60  ;;  %1327 = vst [vmem:[%s3697_s4] sm:$0x4] %v1326_v15  ;;  %v1332_v26 = vsel %vm3316_vm9, %v1293_v13, %v1331_v30 }
 0x38b   :  { %1833 = vmatpush.bf16.msrb.mxu2 %v2561_v42  ;;  %1846 = vmatpush.bf16.msrb.mxu3 %v2535_v33  ;;  %1330 = vst [vmem:[%s3697_s4 + $0x4] sm:$0x4] %v1329_v61  ;;  %v1335_v28 = vsel %vm3316_vm9, %v1297_v5, %v1334_v34  ;;  %v1338_v32 = vsel %vm3316_vm9, %v1301_v59, %v1337_v17 }
 0x38c   :  { %1333 = vst [vmem:[%s3697_s4 + $0x8] sm:$0x4] %v1332_v26  ;;  %v1341_v33 = vsel %vm3316_vm9, %v1305_v62, %v1340_v18  ;;  %v1344_v42 = vsel %vm3316_vm9, %v1309_v51, %v1343_v31  ;;  %v1347_v4 = vsel %vm3316_vm9, %v1313_v14, %v1346_v11 }
 0x38d   :  { %1336 = vst [vmem:[%s3697_s4 + $0xc] sm:$0x4] %v1335_v28 }
 0x38e   :  { %1808 = vmatpush.bf16.msrb.mxu0 %v2559_v41  ;;  %1821 = vmatpush.bf16.msrb.mxu1 %v2571_v45  ;;  %1339 = vst [vmem:[%s3697_s4 + $0x10] sm:$0x4] %v1338_v32  ;;  %v2214_v41 = vld [vmem:[%s3695_s0 + $0x50] sm:$0xff] }
 0x38f   :  { %1834 = vmatpush.bf16.msrb.mxu2 %v2597_v54  ;;  %1847 = vmatpush.bf16.msrb.mxu3 %v2573_v46  ;;  %1342 = vst [vmem:[%s3697_s4 + $0x14] sm:$0x4] %v1341_v33  ;;  %v1352_v45 = vunpack.c.l.bf16 %v2214_v41  ;;  %v1353_v46 = vunpack.c.h.bf16 %v2214_v41 }
 0x390   :  { %1345 = vst [vmem:[%s3697_s4 + $0x18] sm:$0x4] %v1344_v42 }
 0x391   :  { %1348 = vst [vmem:[%s3697_s4 + $0x1c] sm:$0x4] %v1347_v4 }
 0x392   :  { %1809 = vmatpush.bf16.msrb.mxu0 %v2595_v53  ;;  %1822 = vmatpush.bf16.msrb.mxu1 %v2607_v57 }
 0x393   :  { %1835 = vmatpush.bf16.msrb.mxu2 %v2633_v2  ;;  %1848 = vmatpush.bf16.msrb.mxu3 %v2609_v58 }
 0x396   :  { %1810 = vmatpush.bf16.msrb.mxu0 %v2631_v1  ;;  %1823 = vmatpush.bf16.msrb.mxu1 %v2643_v6  ;;  %v2215_v1 = vld [vmem:[%s3695_s0 + $0x58] sm:$0xff] }
 0x397   :  { %1836 = vmatpush.bf16.msrb.mxu2 %v2669_v20  ;;  %1849 = vmatpush.bf16.msrb.mxu3 %v2645_v9  ;;  %v1355_v9 = vunpack.c.h.bf16 %v2215_v1  ;;  %v1354_v10 = vunpack.c.l.bf16 %v2215_v1 }
 0x39a   :  { %1811 = vmatpush.bf16.msrb.mxu0 %v2667_v19  ;;  %1824 = vmatpush.bf16.msrb.mxu1 %v2679_v24 }
 0x39b   :  { %1837 = vmatpush.bf16.msrb.mxu2 %v2708_v38  ;;  %1850 = vmatpush.bf16.msrb.mxu3 %v2681_v25 }
 0x39e   :  { %1812 = vmatpush.bf16.msrb.mxu0 %v2703_v36  ;;  %1825 = vmatpush.bf16.msrb.mxu1 %v2712_v39 }
 0x39f   :  { %1838 = vmatpush.bf16.msrb.mxu2 %v2726_v48  ;;  %1851 = vmatpush.bf16.msrb.mxu3 %v2714_v40 }
 0x3fd   :  { %v1365_v53 = vpop.f32.mrf.mxu0  ;;  %v1378_v54 = vpop.f32.mrf.mxu1 }
 0x3fe   :  { %v1408_v57 = vadd.f32 %v1365_v53, %v1352_v45  ;;  %v1409_v58 = vadd.f32 %v1378_v54, %v1353_v46 }
 0x400   :  { %v2216_v2 = vmul.f32 -1.442695, %v1408_v57  ;;  %v2217_v6 = vmul.f32 -1.442695, %v1409_v58 }
 0x402   :  { %2354 = vpow2.f32 %v2216_v2 }
 0x403   :  { %2356 = vpow2.f32 %v2217_v6 }
 0x404   :  { %v1391_v19 = vpop.f32.mrf.mxu2  ;;  %v1404_v20 = vpop.f32.mrf.mxu3 }
 0x405   :  { %v1411_v24 = vadd.f32 %v1404_v20, %v1355_v9  ;;  %v1367_v25 = vpop.f32.mrf.mxu0  ;;  %v1380_v36 = vpop.f32.mrf.mxu1  ;;  %v1410_v37 = vadd.f32 %v1391_v19, %v1354_v10 }
 0x407   :  { %v2218_v38 = vmul.f32 -1.442695, %v1411_v24 }
 0x408   :  { %v2355_v39 = vpop.eup %2354 }
 0x409   :  { %v2357_v40 = vpop.eup %2356  ;;  %v1415_v48 = vadd.f32 1.0, %v2355_v39  ;;  %2358 = vpow2.f32 %v2218_v38 }
 0x40a   :  { %v1434_v23 = vadd.f32 1.0, %v2357_v40 }
 0x40b   :  { %2360 = vrcp.f32 %v1415_v48  ;;  %v1427_v21 = vand.u32 2147483648, %v1415_v48  ;;  %v1425_v47 = vand.u32 2147483647, %v1415_v48  ;;  %vm1421_vm0 = vweird.f32 %v1415_v48 }
 0x40c   :  { %2362 = vrcp.f32 %v1434_v23  ;;  %v1393_v29 = vpop.f32.mrf.mxu2  ;;  %v1406_v43 = vpop.f32.mrf.mxu3  ;;  %v1446_v8 = vand.u32 2147483648, %v1434_v23  ;;  %v1444_v16 = vand.u32 2147483647, %v1434_v23  ;;  %vm1440_vm1 = vweird.f32 %v1434_v23 }
 0x40d   :  { %v1428_v30 = vor.u32 1.1754944e-38, %v1427_v21  ;;  %vm1426_vm4 = vcmp.eq.f32.partialorder %v1425_v47, 8.507059e+37 }
 0x40e   :  { %v1447_v59 = vor.u32 1.1754944e-38, %v1446_v8  ;;  %vm1445_vm5 = vcmp.eq.f32.partialorder %v1444_v16, 8.507059e+37  ;;  %v1555_v8 = vld [vmem:[%s3697_s4 + $0x8] sm:$0x4] }
 0x40f   :  { %v2359_v35 = vpop.eup %2358 }
 0x410   :  { %v1454_v27 = vadd.f32 1.0, %v2359_v35  ;;  %v1549_v35 = vld [vmem:[%s3697_s4] sm:$0x4] }
 0x411   :  { %v2361_v3 = vpop.eup %2360 }
 0x412   :  { %v2363_v7 = vpop.eup %2362  ;;  %v1417_v49 = vmul.f32 %v2361_v3, %v1415_v48  ;;  %2364 = vrcp.f32 %v1454_v27  ;;  %vm1422_vm10 = vweird.f32 %v2361_v3  ;;  %v1466_v28 = vand.u32 2147483648, %v1454_v27 }
 0x413   :  { %v1436_v50 = vmul.f32 %v2363_v7, %v1434_v23  ;;  %2366 = vtanh.f32 %v1410_v37  ;;  %vm1441_vm11 = vweird.f32 %v2363_v7  ;;  %vm1423_vm2 = vmor %vm1421_vm0, %vm1422_vm10  ;;  %vm1460_vm7 = vweird.f32 %v1454_v27 }
 0x414   :  { %v1418_v55 = vsub.f32 1.0, %v1417_v49  ;;  %vm1442_vm3 = vmor %vm1440_vm1, %vm1441_vm11  ;;  %v1464_v32 = vand.u32 2147483647, %v1454_v27  ;;  %v1467_v33 = vor.u32 1.1754944e-38, %v1466_v28  ;;  %vm1547_vm10 = vsmask.f32 7946 }
 0x415   :  { %v1437_v44 = vsub.f32 1.0, %v1436_v50  ;;  %vm3432_vm11 = vmand %vm360_vm14, %vm1547_vm10  ;;  %v1552_v49 = vld [vmem:[%s3697_s4 + $0x4] sm:$0x4] }
 0x416   :  { %v1419_v22 = vmul.f32 %v2361_v3, %v1418_v55  ;;  %vm1465_vm9 = vcmp.eq.f32.partialorder %v1464_v32, 8.507059e+37 }
 0x417   :  { %v1438_v12 = vmul.f32 %v2363_v7, %v1437_v44 }
 0x418   :  { %v2365_v56 = vpop.eup %2364  ;;  %v1420_v63 = vadd.f32 %v2361_v3, %v1419_v22  ;;  %v1561_v22 = vld [vmem:[%s3697_s4 + $0x10] sm:$0x4] }
 0x419   :  { %v1439_v0 = vadd.f32 %v2363_v7, %v1438_v12  ;;  %v1456_v13 = vmul.f32 %v2365_v56, %v1454_v27  ;;  %v2367_v34 = vpop.eup %2366  ;;  %vm1461_vm6 = vweird.f32 %v2365_v56  ;;  %v1558_v12 = vld [vmem:[%s3697_s4 + $0xc] sm:$0x4] }
 0x41a   :  { %v1424_v51 = vsel %vm1423_vm2, %v2361_v3, %v1420_v63  ;;  %vm1462_vm8 = vmor %vm1460_vm7, %vm1461_vm6 }
 0x41b   :  { %v1429_v17 = vsel %vm1426_vm4, %v1428_v30, %v1424_v51  ;;  %v1443_v5 = vsel %vm1442_vm3, %v2363_v7, %v1439_v0  ;;  %v1457_v62 = vsub.f32 1.0, %v1456_v13  ;;  %v1567_v0 = vld [vmem:[%s3697_s4 + $0x18] sm:$0x4] }
 0x41c   :  { %v1448_v15 = vsel %vm1445_vm5, %v1447_v59, %v1443_v5  ;;  %v1471_v61 = vmul.f32 %v2367_v34, %v1429_v17  ;;  %v1570_v59 = vld [vmem:[%s3697_s4 + $0x1c] sm:$0x4]  ;;  %v2223_v34 = vld [vmem:[%s3695_s0 + $0x60] sm:$0xff] }
 0x41d   :  { %v1470_v18 = vmul.f32 %v1448_v15, %v3300_v52  ;;  %v1458_v14 = vmul.f32 %v2365_v56, %v1457_v62  ;;  %v1576_v17 = vunpack.c.l.bf16 %v2223_v34  ;;  %v1577_v5 = vunpack.c.h.bf16 %v2223_v34 }
 0x41f   :  { %v3424_v26 = vadd.f32 %v1471_v61, %v1470_v18  ;;  %v1459_v31 = vadd.f32 %v2365_v56, %v1458_v14  ;;  %v2224_v14 = vld [vmem:[%s3695_s0 + $0x68] sm:$0xff] }
 0x420   :  { %v1579_v32 = vunpack.c.h.bf16 %v2224_v14 }
 0x421   :  { %2368 = vtanh.f32 %v3424_v26  ;;  %v1463_v11 = vsel %vm1462_vm8, %v2365_v56, %v1459_v31  ;;  %v1564_v56 = vld [vmem:[%s3697_s4 + $0x14] sm:$0x4] }
 0x422   :  { %v1468_v4 = vsel %vm1465_vm9, %v1467_v33, %v1463_v11 }
 0x427   :  { %v2369_v42 = vpop.eup %2368 }
 0x428   :  { %v1474_v41 = vmul.f32 %v2369_v42, %v1468_v4 }
 0x42a   :  { %v1475_v45 = vpack.c.bf16 %v1474_v41, %v1474_v41 }
 0x42c   :  { %v1477_v46 = vrot.slane %v1475_v45, 3  ;;  %1588 = vmatmul.bf16.vlgmr.msra.gmra.mxu0 %v1475_v45  ;;  %1601 = vmatmul.bf16.vlgmr.msra.gmra.mxu1 %v1475_v45 }
 0x42d   :  { %1614 = vmatmul.bf16.vlgmr.msra.gmra.mxu2 %v1475_v45  ;;  %1627 = vmatmul.bf16.vlgmr.msra.gmra.mxu3 %v1475_v45 }
 0x42e   :  { %v1480_v52 = vsel %vm351_vm12, %v1475_v45, %v1477_v46  ;;  %v1482_v53 = vsel %vm356_vm13, %v1475_v45, %v1477_v46  ;;  %v1485_v54 = vsel %vm360_vm14, %v1475_v45, %v1477_v46  ;;  %v1488_v57 = vsel %vm364_vm15, %v1475_v45, %v1477_v46 }
 0x42f   :  { %v1484_v58 = vrot.slane %v1482_v53, 1  ;;  %v1487_v1 = vrot.slane %v1485_v54, 2  ;;  %v1490_v2 = vrot.slane %v1488_v57, 3  ;;  %v1492_v6 = vunpack.i.h.s16 %v1480_v52 }
 0x430   :  { %v2219_v9 = vpack.i.b16 %v1480_v52, %v1480_v52 }
 0x431   :  { %v1494_v19 = vunpack.i.h.s16 %v1484_v58  ;;  %v1496_v20 = vunpack.i.h.s16 %v1487_v1  ;;  %v1498_v24 = vunpack.i.h.s16 %v1490_v2  ;;  %v1500_v25 = vpack.i.b16 %v1492_v6, %v1492_v6 }
 0x432   :  { %v2220_v38 = vpack.i.b16 %v1484_v58, %v1484_v58  ;;  %v2221_v39 = vpack.i.b16 %v1487_v1, %v1487_v1  ;;  %v2222_v40 = vpack.i.b16 %v1490_v2, %v1490_v2  ;;  %v1510_v48 = vperm.slane %v2219_v9, %v2810_v60 }
 0x433   :  { %v1502_v23 = vpack.i.b16 %v1494_v19, %v1494_v19  ;;  %v1504_v29 = vpack.i.b16 %v1496_v20, %v1496_v20  ;;  %v1506_v43 = vpack.i.b16 %v1498_v24, %v1498_v24  ;;  %v1514_v10 = vperm.slane %v1500_v25, %v2810_v60 }
 0x434   :  { %v1518_v27 = vperm.slane %v2220_v38, %v2810_v60  ;;  %v1526_v3 = vperm.slane %v2221_v39, %v2810_v60  ;;  %v1534_v37 = vperm.slane %v2222_v40, %v2810_v60  ;;  %v1550_v7 = vsel %vm3432_vm11, %v1510_v48, %v1549_v35 }
 0x435   :  { %v1522_v50 = vperm.slane %v1502_v23, %v2810_v60  ;;  %v1530_v55 = vperm.slane %v1504_v29, %v2810_v60  ;;  %v1538_v44 = vperm.slane %v1506_v43, %v2810_v60  ;;  %1551 = vst [vmem:[%s3697_s4] sm:$0x4] %v1550_v7  ;;  %v1553_v21 = vsel %vm3432_vm11, %v1514_v10, %v1552_v49 }
 0x436   :  { %1554 = vst [vmem:[%s3697_s4 + $0x4] sm:$0x4] %v1553_v21  ;;  %v1556_v47 = vsel %vm3432_vm11, %v1518_v27, %v1555_v8  ;;  %v1562_v16 = vsel %vm3432_vm11, %v1526_v3, %v1561_v22  ;;  %v1568_v13 = vsel %vm3432_vm11, %v1534_v37, %v1567_v0  ;;  %v1578_v1 = vunpack.c.l.bf16 %v2224_v14 }
 0x437   :  { %1557 = vst [vmem:[%s3697_s4 + $0x8] sm:$0x4] %v1556_v47  ;;  %v1559_v63 = vsel %vm3432_vm11, %v1522_v50, %v1558_v12  ;;  %v1565_v30 = vsel %vm3432_vm11, %v1530_v55, %v1564_v56  ;;  %v1571_v51 = vsel %vm3432_vm11, %v1538_v44, %v1570_v59 }
 0x438   :  { %1560 = vst [vmem:[%s3697_s4 + $0xc] sm:$0x4] %v1559_v63 }
 0x439   :  { %1563 = vst [vmem:[%s3697_s4 + $0x10] sm:$0x4] %v1562_v16 }
 0x43a   :  { %1566 = vst [vmem:[%s3697_s4 + $0x14] sm:$0x4] %v1565_v30 }
 0x43b   :  { %1569 = vst [vmem:[%s3697_s4 + $0x18] sm:$0x4] %v1568_v13 }
 0x43c   :  { %1572 = vst [vmem:[%s3697_s4 + $0x1c] sm:$0x4] %v1571_v51 }
 0x4a9   :  { %v1589_v62 = vpop.f32.mrf.mxu0  ;;  %v1602_v15 = vpop.f32.mrf.mxu1 }
 0x4aa   :  { %v1632_v61 = vadd.f32 %v1589_v62, %v1576_v17  ;;  %v1633_v18 = vadd.f32 %v1602_v15, %v1577_v5 }
 0x4ac   :  { %v2225_v31 = vmul.f32 -1.442695, %v1632_v61  ;;  %v2226_v28 = vmul.f32 -1.442695, %v1633_v18 }
 0x4ae   :  { %2370 = vpow2.f32 %v2225_v31 }
 0x4af   :  { %2372 = vpow2.f32 %v2226_v28 }
 0x4b0   :  { %v1615_v11 = vpop.f32.mrf.mxu2  ;;  %v1628_v33 = vpop.f32.mrf.mxu3 }
 0x4b1   :  { %v1635_v42 = vadd.f32 %v1628_v33, %v1579_v32  ;;  %v1591_v4 = vpop.f32.mrf.mxu0  ;;  %v1604_v41 = vpop.f32.mrf.mxu1  ;;  %v1634_v19 = vadd.f32 %v1615_v11, %v1578_v1 }
 0x4b3   :  { %v2227_v45 = vmul.f32 -1.442695, %v1635_v42 }
 0x4b4   :  { %v2371_v46 = vpop.eup %2370 }
 0x4b5   :  { %v2373_v52 = vpop.eup %2372  ;;  %v1639_v53 = vadd.f32 1.0, %v2371_v46  ;;  %2374 = vpow2.f32 %v2227_v45  ;;  %v1774_v45 = vld [vmem:[%s3697_s4] sm:$0x8] }
 0x4b6   :  { %v1658_v54 = vadd.f32 1.0, %v2373_v52 }
 0x4b7   :  { %2376 = vrcp.f32 %v1639_v53  ;;  %v1651_v39 = vand.u32 2147483648, %v1639_v53  ;;  %v1649_v23 = vand.u32 2147483647, %v1639_v53  ;;  %vm1645_vm2 = vweird.f32 %v1639_v53 }
 0x4b8   :  { %2378 = vrcp.f32 %v1658_v54  ;;  %v1617_v57 = vpop.f32.mrf.mxu2  ;;  %v1630_v58 = vpop.f32.mrf.mxu3  ;;  %v1670_v40 = vand.u32 2147483648, %v1658_v54  ;;  %v1668_v43 = vand.u32 2147483647, %v1658_v54  ;;  %vm1664_vm3 = vweird.f32 %v1658_v54 }
 0x4b9   :  { %v1652_v27 = vor.u32 1.1754944e-38, %v1651_v39  ;;  %vm1650_vm6 = vcmp.eq.f32.partialorder %v1649_v23, 8.507059e+37  ;;  %v1777_v57 = vld [vmem:[%s3697_s4 + $0x4] sm:$0x8]  ;;  %v1789_v39 = vld [vmem:[%s3697_s4 + $0x14] sm:$0x8] }
 0x4ba   :  { %v1671_v7 = vor.u32 1.1754944e-38, %v1670_v40  ;;  %vm1669_vm7 = vcmp.eq.f32.partialorder %v1668_v43, 8.507059e+37  ;;  %v1792_v43 = vld [vmem:[%s3697_s4 + $0x18] sm:$0x8] }
 0x4bb   :  { %v2375_v2 = vpop.eup %2374 }
 0x4bc   :  { %v1678_v6 = vadd.f32 1.0, %v2375_v2 }
 0x4bd   :  { %v2377_v9 = vpop.eup %2376 }
 0x4be   :  { %v2379_v20 = vpop.eup %2378  ;;  %v1641_v24 = vmul.f32 %v2377_v9, %v1639_v53  ;;  %2380 = vrcp.f32 %v1678_v6  ;;  %vm1646_vm0 = vweird.f32 %v2377_v9  ;;  %v1690_v63 = vand.u32 2147483648, %v1678_v6 }
 0x4bf   :  { %v1660_v25 = vmul.f32 %v2379_v20, %v1658_v54  ;;  %2382 = vtanh.f32 %v1634_v19  ;;  %vm1665_vm1 = vweird.f32 %v2379_v20  ;;  %vm1647_vm4 = vmor %vm1645_vm2, %vm1646_vm0  ;;  %vm1684_vm9 = vweird.f32 %v1678_v6  ;;  %v1786_v19 = vld [vmem:[%s3697_s4 + $0x10] sm:$0x8] }
 0x4c0   :  { %v1642_v36 = vsub.f32 1.0, %v1641_v24  ;;  %vm1666_vm5 = vmor %vm1664_vm3, %vm1665_vm1  ;;  %v1688_v30 = vand.u32 2147483647, %v1678_v6  ;;  %v1691_v13 = vor.u32 1.1754944e-38, %v1690_v63  ;;  %vm1772_vm0 = vsmask.f32 3328 }
 0x4c1   :  { %v1661_v38 = vsub.f32 1.0, %v1660_v25  ;;  %vm3523_vm1 = vmand %vm364_vm15, %vm1772_vm0 }
 0x4c2   :  { %v1643_v48 = vmul.f32 %v2377_v9, %v1642_v36  ;;  %vm1689_vm11 = vcmp.eq.f32.partialorder %v1688_v30, 8.507059e+37 }
 0x4c3   :  { %v1662_v29 = vmul.f32 %v2379_v20, %v1661_v38  ;;  %v1783_v38 = vld [vmem:[%s3697_s4 + $0xc] sm:$0x8] }
 0x4c4   :  { %v2381_v10 = vpop.eup %2380  ;;  %v1644_v35 = vadd.f32 %v2377_v9, %v1643_v48 }
 0x4c5   :  { %v1663_v3 = vadd.f32 %v2379_v20, %v1662_v29  ;;  %v1680_v37 = vmul.f32 %v2381_v10, %v1678_v6  ;;  %v2383_v50 = vpop.eup %2382  ;;  %vm1685_vm8 = vweird.f32 %v2381_v10 }
 0x4c6   :  { %v1648_v49 = vsel %vm1647_vm4, %v2377_v9, %v1644_v35  ;;  %vm1686_vm10 = vmor %vm1684_vm9, %vm1685_vm8  ;;  %v1780_v9 = vld [vmem:[%s3697_s4 + $0x8] sm:$0x8] }
 0x4c7   :  { %v1653_v55 = vsel %vm1650_vm6, %v1652_v27, %v1648_v49  ;;  %v1667_v44 = vsel %vm1666_vm5, %v2379_v20, %v1663_v3  ;;  %v1681_v21 = vsub.f32 1.0, %v1680_v37  ;;  %v1795_v27 = vld [vmem:[%s3697_s4 + $0x1c] sm:$0x8] }
 0x4c8   :  { %v1672_v8 = vsel %vm1669_vm7, %v1671_v7, %v1667_v44  ;;  %v1695_v22 = vmul.f32 %v2383_v50, %v1653_v55  ;;  %v2232_v50 = vld [vmem:[%s3695_s0 + $0x70] sm:$0xff] }
 0x4c9   :  { %v1694_v47 = vmul.f32 %v1672_v8, %v3424_v26  ;;  %v1682_v12 = vmul.f32 %v2381_v10, %v1681_v21  ;;  %v1801_v55 = vunpack.c.l.bf16 %v2232_v50  ;;  %v1802_v44 = vunpack.c.h.bf16 %v2232_v50 }
 0x4cb   :  { %v3515_v16 = vadd.f32 %v1695_v22, %v1694_v47  ;;  %v1683_v56 = vadd.f32 %v2381_v10, %v1682_v12  ;;  %v2233_v12 = vld [vmem:[%s3695_s0 + $0x78] sm:$0xff] }
 0x4cc   :  { %v1804_v30 = vunpack.c.h.bf16 %v2233_v12 }
 0x4cd   :  { %2384 = vtanh.f32 %v3515_v16  ;;  %v1687_v0 = vsel %vm1686_vm10, %v2381_v10, %v1683_v56 }
 0x4ce   :  { %v1692_v51 = vsel %vm1689_vm11, %v1691_v13, %v1687_v0 }
 0x4d3   :  { %v2385_v59 = vpop.eup %2384 }
 0x4d4   :  { %v1698_v34 = vmul.f32 %v2385_v59, %v1692_v51 }
 0x4d6   :  { %v1699_v17 = vpack.c.bf16 %v1698_v34, %v1698_v34 }
 0x4d8   :  { %v1701_v5 = vrot.slane %v1699_v17, 3  ;;  %1813 = vmatmul.bf16.vlgmr.msrb.gmra.mxu0 %v1699_v17  ;;  %1826 = vmatmul.bf16.vlgmr.msrb.gmra.mxu1 %v1699_v17 }
 0x4d9   :  { %1839 = vmatmul.bf16.vlgmr.msrb.gmra.mxu2 %v1699_v17  ;;  %1852 = vmatmul.bf16.vlgmr.msrb.gmra.mxu3 %v1699_v17 }
 0x4da   :  { %v1704_v26 = vsel %vm351_vm12, %v1699_v17, %v1701_v5  ;;  %v1706_v62 = vsel %vm356_vm13, %v1699_v17, %v1701_v5  ;;  %v1709_v15 = vsel %vm360_vm14, %v1699_v17, %v1701_v5  ;;  %v1712_v61 = vsel %vm364_vm15, %v1699_v17, %v1701_v5 }
 0x4db   :  { %v1708_v18 = vrot.slane %v1706_v62, 1  ;;  %v1711_v14 = vrot.slane %v1709_v15, 2  ;;  %v1714_v31 = vrot.slane %v1712_v61, 3  ;;  %v1716_v28 = vunpack.i.h.s16 %v1704_v26 }
 0x4dc   :  { %v2228_v32 = vpack.i.b16 %v1704_v26, %v1704_v26 }
 0x4dd   :  { %v1718_v11 = vunpack.i.h.s16 %v1708_v18  ;;  %v1720_v33 = vunpack.i.h.s16 %v1711_v14  ;;  %v1722_v42 = vunpack.i.h.s16 %v1714_v31  ;;  %v1724_v4 = vpack.i.b16 %v1716_v28, %v1716_v28 }
 0x4de   :  { %v2229_v46 = vpack.i.b16 %v1708_v18, %v1708_v18  ;;  %v2230_v52 = vpack.i.b16 %v1711_v14, %v1711_v14  ;;  %v2231_v53 = vpack.i.b16 %v1714_v31, %v1714_v31  ;;  %v1734_v54 = vperm.slane %v2228_v32, %v2810_v60 }
 0x4df   :  { %v1726_v58 = vpack.i.b16 %v1718_v11, %v1718_v11  ;;  %v1728_v1 = vpack.i.b16 %v1720_v33, %v1720_v33  ;;  %v1730_v2 = vpack.i.b16 %v1722_v42, %v1722_v42  ;;  %v1738_v6 = vperm.slane %v1724_v4, %v2810_v60 }
 0x4e0   :  { %v1742_v20 = vperm.slane %v2229_v46, %v2810_v60  ;;  %v1750_v24 = vperm.slane %v2230_v52, %v2810_v60  ;;  %v1758_v25 = vperm.slane %v2231_v53, %v2810_v60  ;;  %v1775_v36 = vsel %vm3523_vm1, %v1734_v54, %v1774_v45 }
 0x4e1   :  { %v1746_v40 = vperm.slane %v1726_v58, %v2810_v60  ;;  %v1754_v48 = vperm.slane %v1728_v1, %v2810_v60  ;;  %v1762_v23 = vperm.slane %v1730_v2, %v2810_v60  ;;  %1776 = vst [vmem:[%s3697_s4] sm:$0x8] %v1775_v36  ;;  %v1778_v29 = vsel %vm3523_vm1, %v1738_v6, %v1777_v57 }
 0x4e2   :  { %1779 = vst [vmem:[%s3697_s4 + $0x4] sm:$0x8] %v1778_v29  ;;  %v1781_v10 = vsel %vm3523_vm1, %v1742_v20, %v1780_v9  ;;  %v1787_v35 = vsel %vm3523_vm1, %v1750_v24, %v1786_v19  ;;  %v1793_v7 = vsel %vm3523_vm1, %v1758_v25, %v1792_v43  ;;  %v1803_v14 = vunpack.c.l.bf16 %v2233_v12 }
 0x4e3   :  { %1782 = vst [vmem:[%s3697_s4 + $0x8] sm:$0x8] %v1781_v10  ;;  %v1784_v3 = vsel %vm3523_vm1, %v1746_v40, %v1783_v38  ;;  %v1790_v37 = vsel %vm3523_vm1, %v1754_v48, %v1789_v39  ;;  %v1796_v49 = vsel %vm3523_vm1, %v1762_v23, %v1795_v27 }
 0x4e4   :  { %1785 = vst [vmem:[%s3697_s4 + $0xc] sm:$0x8] %v1784_v3 }
 0x4e5   :  { %1788 = vst [vmem:[%s3697_s4 + $0x10] sm:$0x8] %v1787_v35 }
 0x4e6   :  { %1791 = vst [vmem:[%s3697_s4 + $0x14] sm:$0x8] %v1790_v37 }
 0x4e7   :  { %1794 = vst [vmem:[%s3697_s4 + $0x18] sm:$0x8] %v1793_v7 }
 0x4e8   :  { %1797 = vst [vmem:[%s3697_s4 + $0x1c] sm:$0x8] %v1796_v49 }
 0x555   :  { %v1814_v21 = vpop.f32.mrf.mxu0  ;;  %v1827_v8 = vpop.f32.mrf.mxu1 }
 0x556   :  { %v1857_v22 = vadd.f32 %v1814_v21, %v1801_v55  ;;  %v1858_v47 = vadd.f32 %v1827_v8, %v1802_v44 }
 0x558   :  { %v2234_v56 = vmul.f32 -1.442695, %v1857_v22  ;;  %v2235_v63 = vmul.f32 -1.442695, %v1858_v47 }
 0x55a   :  { %2386 = vpow2.f32 %v2234_v56 }
 0x55b   :  { %2388 = vpow2.f32 %v2235_v63 }
 0x55c   :  { %v1840_v0 = vpop.f32.mrf.mxu2  ;;  %v1853_v13 = vpop.f32.mrf.mxu3 }
 0x55d   :  { %v1860_v59 = vadd.f32 %v1853_v13, %v1804_v30  ;;  %v1816_v51 = vpop.f32.mrf.mxu0  ;;  %v1829_v34 = vpop.f32.mrf.mxu1  ;;  %v1859_v11 = vadd.f32 %v1840_v0, %v1803_v14 }
 0x55f   :  { %v2236_v17 = vmul.f32 -1.442695, %v1860_v59 }
 0x560   :  { %v2387_v5 = vpop.eup %2386 }
 0x561   :  { %v2389_v26 = vpop.eup %2388  ;;  %v1864_v62 = vadd.f32 1.0, %v2387_v5  ;;  %2390 = vpow2.f32 %v2236_v17 }
 0x562   :  { %v1883_v15 = vadd.f32 1.0, %v2389_v26 }
 0x563   :  { %2392 = vrcp.f32 %v1864_v62  ;;  %v1876_v46 = vand.u32 2147483648, %v1864_v62  ;;  %v1874_v54 = vand.u32 2147483647, %v1864_v62  ;;  %vm1870_vm4 = vweird.f32 %v1864_v62 }
 0x564   :  { %2394 = vrcp.f32 %v1883_v15  ;;  %v1842_v61 = vpop.f32.mrf.mxu2  ;;  %v1855_v18 = vpop.f32.mrf.mxu3  ;;  %v1895_v52 = vand.u32 2147483648, %v1883_v15  ;;  %v1893_v58 = vand.u32 2147483647, %v1883_v15  ;;  %vm1889_vm5 = vweird.f32 %v1883_v15 }
 0x565   :  { %v1877_v6 = vor.u32 1.1754944e-38, %v1876_v46  ;;  %vm1875_vm8 = vcmp.eq.f32.partialorder %v1874_v54, 8.507059e+37  ;;  %v2007_v54 = vld [vmem:[%s3697_s4 + $0xc] sm:$0x8] }
 0x566   :  { %v1896_v20 = vor.u32 1.1754944e-38, %v1895_v52  ;;  %vm1894_vm9 = vcmp.eq.f32.partialorder %v1893_v58, 8.507059e+37  ;;  %v2004_v52 = vld [vmem:[%s3697_s4 + $0x8] sm:$0x8]  ;;  %v2013_v58 = vld [vmem:[%s3697_s4 + $0x14] sm:$0x8] }
 0x567   :  { %v2391_v31 = vpop.eup %2390 }
 0x568   :  { %v1903_v28 = vadd.f32 1.0, %v2391_v31  ;;  %v1998_v31 = vld [vmem:[%s3697_s4] sm:$0x8] }
 0x569   :  { %v2393_v32 = vpop.eup %2392 }
 0x56a   :  { %v2395_v33 = vpop.eup %2394  ;;  %v1866_v42 = vmul.f32 %v2393_v32, %v1864_v62  ;;  %2396 = vrcp.f32 %v1903_v28  ;;  %vm1871_vm2 = vweird.f32 %v2393_v32  ;;  %v1915_v35 = vand.u32 2147483648, %v1903_v28 }
 0x56b   :  { %v1885_v4 = vmul.f32 %v2395_v33, %v1883_v15  ;;  %2398 = vtanh.f32 %v1859_v11  ;;  %vm1890_vm3 = vweird.f32 %v2395_v33  ;;  %vm1872_vm6 = vmor %vm1870_vm4, %vm1871_vm2  ;;  %vm1909_vm11 = vweird.f32 %v1903_v28 }
 0x56c   :  { %v1867_v41 = vsub.f32 1.0, %v1866_v42  ;;  %vm1891_vm7 = vmor %vm1889_vm5, %vm1890_vm3  ;;  %v1913_v27 = vand.u32 2147483647, %v1903_v28  ;;  %v1916_v37 = vor.u32 1.1754944e-38, %v1915_v35  ;;  %vm1996_vm2 = vsmask.f32 7950 }
 0x56d   :  { %v1886_v45 = vsub.f32 1.0, %v1885_v4  ;;  %vm3617_vm3 = vmand %vm364_vm15, %vm1996_vm2  ;;  %v2001_v42 = vld [vmem:[%s3697_s4 + $0x4] sm:$0x8] }
 0x56e   :  { %v1868_v53 = vmul.f32 %v2393_v32, %v1867_v41  ;;  %vm1914_vm1 = vcmp.eq.f32.partialorder %v1913_v27, 8.507059e+37 }
 0x56f   :  { %v1887_v57 = vmul.f32 %v2395_v33, %v1886_v45 }
 0x570   :  { %v2397_v1 = vpop.eup %2396  ;;  %v1869_v2 = vadd.f32 %v2393_v32, %v1868_v53  ;;  %v2010_v53 = vld [vmem:[%s3697_s4 + $0x10] sm:$0x8] }
 0x571   :  { %v1888_v9 = vadd.f32 %v2395_v33, %v1887_v57  ;;  %v1905_v19 = vmul.f32 %v2397_v1, %v1903_v28  ;;  %v2399_v25 = vpop.eup %2398  ;;  %vm1910_vm10 = vweird.f32 %v2397_v1 }
 0x572   :  { %v1873_v24 = vsel %vm1872_vm6, %v2393_v32, %v1869_v2  ;;  %vm1911_vm0 = vmor %vm1909_vm11, %vm1910_vm10 }
 0x573   :  { %v1878_v36 = vsel %vm1875_vm8, %v1877_v6, %v1873_v24  ;;  %v1892_v38 = vsel %vm1891_vm7, %v2395_v33, %v1888_v9  ;;  %v1906_v39 = vsub.f32 1.0, %v1905_v19  ;;  %v2016_v6 = vld [vmem:[%s3697_s4 + $0x18] sm:$0x8]  ;;  %v2019_v19 = vld [vmem:[%s3697_s4 + $0x1c] sm:$0x8] }
 0x574   :  { %v1897_v40 = vsel %vm1894_vm9, %v1896_v20, %v1892_v38  ;;  %v1920_v48 = vmul.f32 %v2399_v25, %v1878_v36 }
 0x575   :  { %v1919_v23 = vmul.f32 %v1897_v40, %v3515_v16  ;;  %v1907_v29 = vmul.f32 %v2397_v1, %v1906_v39 }
 0x577   :  { %v1921_v43 = vadd.f32 %v1920_v48, %v1919_v23  ;;  %v1908_v10 = vadd.f32 %v2397_v1, %v1907_v29 }
 0x579   :  { %2400 = vtanh.f32 %v1921_v43  ;;  %2030 = vst [vmem:[%s3698_s6] sm:$0xff] %v1921_v43  ;;  %v1912_v3 = vsel %vm1911_vm0, %v2397_v1, %v1908_v10 }
 0x57a   :  { %v1917_v49 = vsel %vm1914_vm1, %v1916_v37, %v1912_v3 }
 0x57f   :  { %v2401_v7 = vpop.eup %2400 }
 0x580   :  { %v1923_v50 = vmul.f32 %v2401_v7, %v1917_v49 }
 0x582   :  { %v1924_v16 = vpack.c.bf16 %v1923_v50, %v1923_v50  ;;  %2028 = vst [vmem:[%s3699_s5] sm:$0xff] %v1923_v50 }
 0x584   :  { %v1926_v55 = vrot.slane %v1924_v16, 3 }
 0x586   :  { %v1929_v44 = vsel %vm351_vm12, %v1924_v16, %v1926_v55  ;;  %v1931_v21 = vsel %vm356_vm13, %v1924_v16, %v1926_v55  ;;  %v1934_v8 = vsel %vm360_vm14, %v1924_v16, %v1926_v55  ;;  %v1937_v22 = vsel %vm364_vm15, %v1924_v16, %v1926_v55 }
 0x587   :  { %v1933_v47 = vrot.slane %v1931_v21, 1  ;;  %v1936_v12 = vrot.slane %v1934_v8, 2  ;;  %v1939_v56 = vrot.slane %v1937_v22, 3  ;;  %v1941_v63 = vunpack.i.h.s16 %v1929_v44 }
 0x588   :  { %v2237_v30 = vpack.i.b16 %v1929_v44, %v1929_v44 }
 0x589   :  { %v1943_v0 = vunpack.i.h.s16 %v1933_v47  ;;  %v1945_v13 = vunpack.i.h.s16 %v1936_v12  ;;  %v1947_v59 = vunpack.i.h.s16 %v1939_v56  ;;  %v1949_v51 = vpack.i.b16 %v1941_v63, %v1941_v63 }
 0x58a   :  { %v2238_v17 = vpack.i.b16 %v1933_v47, %v1933_v47  ;;  %v2239_v5 = vpack.i.b16 %v1936_v12, %v1936_v12  ;;  %v2240_v26 = vpack.i.b16 %v1939_v56, %v1939_v56  ;;  %v1959_v62 = vperm.slane %v2237_v30, %v2810_v60 }
 0x58b   :  { %v1951_v15 = vpack.i.b16 %v1943_v0, %v1943_v0  ;;  %v1953_v61 = vpack.i.b16 %v1945_v13, %v1945_v13  ;;  %v1955_v18 = vpack.i.b16 %v1947_v59, %v1947_v59  ;;  %v1963_v14 = vperm.slane %v1949_v51, %v2810_v60 }
 0x58c   :  { %v1967_v28 = vperm.slane %v2238_v17, %v2810_v60  ;;  %v1975_v32 = vperm.slane %v2239_v5, %v2810_v60  ;;  %v1983_v11 = vperm.slane %v2240_v26, %v2810_v60  ;;  %v1999_v33 = vsel %vm3617_vm3, %v1959_v62, %v1998_v31 }
 0x58d   :  { %v1971_v4 = vperm.slane %v1951_v15, %v2810_v60  ;;  %v1979_v41 = vperm.slane %v1953_v61, %v2810_v60  ;;  %v1987_v45 = vperm.slane %v1955_v18, %v2810_v60  ;;  %2000 = vst [vmem:[%s3697_s4] sm:$0x8] %v1999_v33  ;;  %v2002_v46 = vsel %vm3617_vm3, %v1963_v14, %v2001_v42 }
 0x58e   :  { %2003 = vst [vmem:[%s3697_s4 + $0x4] sm:$0x8] %v2002_v46  ;;  %v2005_v60 = vsel %vm3617_vm3, %v1967_v28, %v2004_v52  ;;  %v2011_v57 = vsel %vm3617_vm3, %v1975_v32, %v2010_v53  ;;  %v2017_v9 = vsel %vm3617_vm3, %v1983_v11, %v2016_v6 }
 0x58f   :  { %2006 = vst [vmem:[%s3697_s4 + $0x8] sm:$0x8] %v2005_v60  ;;  %v2008_v1 = vsel %vm3617_vm3, %v1971_v4, %v2007_v54  ;;  %v2014_v2 = vsel %vm3617_vm3, %v1979_v41, %v2013_v58  ;;  %v2020_v20 = vsel %vm3617_vm3, %v1987_v45, %v2019_v19 }
 0x590   :  { %2009 = vst [vmem:[%s3697_s4 + $0xc] sm:$0x8] %v2008_v1 }
 0x591   :  { %2012 = vst [vmem:[%s3697_s4 + $0x10] sm:$0x8] %v2011_v57 }
 0x592   :  { %2015 = vst [vmem:[%s3697_s4 + $0x14] sm:$0x8] %v2014_v2 }
 0x593   :  { %2018 = vst [vmem:[%s3697_s4 + $0x18] sm:$0x8] %v2017_v9 }
 0x594   :  { %2021 = vst [vmem:[%s3697_s4 + $0x1c] sm:$0x8] %v2020_v20 }

</bundles_post_ra>
